<compile_context>
chip_gen: v5e
topology: v5e:2x2
jax: 0.10.0
libtpu: 0.0.40
codegen_flags: <defaults>
</compile_context>

<pallas_src>
import jax
import jax.numpy as jnp
from jax import lax
from jax.experimental import pallas as pl
from jax.experimental.pallas import tpu as pltpu

# ----------------------------- model config ---------------------------------
B = 2                 # batch
C = 3                 # image channels (RGB, matches CLIP mean/std)
IMG = 16              # image size
PATCH = 4             # patch size
GRID = IMG // PATCH   # 4
NUM_PATCHES = GRID * GRID       # 16
SEQ = NUM_PATCHES + 1           # 17  (CLS + patches)
SEQ_PAD = 24                    # per-image sequence padded to a multiple of 8
BSEQ = B * SEQ_PAD              # 48  batch stacked along sublanes
PATCH_DIM = C * PATCH * PATCH   # 48
HID = 32              # hidden size
HEADS = 2
HEAD_DIM = HID // HEADS         # 16
INTER = 4 * HID                 # 128 (CLIP MLP ratio = 4)
PROJ = 16             # visual projection dim
LAYERS = 2
EPS = 1e-5

# CLIP processor normalization constants
CLIP_MEAN = jnp.array([0.48145466, 0.4578275, 0.40821073], dtype=jnp.float32)
CLIP_STD = jnp.array([0.26862954, 0.26130258, 0.27577711], dtype=jnp.float32)

# ----------------------- packed small-vector slab layout ---------------------
VEC_W = 128                                   # lane width of the packed slab
ROW_LN_PRE_G, ROW_LN_PRE_B, ROW_LN_POST_G, ROW_LN_POST_B = 0, 1, 2, 3
LAYER_ROW_BASE = 4
ROWS_PER_LAYER = 8
(OFF_LN1_G, OFF_LN1_B, OFF_BQKV, OFF_BO,
 OFF_LN2_G, OFF_LN2_B, OFF_B1, OFF_B2) = range(ROWS_PER_LAYER)
VEC_ROWS_RAW = LAYER_ROW_BASE + ROWS_PER_LAYER * LAYERS      # 20
VEC_ROWS = ((VEC_ROWS_RAW + 7) // 8) * 8                     # 24 (sublane aligned)


# ----------------------------- fused pallas kernel ---------------------------
def _layernorm(x, g, b):
    mu = jnp.mean(x, axis=-1, keepdims=True)
    var = jnp.mean((x - mu) ** 2, axis=-1, keepdims=True)
    return (x - mu) * lax.rsqrt(var + EPS) * g + b


def clip_fused_kernel(
    patches_ref,     # (BSEQ, PATCH_DIM)   rows 0 / >= SEQ of each image block are zero
    w_pe_ref,        # (PATCH_DIM, HID)    = w_patch / std (normalize folded in)
    add_ref,         # (BSEQ, HID)         = cls+pos0 | pos[1:] + (-mean/std)@W | 0 (tiled per image)
    vecs_ref,        # (VEC_ROWS, VEC_W)   packed ln/bias vectors, lane-padded
    mask_ref,        # (BSEQ, BSEQ)        block-diag (same image) & valid-key mask, else -1e9
    wqkv_ref,        # (LAYERS, HID, 3*HID)  [Q part pre-scaled by 1/sqrt(HEAD_DIM)]
    wo_ref,          # (LAYERS, HID, HID)
    w1_ref,          # (LAYERS, HID, INTER)
    w2_ref,          # (LAYERS, INTER, HID)
    w_proj_ref,      # (HID, PROJ)
    out_ref,         # (B, PROJ)
):
    def vec(row, width):
        return vecs_ref[row:row + 1, 0:width]            # (1, width), broadcast over rows

    # --- embeddings: normalize + conv-as-matmul + CLS + pos via one matmul+add ---
    x = jnp.dot(patches_ref[...], w_pe_ref[...],
                preferred_element_type=jnp.float32) + add_ref[...]      # (BSEQ, HID)
    x = _layernorm(x, vec(ROW_LN_PRE_G, HID), vec(ROW_LN_PRE_B, HID))   # CLIP pre_layrnorm
    mask = mask_ref[...]                                                # (BSEQ, BSEQ)

    for l in range(LAYERS):                                             # static unroll (LAYERS=2)
        base = LAYER_ROW_BASE + l * ROWS_PER_LAYER

        # ---- self-attention block ----
        xn = _layernorm(x, vec(base + OFF_LN1_G, HID), vec(base + OFF_LN1_B, HID))
        qkv = jnp.dot(xn, wqkv_ref[l],
                      preferred_element_type=jnp.float32) + vec(base + OFF_BQKV, 3 * HID)
        head_outs = []
        for h in range(HEADS):                                          # static unroll
            qh = qkv[:, h * HEAD_DIM:(h + 1) * HEAD_DIM]
            kh = qkv[:, HID + h * HEAD_DIM:HID + (h + 1) * HEAD_DIM]
            vh = qkv[:, 2 * HID + h * HEAD_DIM:2 * HID + (h + 1) * HEAD_DIM]
            # scores = q @ k.T  (contract last dims), (BSEQ, BSEQ)
            s = lax.dot_general(qh, kh, (((1,), (1,)), ((), ())),
                                preferred_element_type=jnp.float32) + mask
            s = s - jnp.max(s, axis=-1, keepdims=True)   # keep: guards padded/query rows
            e = jnp.exp(s)
            p = e / jnp.sum(e, axis=-1, keepdims=True)   # exact reciprocal for fidelity
            head_outs.append(jnp.dot(p, vh, preferred_element_type=jnp.float32))
        attn = jnp.concatenate(head_outs, axis=-1)                       # (BSEQ, HID)
        x = x + jnp.dot(attn, wo_ref[l],
                        preferred_element_type=jnp.float32) + vec(base + OFF_BO, HID)

        # ---- MLP block ----
        xn2 = _layernorm(x, vec(base + OFF_LN2_G, HID), vec(base + OFF_LN2_B, HID))
        hmid = jnp.dot(xn2, w1_ref[l],
                       preferred_element_type=jnp.float32) + vec(base + OFF_B1, INTER)
        hmid = hmid * jax.nn.sigmoid(1.702 * hmid)                       # CLIP quick_gelu
        x = x + jnp.dot(hmid, w2_ref[l],
                        preferred_element_type=jnp.float32) + vec(base + OFF_B2, HID)

    # ---- pooled head: post_layernorm(CLS rows) @ visual_projection (no bias) ----
    cls = jnp.concatenate([x[b * SEQ_PAD:b * SEQ_PAD + 1, :] for b in range(B)], axis=0)
    cls_n = _layernorm(cls, vec(ROW_LN_POST_G, HID), vec(ROW_LN_POST_B, HID))
    out_ref[...] = jnp.dot(cls_n, w_proj_ref[...], preferred_element_type=jnp.float32)


# ----------------------------- pallas_call wrapper ----------------------------
def clip_forward_fused(patches, fp):
    # Grid-less call: whole (tiny, <1 MiB) working set resident in VMEM; one
    # invocation for the full batch -> no per-grid-step overhead on single-TC chips.
    return pl.pallas_call(
        clip_fused_kernel,
        out_shape=jax.ShapeDtypeStruct((B, PROJ), jnp.float32),
        compiler_params=pltpu.CompilerParams(vmem_limit_bytes=32 * 1024 * 1024),
    )(patches, fp["w_pe"], fp["add"], fp["vecs"], fp["mask"],
      fp["wqkv"], fp["wo"], fp["w1"], fp["w2"], fp["w_proj"])


# ----------------------------- glue (plain JAX) -------------------------------
def extract_patches_stacked(x_nchw):
    # (B, C, IMG, IMG) -> (B*SEQ_PAD, C*PATCH*PATCH); row 0 (CLS slot) and rows
    # >= SEQ of each image block are zero, so the in-kernel matmul+add yields
    # cls+pos / zeros there.
    x = x_nchw.reshape(B, C, GRID, PATCH, GRID, PATCH)
    x = x.transpose(0, 2, 4, 1, 3, 5)                 # (B, gh, gw, c, ph, pw)
    x = x.reshape(B, NUM_PATCHES, PATCH_DIM)
    x = jnp.pad(x, ((0, 0), (1, SEQ_PAD - SEQ), (0, 0)))   # (B, SEQ_PAD, PATCH_DIM)
    return x.reshape(BSEQ, PATCH_DIM)


def init_params(key):
    ks = iter(jax.random.split(key, 64))
    n = lambda shape, s=0.02: jax.random.normal(next(ks), shape, jnp.float32) * s
    raw = {
        # conv2d(C, HID, k=PATCH, stride=PATCH, bias=False) flattened to a matmul
        "w_patch": n((PATCH_DIM, HID)),
        "cls": n((1, HID)),
        "pos": n((SEQ, HID)),
        "ln_pre_g": jnp.ones((HID,), jnp.float32),
        "ln_pre_b": n((HID,)),
        "ln_post_g": jnp.ones((HID,), jnp.float32),
        "ln_post_b": n((HID,)),
        "w_proj": n((HID, PROJ)),
        "layers": [],
    }
    for _ in range(LAYERS):
        raw["layers"].append({
            "ln1_g": jnp.ones((HID,), jnp.float32), "ln1_b": n((HID,)),
            "wq": n((HID, HID)), "bq": n((HID,)),
            "wk": n((HID, HID)), "bk": n((HID,)),
            "wv": n((HID, HID)), "bv": n((HID,)),
            "wo": n((HID, HID)), "bo": n((HID,)),
            "ln2_g": jnp.ones((HID,), jnp.float32), "ln2_b": n((HID,)),
            "w1": n((HID, INTER)), "b1": n((INTER,)),
            "w2": n((INTER, HID)), "b2": n((HID,)),
        })
    return raw


def fuse_params(raw):
    # Fold processor normalization into the patch-embedding weights, fold the
    # attention scale into the Q slab, fuse QKV, pack all small vectors.
    mean_vec = jnp.repeat(CLIP_MEAN, PATCH * PATCH)          # (PATCH_DIM,), (c, ph, pw) order
    std_vec = jnp.repeat(CLIP_STD, PATCH * PATCH)
    w_pe = raw["w_patch"] / std_vec[:, None]
    patch_bias = -(mean_vec / std_vec) @ raw["w_patch"]      # (HID,)

    add1 = jnp.zeros((SEQ_PAD, HID), jnp.float32)
    add1 = add1.at[0].set(raw["cls"][0] + raw["pos"][0])
    add1 = add1.at[1:SEQ].set(raw["pos"][1:] + patch_bias[None, :])
    add = jnp.tile(add1, (B, 1))                             # (BSEQ, HID)

    idx = jnp.arange(BSEQ)
    same_img = (idx[:, None] // SEQ_PAD) == (idx[None, :] // SEQ_PAD)
    key_valid = (idx % SEQ_PAD) < SEQ
    mask = jnp.where(same_img & key_valid[None, :], 0.0, -1e9).astype(jnp.float32)

    scale = HEAD_DIM ** -0.5
    wqkv = jnp.stack([jnp.concatenate([lp["wq"] * scale, lp["wk"], lp["wv"]], axis=1)
                      for lp in raw["layers"]])              # (LAYERS, HID, 3*HID)
    wo = jnp.stack([lp["wo"] for lp in raw["layers"]])       # (LAYERS, HID, HID)
    w1 = jnp.stack([lp["w1"] for lp in raw["layers"]])       # (LAYERS, HID, INTER)
    w2 = jnp.stack([lp["w2"] for lp in raw["layers"]])       # (LAYERS, INTER, HID)

    def padrow(v):
        v = v.reshape(-1)
        return jnp.pad(v, (0, VEC_W - v.shape[0]))

    rows = [padrow(raw["ln_pre_g"]), padrow(raw["ln_pre_b"]),
            padrow(raw["ln_post_g"]), padrow(raw["ln_post_b"])]
    for lp in raw["layers"]:
        bqkv = jnp.concatenate([lp["bq"] * scale, lp["bk"], lp["bv"]])
        rows += [padrow(lp["ln1_g"]), padrow(lp["ln1_b"]),
                 padrow(bqkv), padrow(lp["bo"]),
                 padrow(lp["ln2_g"]), padrow(lp["ln2_b"]),
                 padrow(lp["b1"]), padrow(lp["b2"])]
    vecs = jnp.stack(rows)                                    # (VEC_ROWS_RAW, 128)
    vecs = jnp.pad(vecs, ((0, VEC_ROWS - vecs.shape[0]), (0, 0)))

    return {"w_pe": w_pe, "add": add, "mask": mask, "vecs": vecs,
            "wqkv": wqkv, "wo": wo, "w1": w1, "w2": w2, "w_proj": raw["w_proj"]}


@jax.jit
def clip_get_image_features(x_nchw, fused_params):
    # TODO(synk): the HF processor also resizes/center-crops to the model image size;
    # here the synthetic model's image_size equals the input size, so only the
    # normalize step applies (folded into w_pe / add).
    patches = extract_patches_stacked(x_nchw)
    return clip_forward_fused(patches, fused_params)


# ----------------------------- main -------------------------------------------
if __name__ == "__main__":
    key = jax.random.PRNGKey(0)
    k_x, k_p = jax.random.split(key)
    # images in [0,1), NCHW like PyTorch (do_rescale=False path of the processor)
    x = jax.random.uniform(k_x, (B, C, IMG, IMG), dtype=jnp.float32)
    params = fuse_params(init_params(k_p))

    feats = clip_get_image_features(x, params)
    feats = jax.block_until_ready(feats)
    assert feats.shape == (B, PROJ)
    assert bool(jnp.all(jnp.isfinite(feats)))
    print("KERNEL_OK")
</pallas_src>

<mosaic_0001>
module attributes {stable_mosaic.version = 11 : i64} {
  func.func @clip_fused_kernel(%arg0: memref<48x48xf32, #tpu.memory_space<vmem>>, %arg1: memref<48x32xf32, #tpu.memory_space<vmem>>, %arg2: memref<48x32xf32, #tpu.memory_space<vmem>>, %arg3: memref<24x128xf32, #tpu.memory_space<vmem>>, %arg4: memref<48x48xf32, #tpu.memory_space<vmem>>, %arg5: memref<2x32x96xf32, #tpu.memory_space<vmem>>, %arg6: memref<2x32x32xf32, #tpu.memory_space<vmem>>, %arg7: memref<2x32x128xf32, #tpu.memory_space<vmem>>, %arg8: memref<2x128x32xf32, #tpu.memory_space<vmem>>, %arg9: memref<32x16xf32, #tpu.memory_space<vmem>>, %arg10: memref<2x16xf32, #tpu.memory_space<vmem>>) attributes {dimension_semantics = [], scalar_prefetch = 0 : i64, scratch_operands = 0 : i64, tpu.core_type = #tpu.core_type<tc>} {
    %c0 = arith.constant 0 : index
    %c0_0 = arith.constant 0 : index
    %0 = vector.load %arg0[%c0, %c0_0] : memref<48x48xf32, #tpu.memory_space<vmem>>, vector<48x48xf32>
    %c0_1 = arith.constant 0 : index
    %c0_2 = arith.constant 0 : index
    %1 = vector.load %arg1[%c0_1, %c0_2] : memref<48x32xf32, #tpu.memory_space<vmem>>, vector<48x32xf32>
    %cst = arith.constant dense<0.000000e+00> : vector<48x32xf32>
    %2 = tpu.matmul %0, %1, %cst {dimension_numbers = #tpu.dot_dimension_numbers<[1], [0], [0], [1], [0, 0, 1, 1], [], []>} : vector<48x48xf32>, vector<48x32xf32>, vector<48x32xf32> -> vector<48x32xf32>
    %c0_3 = arith.constant 0 : index
    %c0_4 = arith.constant 0 : index
    %3 = vector.load %arg2[%c0_3, %c0_4] : memref<48x32xf32, #tpu.memory_space<vmem>>, vector<48x32xf32>
    %4 = arith.addf %2, %3 : vector<48x32xf32>
    %c0_5 = arith.constant 0 : index
    %c0_6 = arith.constant 0 : index
    %5 = vector.load %arg3[%c0_5, %c0_6] : memref<24x128xf32, #tpu.memory_space<vmem>>, vector<1x32xf32>
    %c1 = arith.constant 1 : index
    %c0_7 = arith.constant 0 : index
    %6 = vector.load %arg3[%c1, %c0_7] : memref<24x128xf32, #tpu.memory_space<vmem>>, vector<1x32xf32>
    %cst_8 = arith.constant dense<0.000000e+00> : vector<48xf32>
    %7 = vector.multi_reduction <add>, %4, %cst_8 [1] : vector<48x32xf32> to vector<48xf32>
    %8 = vector.shape_cast %7 : vector<48xf32> to vector<48x1xf32>
    %cst_9 = arith.constant 3.200000e+01 : f32
    %9 = vector.broadcast %cst_9 : f32 to vector<48x1xf32>
    %10 = arith.divf %8, %9 : vector<48x1xf32>
    %11 = vector.broadcast %10 : vector<48x1xf32> to vector<48x32xf32>
    %12 = arith.subf %4, %11 : vector<48x32xf32>
    %13 = arith.mulf %12, %12 : vector<48x32xf32>
    %cst_10 = arith.constant dense<0.000000e+00> : vector<48xf32>
    %14 = vector.multi_reduction <add>, %13, %cst_10 [1] : vector<48x32xf32> to vector<48xf32>
    %15 = vector.shape_cast %14 : vector<48xf32> to vector<48x1xf32>
    %cst_11 = arith.constant 3.200000e+01 : f32
    %16 = vector.broadcast %cst_11 : f32 to vector<48x1xf32>
    %17 = arith.divf %15, %16 : vector<48x1xf32>
    %18 = vector.broadcast %10 : vector<48x1xf32> to vector<48x32xf32>
    %19 = arith.subf %4, %18 : vector<48x32xf32>
    %cst_12 = arith.constant 9.99999974E-6 : f32
    %20 = vector.broadcast %cst_12 : f32 to vector<48x1xf32>
    %21 = arith.addf %17, %20 : vector<48x1xf32>
    %22 = math.rsqrt %21 : vector<48x1xf32>
    %23 = vector.broadcast %22 : vector<48x1xf32> to vector<48x32xf32>
    %24 = arith.mulf %19, %23 : vector<48x32xf32>
    %25 = vector.broadcast %5 : vector<1x32xf32> to vector<48x32xf32>
    %26 = arith.mulf %24, %25 : vector<48x32xf32>
    %27 = vector.broadcast %6 : vector<1x32xf32> to vector<48x32xf32>
    %28 = arith.addf %26, %27 : vector<48x32xf32>
    %c0_13 = arith.constant 0 : index
    %c0_14 = arith.constant 0 : index
    %29 = vector.load %arg4[%c0_13, %c0_14] : memref<48x48xf32, #tpu.memory_space<vmem>>, vector<48x48xf32>
    %c4 = arith.constant 4 : index
    %c0_15 = arith.constant 0 : index
    %30 = vector.load %arg3[%c4, %c0_15] : memref<24x128xf32, #tpu.memory_space<vmem>>, vector<1x32xf32>
    %c5 = arith.constant 5 : index
    %c0_16 = arith.constant 0 : index
    %31 = vector.load %arg3[%c5, %c0_16] : memref<24x128xf32, #tpu.memory_space<vmem>>, vector<1x32xf32>
    %cst_17 = arith.constant dense<0.000000e+00> : vector<48xf32>
    %32 = vector.multi_reduction <add>, %28, %cst_17 [1] : vector<48x32xf32> to vector<48xf32>
    %33 = vector.shape_cast %32 : vector<48xf32> to vector<48x1xf32>
    %cst_18 = arith.constant 3.200000e+01 : f32
    %34 = vector.broadcast %cst_18 : f32 to vector<48x1xf32>
    %35 = arith.divf %33, %34 : vector<48x1xf32>
    %36 = vector.broadcast %35 : vector<48x1xf32> to vector<48x32xf32>
    %37 = arith.subf %28, %36 : vector<48x32xf32>
    %38 = arith.mulf %37, %37 : vector<48x32xf32>
    %cst_19 = arith.constant dense<0.000000e+00> : vector<48xf32>
    %39 = vector.multi_reduction <add>, %38, %cst_19 [1] : vector<48x32xf32> to vector<48xf32>
    %40 = vector.shape_cast %39 : vector<48xf32> to vector<48x1xf32>
    %cst_20 = arith.constant 3.200000e+01 : f32
    %41 = vector.broadcast %cst_20 : f32 to vector<48x1xf32>
    %42 = arith.divf %40, %41 : vector<48x1xf32>
    %43 = vector.broadcast %35 : vector<48x1xf32> to vector<48x32xf32>
    %44 = arith.subf %28, %43 : vector<48x32xf32>
    %cst_21 = arith.constant 9.99999974E-6 : f32
    %45 = vector.broadcast %cst_21 : f32 to vector<48x1xf32>
    %46 = arith.addf %42, %45 : vector<48x1xf32>
    %47 = math.rsqrt %46 : vector<48x1xf32>
    %48 = vector.broadcast %47 : vector<48x1xf32> to vector<48x32xf32>
    %49 = arith.mulf %44, %48 : vector<48x32xf32>
    %50 = vector.broadcast %30 : vector<1x32xf32> to vector<48x32xf32>
    %51 = arith.mulf %49, %50 : vector<48x32xf32>
    %52 = vector.broadcast %31 : vector<1x32xf32> to vector<48x32xf32>
    %53 = arith.addf %51, %52 : vector<48x32xf32>
    %c0_22 = arith.constant 0 : index
    %c0_23 = arith.constant 0 : index
    %c0_24 = arith.constant 0 : index
    %54 = vector.load %arg5[%c0_22, %c0_23, %c0_24] : memref<2x32x96xf32, #tpu.memory_space<vmem>>, vector<1x32x96xf32>
    %55 = vector.shape_cast %54 : vector<1x32x96xf32> to vector<32x96xf32>
    %cst_25 = arith.constant dense<0.000000e+00> : vector<48x96xf32>
    %56 = tpu.matmul %53, %55, %cst_25 {dimension_numbers = #tpu.dot_dimension_numbers<[1], [0], [0], [1], [0, 0, 1, 1], [], []>} : vector<48x32xf32>, vector<32x96xf32>, vector<48x96xf32> -> vector<48x96xf32>
    %c6 = arith.constant 6 : index
    %c0_26 = arith.constant 0 : index
    %57 = vector.load %arg3[%c6, %c0_26] : memref<24x128xf32, #tpu.memory_space<vmem>>, vector<1x96xf32>
    %58 = vector.broadcast %57 : vector<1x96xf32> to vector<48x96xf32>
    %59 = arith.addf %56, %58 : vector<48x96xf32>
    %60 = vector.extract_strided_slice %59 {offsets = [0, 0], sizes = [48, 16], strides = [1, 1]} : vector<48x96xf32> to vector<48x16xf32>
    %61 = vector.extract_strided_slice %59 {offsets = [0, 32], sizes = [48, 16], strides = [1, 1]} : vector<48x96xf32> to vector<48x16xf32>
    %62 = vector.extract_strided_slice %59 {offsets = [0, 64], sizes = [48, 16], strides = [1, 1]} : vector<48x96xf32> to vector<48x16xf32>
    %cst_27 = arith.constant dense<0.000000e+00> : vector<48x48xf32>
    %63 = tpu.matmul %60, %61, %cst_27 {dimension_numbers = #tpu.dot_dimension_numbers<[1], [1], [0], [0], [0, 0, 1, 0], [], []>} : vector<48x16xf32>, vector<48x16xf32>, vector<48x48xf32> -> vector<48x48xf32>
    %64 = arith.addf %63, %29 : vector<48x48xf32>
    %cst_28 = arith.constant dense<0xFF800000> : vector<48xf32>
    %65 = vector.multi_reduction <maximumf>, %64, %cst_28 [1] : vector<48x48xf32> to vector<48xf32>
    %66 = vector.shape_cast %65 : vector<48xf32> to vector<48x1xf32>
    %67 = vector.broadcast %66 : vector<48x1xf32> to vector<48x48xf32>
    %68 = arith.subf %64, %67 : vector<48x48xf32>
    %69 = math.exp %68 : vector<48x48xf32>
    %cst_29 = arith.constant dense<0.000000e+00> : vector<48xf32>
    %70 = vector.multi_reduction <add>, %69, %cst_29 [1] : vector<48x48xf32> to vector<48xf32>
    %71 = vector.shape_cast %70 : vector<48xf32> to vector<48x1xf32>
    %72 = vector.broadcast %71 : vector<48x1xf32> to vector<48x48xf32>
    %73 = arith.divf %69, %72 : vector<48x48xf32>
    %cst_30 = arith.constant dense<0.000000e+00> : vector<48x16xf32>
    %74 = tpu.matmul %73, %62, %cst_30 {dimension_numbers = #tpu.dot_dimension_numbers<[1], [0], [0], [1], [0, 0, 1, 1], [], []>} : vector<48x48xf32>, vector<48x16xf32>, vector<48x16xf32> -> vector<48x16xf32>
    %75 = vector.extract_strided_slice %59 {offsets = [0, 16], sizes = [48, 16], strides = [1, 1]} : vector<48x96xf32> to vector<48x16xf32>
    %76 = vector.extract_strided_slice %59 {offsets = [0, 48], sizes = [48, 16], strides = [1, 1]} : vector<48x96xf32> to vector<48x16xf32>
    %77 = vector.extract_strided_slice %59 {offsets = [0, 80], sizes = [48, 16], strides = [1, 1]} : vector<48x96xf32> to vector<48x16xf32>
    %cst_31 = arith.constant dense<0.000000e+00> : vector<48x48xf32>
    %78 = tpu.matmul %75, %76, %cst_31 {dimension_numbers = #tpu.dot_dimension_numbers<[1], [1], [0], [0], [0, 0, 1, 0], [], []>} : vector<48x16xf32>, vector<48x16xf32>, vector<48x48xf32> -> vector<48x48xf32>
    %79 = arith.addf %78, %29 : vector<48x48xf32>
    %cst_32 = arith.constant dense<0xFF800000> : vector<48xf32>
    %80 = vector.multi_reduction <maximumf>, %79, %cst_32 [1] : vector<48x48xf32> to vector<48xf32>
    %81 = vector.shape_cast %80 : vector<48xf32> to vector<48x1xf32>
    %82 = vector.broadcast %81 : vector<48x1xf32> to vector<48x48xf32>
    %83 = arith.subf %79, %82 : vector<48x48xf32>
    %84 = math.exp %83 : vector<48x48xf32>
    %cst_33 = arith.constant dense<0.000000e+00> : vector<48xf32>
    %85 = vector.multi_reduction <add>, %84, %cst_33 [1] : vector<48x48xf32> to vector<48xf32>
    %86 = vector.shape_cast %85 : vector<48xf32> to vector<48x1xf32>
    %87 = vector.broadcast %86 : vector<48x1xf32> to vector<48x48xf32>
    %88 = arith.divf %84, %87 : vector<48x48xf32>
    %cst_34 = arith.constant dense<0.000000e+00> : vector<48x16xf32>
    %89 = tpu.matmul %88, %77, %cst_34 {dimension_numbers = #tpu.dot_dimension_numbers<[1], [0], [0], [1], [0, 0, 1, 1], [], []>} : vector<48x48xf32>, vector<48x16xf32>, vector<48x16xf32> -> vector<48x16xf32>
    %90 = tpu.concatenate %74, %89 in 1 : vector<48x16xf32>, vector<48x16xf32> -> vector<48x32xf32>
    %c0_35 = arith.constant 0 : index
    %c0_36 = arith.constant 0 : index
    %c0_37 = arith.constant 0 : index
    %91 = vector.load %arg6[%c0_35, %c0_36, %c0_37] : memref<2x32x32xf32, #tpu.memory_space<vmem>>, vector<1x32x32xf32>
    %92 = vector.shape_cast %91 : vector<1x32x32xf32> to vector<32x32xf32>
    %cst_38 = arith.constant dense<0.000000e+00> : vector<48x32xf32>
    %93 = tpu.matmul %90, %92, %cst_38 {dimension_numbers = #tpu.dot_dimension_numbers<[1], [0], [0], [1], [0, 0, 1, 1], [], []>} : vector<48x32xf32>, vector<32x32xf32>, vector<48x32xf32> -> vector<48x32xf32>
    %94 = arith.addf %28, %93 : vector<48x32xf32>
    %c7 = arith.constant 7 : index
    %c0_39 = arith.constant 0 : index
    %95 = vector.load %arg3[%c7, %c0_39] : memref<24x128xf32, #tpu.memory_space<vmem>>, vector<1x32xf32>
    %96 = vector.broadcast %95 : vector<1x32xf32> to vector<48x32xf32>
    %97 = arith.addf %94, %96 : vector<48x32xf32>
    %c8 = arith.constant 8 : index
    %c0_40 = arith.constant 0 : index
    %98 = vector.load %arg3[%c8, %c0_40] : memref<24x128xf32, #tpu.memory_space<vmem>>, vector<1x32xf32>
    %c9 = arith.constant 9 : index
    %c0_41 = arith.constant 0 : index
    %99 = vector.load %arg3[%c9, %c0_41] : memref<24x128xf32, #tpu.memory_space<vmem>>, vector<1x32xf32>
    %cst_42 = arith.constant dense<0.000000e+00> : vector<48xf32>
    %100 = vector.multi_reduction <add>, %97, %cst_42 [1] : vector<48x32xf32> to vector<48xf32>
    %101 = vector.shape_cast %100 : vector<48xf32> to vector<48x1xf32>
    %cst_43 = arith.constant 3.200000e+01 : f32
    %102 = vector.broadcast %cst_43 : f32 to vector<48x1xf32>
    %103 = arith.divf %101, %102 : vector<48x1xf32>
    %104 = vector.broadcast %103 : vector<48x1xf32> to vector<48x32xf32>
    %105 = arith.subf %97, %104 : vector<48x32xf32>
    %106 = arith.mulf %105, %105 : vector<48x32xf32>
    %cst_44 = arith.constant dense<0.000000e+00> : vector<48xf32>
    %107 = vector.multi_reduction <add>, %106, %cst_44 [1] : vector<48x32xf32> to vector<48xf32>
    %108 = vector.shape_cast %107 : vector<48xf32> to vector<48x1xf32>
    %cst_45 = arith.constant 3.200000e+01 : f32
    %109 = vector.broadcast %cst_45 : f32 to vector<48x1xf32>
    %110 = arith.divf %108, %109 : vector<48x1xf32>
    %111 = vector.broadcast %103 : vector<48x1xf32> to vector<48x32xf32>
    %112 = arith.subf %97, %111 : vector<48x32xf32>
    %cst_46 = arith.constant 9.99999974E-6 : f32
    %113 = vector.broadcast %cst_46 : f32 to vector<48x1xf32>
    %114 = arith.addf %110, %113 : vector<48x1xf32>
    %115 = math.rsqrt %114 : vector<48x1xf32>
    %116 = vector.broadcast %115 : vector<48x1xf32> to vector<48x32xf32>
    %117 = arith.mulf %112, %116 : vector<48x32xf32>
    %118 = vector.broadcast %98 : vector<1x32xf32> to vector<48x32xf32>
    %119 = arith.mulf %117, %118 : vector<48x32xf32>
    %120 = vector.broadcast %99 : vector<1x32xf32> to vector<48x32xf32>
    %121 = arith.addf %119, %120 : vector<48x32xf32>
    %c0_47 = arith.constant 0 : index
    %c0_48 = arith.constant 0 : index
    %c0_49 = arith.constant 0 : index
    %122 = vector.load %arg7[%c0_47, %c0_48, %c0_49] : memref<2x32x128xf32, #tpu.memory_space<vmem>>, vector<1x32x128xf32>
    %123 = vector.shape_cast %122 : vector<1x32x128xf32> to vector<32x128xf32>
    %cst_50 = arith.constant dense<0.000000e+00> : vector<48x128xf32>
    %124 = tpu.matmul %121, %123, %cst_50 {dimension_numbers = #tpu.dot_dimension_numbers<[1], [0], [0], [1], [0, 0, 1, 1], [], []>} : vector<48x32xf32>, vector<32x128xf32>, vector<48x128xf32> -> vector<48x128xf32>
    %c10 = arith.constant 10 : index
    %c0_51 = arith.constant 0 : index
    %125 = vector.load %arg3[%c10, %c0_51] : memref<24x128xf32, #tpu.memory_space<vmem>>, vector<1x128xf32>
    %126 = vector.broadcast %125 : vector<1x128xf32> to vector<48x128xf32>
    %127 = arith.addf %124, %126 : vector<48x128xf32>
    %cst_52 = arith.constant 1.702000e+00 : f32
    %128 = vector.broadcast %cst_52 : f32 to vector<48x128xf32>
    %129 = arith.mulf %128, %127 : vector<48x128xf32>
    %130 = arith.negf %129 : vector<48x128xf32>
    %131 = math.exp %130 : vector<48x128xf32>
    %cst_53 = arith.constant 1.000000e+00 : f32
    %132 = vector.broadcast %cst_53 : f32 to vector<48x128xf32>
    %133 = arith.addf %132, %131 : vector<48x128xf32>
    %134 = arith.divf %132, %133 : vector<48x128xf32>
    %135 = arith.mulf %127, %134 : vector<48x128xf32>
    %c0_54 = arith.constant 0 : index
    %c0_55 = arith.constant 0 : index
    %c0_56 = arith.constant 0 : index
    %136 = vector.load %arg8[%c0_54, %c0_55, %c0_56] : memref<2x128x32xf32, #tpu.memory_space<vmem>>, vector<1x128x32xf32>
    %137 = vector.shape_cast %136 : vector<1x128x32xf32> to vector<128x32xf32>
    %cst_57 = arith.constant dense<0.000000e+00> : vector<48x32xf32>
    %138 = tpu.matmul %135, %137, %cst_57 {dimension_numbers = #tpu.dot_dimension_numbers<[1], [0], [0], [1], [0, 0, 1, 1], [], []>} : vector<48x128xf32>, vector<128x32xf32>, vector<48x32xf32> -> vector<48x32xf32>
    %139 = arith.addf %97, %138 : vector<48x32xf32>
    %c11 = arith.constant 11 : index
    %c0_58 = arith.constant 0 : index
    %140 = vector.load %arg3[%c11, %c0_58] : memref<24x128xf32, #tpu.memory_space<vmem>>, vector<1x32xf32>
    %141 = vector.broadcast %140 : vector<1x32xf32> to vector<48x32xf32>
    %142 = arith.addf %139, %141 : vector<48x32xf32>
    %c12 = arith.constant 12 : index
    %c0_59 = arith.constant 0 : index
    %143 = vector.load %arg3[%c12, %c0_59] : memref<24x128xf32, #tpu.memory_space<vmem>>, vector<1x32xf32>
    %c13 = arith.constant 13 : index
    %c0_60 = arith.constant 0 : index
    %144 = vector.load %arg3[%c13, %c0_60] : memref<24x128xf32, #tpu.memory_space<vmem>>, vector<1x32xf32>
    %cst_61 = arith.constant dense<0.000000e+00> : vector<48xf32>
    %145 = vector.multi_reduction <add>, %142, %cst_61 [1] : vector<48x32xf32> to vector<48xf32>
    %146 = vector.shape_cast %145 : vector<48xf32> to vector<48x1xf32>
    %cst_62 = arith.constant 3.200000e+01 : f32
    %147 = vector.broadcast %cst_62 : f32 to vector<48x1xf32>
    %148 = arith.divf %146, %147 : vector<48x1xf32>
    %149 = vector.broadcast %148 : vector<48x1xf32> to vector<48x32xf32>
    %150 = arith.subf %142, %149 : vector<48x32xf32>
    %151 = arith.mulf %150, %150 : vector<48x32xf32>
    %cst_63 = arith.constant dense<0.000000e+00> : vector<48xf32>
    %152 = vector.multi_reduction <add>, %151, %cst_63 [1] : vector<48x32xf32> to vector<48xf32>
    %153 = vector.shape_cast %152 : vector<48xf32> to vector<48x1xf32>
    %cst_64 = arith.constant 3.200000e+01 : f32
    %154 = vector.broadcast %cst_64 : f32 to vector<48x1xf32>
    %155 = arith.divf %153, %154 : vector<48x1xf32>
    %156 = vector.broadcast %148 : vector<48x1xf32> to vector<48x32xf32>
    %157 = arith.subf %142, %156 : vector<48x32xf32>
    %cst_65 = arith.constant 9.99999974E-6 : f32
    %158 = vector.broadcast %cst_65 : f32 to vector<48x1xf32>
    %159 = arith.addf %155, %158 : vector<48x1xf32>
    %160 = math.rsqrt %159 : vector<48x1xf32>
    %161 = vector.broadcast %160 : vector<48x1xf32> to vector<48x32xf32>
    %162 = arith.mulf %157, %161 : vector<48x32xf32>
    %163 = vector.broadcast %143 : vector<1x32xf32> to vector<48x32xf32>
    %164 = arith.mulf %162, %163 : vector<48x32xf32>
    %165 = vector.broadcast %144 : vector<1x32xf32> to vector<48x32xf32>
    %166 = arith.addf %164, %165 : vector<48x32xf32>
    %c1_66 = arith.constant 1 : index
    %c0_67 = arith.constant 0 : index
    %c0_68 = arith.constant 0 : index
    %167 = vector.load %arg5[%c1_66, %c0_67, %c0_68] : memref<2x32x96xf32, #tpu.memory_space<vmem>>, vector<1x32x96xf32>
    %168 = vector.shape_cast %167 : vector<1x32x96xf32> to vector<32x96xf32>
    %cst_69 = arith.constant dense<0.000000e+00> : vector<48x96xf32>
    %169 = tpu.matmul %166, %168, %cst_69 {dimension_numbers = #tpu.dot_dimension_numbers<[1], [0], [0], [1], [0, 0, 1, 1], [], []>} : vector<48x32xf32>, vector<32x96xf32>, vector<48x96xf32> -> vector<48x96xf32>
    %c14 = arith.constant 14 : index
    %c0_70 = arith.constant 0 : index
    %170 = vector.load %arg3[%c14, %c0_70] : memref<24x128xf32, #tpu.memory_space<vmem>>, vector<1x96xf32>
    %171 = vector.broadcast %170 : vector<1x96xf32> to vector<48x96xf32>
    %172 = arith.addf %169, %171 : vector<48x96xf32>
    %173 = vector.extract_strided_slice %172 {offsets = [0, 0], sizes = [48, 16], strides = [1, 1]} : vector<48x96xf32> to vector<48x16xf32>
    %174 = vector.extract_strided_slice %172 {offsets = [0, 32], sizes = [48, 16], strides = [1, 1]} : vector<48x96xf32> to vector<48x16xf32>
    %175 = vector.extract_strided_slice %172 {offsets = [0, 64], sizes = [48, 16], strides = [1, 1]} : vector<48x96xf32> to vector<48x16xf32>
    %cst_71 = arith.constant dense<0.000000e+00> : vector<48x48xf32>
    %176 = tpu.matmul %173, %174, %cst_71 {dimension_numbers = #tpu.dot_dimension_numbers<[1], [1], [0], [0], [0, 0, 1, 0], [], []>} : vector<48x16xf32>, vector<48x16xf32>, vector<48x48xf32> -> vector<48x48xf32>
    %177 = arith.addf %176, %29 : vector<48x48xf32>
    %cst_72 = arith.constant dense<0xFF800000> : vector<48xf32>
    %178 = vector.multi_reduction <maximumf>, %177, %cst_72 [1] : vector<48x48xf32> to vector<48xf32>
    %179 = vector.shape_cast %178 : vector<48xf32> to vector<48x1xf32>
    %180 = vector.broadcast %179 : vector<48x1xf32> to vector<48x48xf32>
    %181 = arith.subf %177, %180 : vector<48x48xf32>
    %182 = math.exp %181 : vector<48x48xf32>
    %cst_73 = arith.constant dense<0.000000e+00> : vector<48xf32>
    %183 = vector.multi_reduction <add>, %182, %cst_73 [1] : vector<48x48xf32> to vector<48xf32>
    %184 = vector.shape_cast %183 : vector<48xf32> to vector<48x1xf32>
    %185 = vector.broadcast %184 : vector<48x1xf32> to vector<48x48xf32>
    %186 = arith.divf %182, %185 : vector<48x48xf32>
    %cst_74 = arith.constant dense<0.000000e+00> : vector<48x16xf32>
    %187 = tpu.matmul %186, %175, %cst_74 {dimension_numbers = #tpu.dot_dimension_numbers<[1], [0], [0], [1], [0, 0, 1, 1], [], []>} : vector<48x48xf32>, vector<48x16xf32>, vector<48x16xf32> -> vector<48x16xf32>
    %188 = vector.extract_strided_slice %172 {offsets = [0, 16], sizes = [48, 16], strides = [1, 1]} : vector<48x96xf32> to vector<48x16xf32>
    %189 = vector.extract_strided_slice %172 {offsets = [0, 48], sizes = [48, 16], strides = [1, 1]} : vector<48x96xf32> to vector<48x16xf32>
    %190 = vector.extract_strided_slice %172 {offsets = [0, 80], sizes = [48, 16], strides = [1, 1]} : vector<48x96xf32> to vector<48x16xf32>
    %cst_75 = arith.constant dense<0.000000e+00> : vector<48x48xf32>
    %191 = tpu.matmul %188, %189, %cst_75 {dimension_numbers = #tpu.dot_dimension_numbers<[1], [1], [0], [0], [0, 0, 1, 0], [], []>} : vector<48x16xf32>, vector<48x16xf32>, vector<48x48xf32> -> vector<48x48xf32>
    %192 = arith.addf %191, %29 : vector<48x48xf32>
    %cst_76 = arith.constant dense<0xFF800000> : vector<48xf32>
    %193 = vector.multi_reduction <maximumf>, %192, %cst_76 [1] : vector<48x48xf32> to vector<48xf32>
    %194 = vector.shape_cast %193 : vector<48xf32> to vector<48x1xf32>
    %195 = vector.broadcast %194 : vector<48x1xf32> to vector<48x48xf32>
    %196 = arith.subf %192, %195 : vector<48x48xf32>
    %197 = math.exp %196 : vector<48x48xf32>
    %cst_77 = arith.constant dense<0.000000e+00> : vector<48xf32>
    %198 = vector.multi_reduction <add>, %197, %cst_77 [1] : vector<48x48xf32> to vector<48xf32>
    %199 = vector.shape_cast %198 : vector<48xf32> to vector<48x1xf32>
    %200 = vector.broadcast %199 : vector<48x1xf32> to vector<48x48xf32>
    %201 = arith.divf %197, %200 : vector<48x48xf32>
    %cst_78 = arith.constant dense<0.000000e+00> : vector<48x16xf32>
    %202 = tpu.matmul %201, %190, %cst_78 {dimension_numbers = #tpu.dot_dimension_numbers<[1], [0], [0], [1], [0, 0, 1, 1], [], []>} : vector<48x48xf32>, vector<48x16xf32>, vector<48x16xf32> -> vector<48x16xf32>
    %203 = tpu.concatenate %187, %202 in 1 : vector<48x16xf32>, vector<48x16xf32> -> vector<48x32xf32>
    %c1_79 = arith.constant 1 : index
    %c0_80 = arith.constant 0 : index
    %c0_81 = arith.constant 0 : index
    %204 = vector.load %arg6[%c1_79, %c0_80, %c0_81] : memref<2x32x32xf32, #tpu.memory_space<vmem>>, vector<1x32x32xf32>
    %205 = vector.shape_cast %204 : vector<1x32x32xf32> to vector<32x32xf32>
    %cst_82 = arith.constant dense<0.000000e+00> : vector<48x32xf32>
    %206 = tpu.matmul %203, %205, %cst_82 {dimension_numbers = #tpu.dot_dimension_numbers<[1], [0], [0], [1], [0, 0, 1, 1], [], []>} : vector<48x32xf32>, vector<32x32xf32>, vector<48x32xf32> -> vector<48x32xf32>
    %207 = arith.addf %142, %206 : vector<48x32xf32>
    %c15 = arith.constant 15 : index
    %c0_83 = arith.constant 0 : index
    %208 = vector.load %arg3[%c15, %c0_83] : memref<24x128xf32, #tpu.memory_space<vmem>>, vector<1x32xf32>
    %209 = vector.broadcast %208 : vector<1x32xf32> to vector<48x32xf32>
    %210 = arith.addf %207, %209 : vector<48x32xf32>
    %c16 = arith.constant 16 : index
    %c0_84 = arith.constant 0 : index
    %211 = vector.load %arg3[%c16, %c0_84] : memref<24x128xf32, #tpu.memory_space<vmem>>, vector<1x32xf32>
    %c17 = arith.constant 17 : index
    %c0_85 = arith.constant 0 : index
    %212 = vector.load %arg3[%c17, %c0_85] : memref<24x128xf32, #tpu.memory_space<vmem>>, vector<1x32xf32>
    %cst_86 = arith.constant dense<0.000000e+00> : vector<48xf32>
    %213 = vector.multi_reduction <add>, %210, %cst_86 [1] : vector<48x32xf32> to vector<48xf32>
    %214 = vector.shape_cast %213 : vector<48xf32> to vector<48x1xf32>
    %cst_87 = arith.constant 3.200000e+01 : f32
    %215 = vector.broadcast %cst_87 : f32 to vector<48x1xf32>
    %216 = arith.divf %214, %215 : vector<48x1xf32>
    %217 = vector.broadcast %216 : vector<48x1xf32> to vector<48x32xf32>
    %218 = arith.subf %210, %217 : vector<48x32xf32>
    %219 = arith.mulf %218, %218 : vector<48x32xf32>
    %cst_88 = arith.constant dense<0.000000e+00> : vector<48xf32>
    %220 = vector.multi_reduction <add>, %219, %cst_88 [1] : vector<48x32xf32> to vector<48xf32>
    %221 = vector.shape_cast %220 : vector<48xf32> to vector<48x1xf32>
    %cst_89 = arith.constant 3.200000e+01 : f32
    %222 = vector.broadcast %cst_89 : f32 to vector<48x1xf32>
    %223 = arith.divf %221, %222 : vector<48x1xf32>
    %224 = vector.broadcast %216 : vector<48x1xf32> to vector<48x32xf32>
    %225 = arith.subf %210, %224 : vector<48x32xf32>
    %cst_90 = arith.constant 9.99999974E-6 : f32
    %226 = vector.broadcast %cst_90 : f32 to vector<48x1xf32>
    %227 = arith.addf %223, %226 : vector<48x1xf32>
    %228 = math.rsqrt %227 : vector<48x1xf32>
    %229 = vector.broadcast %228 : vector<48x1xf32> to vector<48x32xf32>
    %230 = arith.mulf %225, %229 : vector<48x32xf32>
    %231 = vector.broadcast %211 : vector<1x32xf32> to vector<48x32xf32>
    %232 = arith.mulf %230, %231 : vector<48x32xf32>
    %233 = vector.broadcast %212 : vector<1x32xf32> to vector<48x32xf32>
    %234 = arith.addf %232, %233 : vector<48x32xf32>
    %c1_91 = arith.constant 1 : index
    %c0_92 = arith.constant 0 : index
    %c0_93 = arith.constant 0 : index
    %235 = vector.load %arg7[%c1_91, %c0_92, %c0_93] : memref<2x32x128xf32, #tpu.memory_space<vmem>>, vector<1x32x128xf32>
    %236 = vector.shape_cast %235 : vector<1x32x128xf32> to vector<32x128xf32>
    %cst_94 = arith.constant dense<0.000000e+00> : vector<48x128xf32>
    %237 = tpu.matmul %234, %236, %cst_94 {dimension_numbers = #tpu.dot_dimension_numbers<[1], [0], [0], [1], [0, 0, 1, 1], [], []>} : vector<48x32xf32>, vector<32x128xf32>, vector<48x128xf32> -> vector<48x128xf32>
    %c18 = arith.constant 18 : index
    %c0_95 = arith.constant 0 : index
    %238 = vector.load %arg3[%c18, %c0_95] : memref<24x128xf32, #tpu.memory_space<vmem>>, vector<1x128xf32>
    %239 = vector.broadcast %238 : vector<1x128xf32> to vector<48x128xf32>
    %240 = arith.addf %237, %239 : vector<48x128xf32>
    %cst_96 = arith.constant 1.702000e+00 : f32
    %241 = vector.broadcast %cst_96 : f32 to vector<48x128xf32>
    %242 = arith.mulf %241, %240 : vector<48x128xf32>
    %243 = arith.negf %242 : vector<48x128xf32>
    %244 = math.exp %243 : vector<48x128xf32>
    %cst_97 = arith.constant 1.000000e+00 : f32
    %245 = vector.broadcast %cst_97 : f32 to vector<48x128xf32>
    %246 = arith.addf %245, %244 : vector<48x128xf32>
    %247 = arith.divf %245, %246 : vector<48x128xf32>
    %248 = arith.mulf %240, %247 : vector<48x128xf32>
    %c1_98 = arith.constant 1 : index
    %c0_99 = arith.constant 0 : index
    %c0_100 = arith.constant 0 : index
    %249 = vector.load %arg8[%c1_98, %c0_99, %c0_100] : memref<2x128x32xf32, #tpu.memory_space<vmem>>, vector<1x128x32xf32>
    %250 = vector.shape_cast %249 : vector<1x128x32xf32> to vector<128x32xf32>
    %cst_101 = arith.constant dense<0.000000e+00> : vector<48x32xf32>
    %251 = tpu.matmul %248, %250, %cst_101 {dimension_numbers = #tpu.dot_dimension_numbers<[1], [0], [0], [1], [0, 0, 1, 1], [], []>} : vector<48x128xf32>, vector<128x32xf32>, vector<48x32xf32> -> vector<48x32xf32>
    %252 = arith.addf %210, %251 : vector<48x32xf32>
    %c19 = arith.constant 19 : index
    %c0_102 = arith.constant 0 : index
    %253 = vector.load %arg3[%c19, %c0_102] : memref<24x128xf32, #tpu.memory_space<vmem>>, vector<1x32xf32>
    %254 = vector.broadcast %253 : vector<1x32xf32> to vector<48x32xf32>
    %255 = arith.addf %252, %254 : vector<48x32xf32>
    %256 = vector.extract_strided_slice %255 {offsets = [0, 0], sizes = [1, 32], strides = [1, 1]} : vector<48x32xf32> to vector<1x32xf32>
    %257 = vector.extract_strided_slice %255 {offsets = [24, 0], sizes = [1, 32], strides = [1, 1]} : vector<48x32xf32> to vector<1x32xf32>
    %258 = tpu.concatenate %256, %257 in 0 : vector<1x32xf32>, vector<1x32xf32> -> vector<2x32xf32>
    %c2 = arith.constant 2 : index
    %c0_103 = arith.constant 0 : index
    %259 = vector.load %arg3[%c2, %c0_103] : memref<24x128xf32, #tpu.memory_space<vmem>>, vector<1x32xf32>
    %c3 = arith.constant 3 : index
    %c0_104 = arith.constant 0 : index
    %260 = vector.load %arg3[%c3, %c0_104] : memref<24x128xf32, #tpu.memory_space<vmem>>, vector<1x32xf32>
    %cst_105 = arith.constant dense<0.000000e+00> : vector<2xf32>
    %261 = vector.multi_reduction <add>, %258, %cst_105 [1] : vector<2x32xf32> to vector<2xf32>
    %262 = vector.shape_cast %261 : vector<2xf32> to vector<2x1xf32>
    %cst_106 = arith.constant 3.200000e+01 : f32
    %263 = vector.broadcast %cst_106 : f32 to vector<2x1xf32>
    %264 = arith.divf %262, %263 : vector<2x1xf32>
    %265 = vector.broadcast %264 : vector<2x1xf32> to vector<2x32xf32>
    %266 = arith.subf %258, %265 : vector<2x32xf32>
    %267 = arith.mulf %266, %266 : vector<2x32xf32>
    %cst_107 = arith.constant dense<0.000000e+00> : vector<2xf32>
    %268 = vector.multi_reduction <add>, %267, %cst_107 [1] : vector<2x32xf32> to vector<2xf32>
    %269 = vector.shape_cast %268 : vector<2xf32> to vector<2x1xf32>
    %cst_108 = arith.constant 3.200000e+01 : f32
    %270 = vector.broadcast %cst_108 : f32 to vector<2x1xf32>
    %271 = arith.divf %269, %270 : vector<2x1xf32>
    %272 = vector.broadcast %264 : vector<2x1xf32> to vector<2x32xf32>
    %273 = arith.subf %258, %272 : vector<2x32xf32>
    %cst_109 = arith.constant 9.99999974E-6 : f32
    %274 = vector.broadcast %cst_109 : f32 to vector<2x1xf32>
    %275 = arith.addf %271, %274 : vector<2x1xf32>
    %276 = math.rsqrt %275 : vector<2x1xf32>
    %277 = vector.broadcast %276 : vector<2x1xf32> to vector<2x32xf32>
    %278 = arith.mulf %273, %277 : vector<2x32xf32>
    %279 = vector.broadcast %259 : vector<1x32xf32> to vector<2x32xf32>
    %280 = arith.mulf %278, %279 : vector<2x32xf32>
    %281 = vector.broadcast %260 : vector<1x32xf32> to vector<2x32xf32>
    %282 = arith.addf %280, %281 : vector<2x32xf32>
    %c0_110 = arith.constant 0 : index
    %c0_111 = arith.constant 0 : index
    %283 = vector.load %arg9[%c0_110, %c0_111] : memref<32x16xf32, #tpu.memory_space<vmem>>, vector<32x16xf32>
    %cst_112 = arith.constant dense<0.000000e+00> : vector<2x16xf32>
    %284 = tpu.matmul %282, %283, %cst_112 {dimension_numbers = #tpu.dot_dimension_numbers<[1], [0], [0], [1], [0, 0, 1, 1], [], []>} : vector<2x32xf32>, vector<32x16xf32>, vector<2x16xf32> -> vector<2x16xf32>
    %c0_113 = arith.constant 0 : index
    %c0_114 = arith.constant 0 : index
    %285 = vector.load %arg10[%c0_113, %c0_114] : memref<2x16xf32, #tpu.memory_space<vmem>>, vector<2x16xf32>
    tpu.vector_store %arg10[%c0_113, %c0_114], %284 {strides = array<i32>} : memref<2x16xf32, #tpu.memory_space<vmem>>, vector<2x16xf32>,
    return
  }
}

</mosaic_0001>

<bundles_post_ra>
// kernel: clip_get_image_features.1
= control target key start
LH: loop header
LB: loop body
LE: loop exit
PB: predicated region body
PF: predicated region fallthrough
CT: control target
= control target key end

     0   :  { %vm54_vm0 = vcmask 392192   ;;  %s4860_s0 = inlined_call_operand.vmem [shape: f32[48,48], index: 0, kind: input, shape index: {}]   ;;  %s4861_s1 = inlined_call_operand.vmem [shape: f32[48,32], index: 1, kind: input, shape index: {}]   ;;  %s4862_s2 = inlined_call_operand.vmem [shape: f32[48,32], index: 2, kind: input, shape index: {}]   ;;  %s4863_s3 = inlined_call_operand.vmem [shape: f32[24,128], index: 3, kind: input, shape index: {}]   ;;  %s4864_s4 = inlined_call_operand.vmem [shape: f32[48,48], index: 4, kind: input, shape index: {}]   ;;  %s4865_s5 = inlined_call_operand.vmem [shape: f32[2,32,96], index: 5, kind: input, shape index: {}]   ;;  %s4866_s6 = inlined_call_operand.vmem [shape: f32[2,32,32], index: 6, kind: input, shape index: {}]   ;;  %s4867_s7 = inlined_call_operand.vmem [shape: f32[2,32,128], index: 7, kind: input, shape index: {}]   ;;  %s4868_s8 = inlined_call_operand.vmem [shape: f32[2,128,32], index: 8, kind: input, shape index: {}]   ;;  %s4869_s9 = inlined_call_operand.vmem [shape: f32[32,16], index: 9, kind: input, shape index: {}]   ;;  %s4870_s10 = inlined_call_operand.hbm [shape: f32[2,16], index: 10, kind: output, shape index: {}]  }
   0x1   :  { %v47_v0 = vld [vmem:[%s4861_s1 + $0x28] sm:$0xff]  ;;  %v46_v1 = vld [vmem:[%s4861_s1 + $0x20] sm:$0xff]  ;;  %v45_v2 = vld [vmem:[%s4861_s1 + $0x18] sm:$0xff] }
   0x2   :  { %83 = vmatpush.msra.mxu0 %v47_v0  ;;  %v44_v3 = vld [vmem:[%s4861_s1 + $0x10] sm:$0xff]  ;;  %v43_v4 = vld [vmem:[%s4861_s1 + $0x8] sm:$0xff]  ;;  %v42_v5 = vld [vmem:[%s4861_s1] sm:$0xff] }
   0x3   :  { %v36_v6 = vld [vmem:[%s4860_s0] sm:$0xff] }
   0x4   :  { %84 = vmatpush.msra.mxu0 %v46_v1 }
   0x6   :  { %85 = vmatpush.msra.mxu0 %v45_v2 }
   0x8   :  { %86 = vmatpush.msra.mxu0 %v44_v3 }
   0xa   :  { %87 = vmatpush.msra.mxu0 %v43_v4 }
   0xb   :  { %15 = vsyncpa [#allocation3], 0  ;;  %v37_v7 = vld [vmem:[%s4860_s0 + $0x8] sm:$0xff]  ;;  %v38_v8 = vld [vmem:[%s4860_s0 + $0x10] sm:$0xff]  ;;  %vm110_vm1 = vcmask 261120   ;;  %v3421_v36 = vmov 32.0  }
   0xc   :  { %88 = vmatpush.msra.mxu0 %v42_v5  ;;  %v39_v9 = vld [vmem:[%s4860_s0 + $0x18] sm:$0xff]  ;;  %v40_v10 = vld [vmem:[%s4860_s0 + $0x20] sm:$0xff]  ;;  %v41_v11 = vld [vmem:[%s4860_s0 + $0x28] sm:$0xff]  ;;  %3181 = vrcp.f32 %v3421_v36  ;;  %s3422_s22 = smov 80   ;;  %s3423_s23 = smov 96  }
   0xd   :  { %2934 = vmatmul.msk.f32.vlgmr.msra.gmra.mxu0 %vm54_vm0, %v36_v6  ;;  %v49_v13 = vld [vmem:[%s4862_s2 + $0x8] sm:$0xff]  ;;  %v50_v17 = vld [vmem:[%s4862_s2 + $0x10] sm:$0xff]  ;;  %v51_v21 = vld [vmem:[%s4862_s2 + $0x18] sm:$0xff]  ;;  %s3424_s24 = smov 112   ;;  %s3425_s25 = smov 48  }
   0xe   :  { %v52_v25 = vld [vmem:[%s4862_s2 + $0x20] sm:$0xff]  ;;  %v53_v29 = vld [vmem:[%s4862_s2 + $0x28] sm:$0xff]  ;;  %s3426_s16 = smov 64   ;;  %s3427_s17 = smov 16  }
   0xf   :  { %v48_v33 = vld [vmem:[%s4862_s2] sm:$0xff]  ;;  %s2925_s26 = sshll.u32 %s4870_s10, 4  ;;  %s2926_s26 = int_to_ptr.hbm [resolvable:$true] %s2925_s26 }
  0x12   :  { %v3182_v37 = vpop.eup %3181 }
  0x13   :  { %v130_v38 = vmul.f32 32.0, %v3182_v37  ;;  %vm134_vm2 = vweird.f32 %v3182_v37 }
  0x15   :  { %2935 = vmatmul.msk.f32.gmra.mxu0 %vm54_vm0, %v37_v7  ;;  %v131_v39 = vsub.f32 1.0, %v130_v38 }
  0x17   :  { %v132_v40 = vmul.f32 %v3182_v37, %v131_v39 }
  0x19   :  { %v133_v41 = vadd.f32 %v3182_v37, %v132_v40 }
  0x1b   :  { %v3550_v42 = vsel %vm134_vm2, %v3182_v37, %v133_v41 }
  0x1d   :  { %2936 = vmatmul.msk.f32.gmra.mxu0 %vm54_vm0, %v38_v8 }
  0x25   :  { %2937 = vmatmul.msk.f32.gmra.mxu0 %vm54_vm0, %v39_v9 }
  0x2d   :  { %2938 = vmatmul.msk.f32.gmra.mxu0 %vm54_vm0, %v40_v10 }
  0x35   :  { %2939 = vmatmul.msk.f32.gmra.mxu0 %vm54_vm0, %v41_v11 }
  0x8a   :  { %v90_v12 = vpop.f32.mrf.mxu0 }
  0x8b   :  { %v91_v34 = vadd.f32 %v90_v12, %v48_v33  ;;  %v3601_v33 = vld [vmem:[%s4863_s3 + $0x1] ss:$0 sm:$0xff] }
  0x8d   :  { %v111_v35 = vsel %vm110_vm1, %v91_v34, 0.0 }
  0x92   :  { %v93_v14 = vpop.f32.mrf.mxu0 }
  0x93   :  { %v94_v15 = vadd.f32 %v93_v14, %v49_v13 }
  0x95   :  { %v114_v16 = vsel %vm110_vm1, %v94_v15, 0.0 }
  0x96   :  { %115 = vadd.xlane.f32.xlu2 %v114_v16 }
  0x9a   :  { %v96_v18 = vpop.f32.mrf.mxu0 }
  0x9b   :  { %v97_v19 = vadd.f32 %v96_v18, %v50_v17 }
  0x9d   :  { %v117_v20 = vsel %vm110_vm1, %v97_v19, 0.0 }
  0x9e   :  { %118 = vadd.xlane.f32.xlu2 %v117_v20 }
  0xa2   :  { %v99_v22 = vpop.f32.mrf.mxu0 }
  0xa3   :  { %v100_v23 = vadd.f32 %v99_v22, %v51_v21 }
  0xa5   :  { %v120_v24 = vsel %vm110_vm1, %v100_v23, 0.0 }
  0xa6   :  { %121 = vadd.xlane.f32.xlu0 %v120_v24 }
  0xaa   :  { %v102_v26 = vpop.f32.mrf.mxu0 }
  0xab   :  { %v103_v27 = vadd.f32 %v102_v26, %v52_v25 }
  0xad   :  { %v123_v28 = vsel %vm110_vm1, %v103_v27, 0.0 }
  0xae   :  { %124 = vadd.xlane.f32.xlu0 %v123_v28 }
  0xb2   :  { %v105_v30 = vpop.f32.mrf.mxu0 }
  0xb3   :  { %v106_v31 = vadd.f32 %v105_v30, %v53_v29  ;;  %v3595_v29 = vld [vmem:[%s4863_s3] ss:$0 sm:$0xff] }
  0xb5   :  { %v126_v32 = vsel %vm110_vm1, %v106_v31, 0.0 }
  0xb6   :  { %127 = vadd.xlane.f32.xlu1 %v126_v32 }
  0xbe   :  { %112 = vadd.xlane.f32.xlu1 %v111_v35 }
 0x109   :  { %v116_v47 = vpop.xlane.xlu2 %115 }
 0x10a   :  { %v137_v51 = vmul.f32 %v3550_v42, %v116_v47 }
 0x10c   :  { %v3564_v54 = vsub.f32 %v94_v15, %v137_v51 }
 0x10e   :  { %v149_v61 = vmul.f32 %v3564_v54, %v3564_v54 }
 0x110   :  { %v157_v1 = vsel %vm110_vm1, %v149_v61, 0.0 }
 0x111   :  { %v119_v56 = vpop.xlane.xlu2 %118 }
 0x112   :  { %v138_v59 = vmul.f32 %v3550_v42, %v119_v56 }
 0x114   :  { %v3575_v63 = vsub.f32 %v97_v19, %v138_v59 }
 0x116   :  { %v150_v5 = vmul.f32 %v3575_v63, %v3575_v63 }
 0x118   :  { %v160_v7 = vsel %vm110_vm1, %v150_v5, 0.0 }
 0x119   :  { %v122_v43 = vpop.xlane.xlu0 %121 }
 0x11a   :  { %v139_v44 = vmul.f32 %v3550_v42, %v122_v43 }
 0x11c   :  { %v3553_v45 = vsub.f32 %v100_v23, %v139_v44 }
 0x11e   :  { %v151_v46 = vmul.f32 %v3553_v45, %v3553_v45 }
 0x120   :  { %v163_v48 = vsel %vm110_vm1, %v151_v46, 0.0 }
 0x121   :  { %164 = vadd.xlane.f32.xlu0 %v163_v48  ;;  %v125_v49 = vpop.xlane.xlu0 %124 }
 0x122   :  { %v140_v50 = vmul.f32 %v3550_v42, %v125_v49 }
 0x124   :  { %v3560_v52 = vsub.f32 %v103_v27, %v140_v50 }
 0x126   :  { %v152_v53 = vmul.f32 %v3560_v52, %v3560_v52 }
 0x128   :  { %v166_v55 = vsel %vm110_vm1, %v152_v53, 0.0 }
 0x129   :  { %v128_v57 = vpop.xlane.xlu1 %127  ;;  %167 = vadd.xlane.f32.xlu1 %v166_v55 }
 0x12a   :  { %v141_v58 = vmul.f32 %v3550_v42, %v128_v57 }
 0x12c   :  { %v3569_v60 = vsub.f32 %v106_v31, %v141_v58 }
 0x12e   :  { %v153_v62 = vmul.f32 %v3569_v60, %v3569_v60 }
 0x130   :  { %v169_v0 = vsel %vm110_vm1, %v153_v62, 0.0 }
 0x131   :  { %170 = vadd.xlane.f32.xlu2 %v169_v0  ;;  %158 = vadd.xlane.f32.xlu1 %v157_v1  ;;  %v113_v2 = vpop.xlane.xlu1 %112 }
 0x132   :  { %v136_v3 = vmul.f32 %v3550_v42, %v113_v2 }
 0x134   :  { %v3580_v4 = vsub.f32 %v91_v34, %v136_v3 }
 0x136   :  { %v148_v6 = vmul.f32 %v3580_v4, %v3580_v4 }
 0x138   :  { %v154_v8 = vsel %vm110_vm1, %v148_v6, 0.0 }
 0x139   :  { %161 = vadd.xlane.f32.xlu2 %v160_v7  ;;  %155 = vadd.xlane.f32.xlu0 %v154_v8 }
 0x194   :  { %v165_v9 = vpop.xlane.xlu0 %164 }
 0x195   :  { %v175_v10 = vmul.f32 %v165_v9, %v3550_v42 }
 0x197   :  { %v181_v11 = vadd.f32 1e-05, %v175_v10 }
 0x199   :  { %3183 = vrsqrt.f32 %v181_v11  ;;  %vm220_vm4 = vweird.f32 %v181_v11 }
 0x19c   :  { %v168_v12 = vpop.xlane.xlu1 %167 }
 0x19d   :  { %v176_v13 = vmul.f32 %v168_v12, %v3550_v42 }
 0x19f   :  { %v3184_v14 = vpop.eup %3183  ;;  %v182_v15 = vadd.f32 1e-05, %v176_v13 }
 0x1a0   :  { %v215_v16 = vmul.f32 %v3184_v14, %v181_v11  ;;  %vm221_vm3 = vweird.f32 %v3184_v14 }
 0x1a1   :  { %3185 = vrsqrt.f32 %v182_v15  ;;  %vm222_vm5 = vmor %vm220_vm4, %vm221_vm3  ;;  %vm230_vm7 = vweird.f32 %v182_v15 }
 0x1a2   :  { %v216_v17 = vmul.f32 %v3184_v14, %v215_v16 }
 0x1a4   :  { %v217_v18 = vmul.f32 0.5, %v216_v17  ;;  %v171_v19 = vpop.xlane.xlu2 %170  ;;  %v159_v20 = vpop.xlane.xlu1 %158 }
 0x1a5   :  { %v177_v21 = vmul.f32 %v171_v19, %v3550_v42  ;;  %v173_v22 = vmul.f32 %v159_v20, %v3550_v42 }
 0x1a6   :  { %v218_v23 = vsub.f32 1.5, %v217_v18 }
 0x1a7   :  { %v3186_v24 = vpop.eup %3185  ;;  %v183_v25 = vadd.f32 1e-05, %v177_v21  ;;  %v179_v26 = vadd.f32 1e-05, %v173_v22 }
 0x1a8   :  { %v219_v27 = vmul.f32 %v3184_v14, %v218_v23  ;;  %v225_v28 = vmul.f32 %v3186_v24, %v182_v15  ;;  %vm231_vm6 = vweird.f32 %v3186_v24 }
 0x1a9   :  { %3187 = vrsqrt.f32 %v183_v25  ;;  %vm232_vm8 = vmor %vm230_vm7, %vm231_vm6  ;;  %vm240_vm11 = vweird.f32 %v183_v25  ;;  %vm200_vm13 = vweird.f32 %v179_v26 }
 0x1aa   :  { %v226_v30 = vmul.f32 %v3186_v24, %v225_v28  ;;  %3189 = vrsqrt.f32 %v179_v26  ;;  %v223_v31 = vsel %vm222_vm5, %v3184_v14, %v219_v27 }
 0x1ab   :  { %v247_v32 = vmul.f32 %v223_v31, %v3553_v45 }
 0x1ac   :  { %v227_v34 = vmul.f32 0.5, %v226_v30  ;;  %v162_v35 = vpop.xlane.xlu2 %161  ;;  %v156_v36 = vpop.xlane.xlu0 %155 }
 0x1ad   :  { %v174_v37 = vmul.f32 %v162_v35, %v3550_v42  ;;  %v172_v38 = vmul.f32 %v156_v36, %v3550_v42  ;;  %v254_v39 = vmul.f32 %v3595_v29, %v247_v32 }
 0x1ae   :  { %v228_v40 = vsub.f32 1.5, %v227_v34 }
 0x1af   :  { %v3188_v41 = vpop.eup %3187  ;;  %v180_v43 = vadd.f32 1e-05, %v174_v37  ;;  %v178_v44 = vadd.f32 1e-05, %v172_v38  ;;  %v3607_v45 = vadd.f32 %v3601_v33, %v254_v39 }
 0x1b0   :  { %v3190_v46 = vpop.eup %3189  ;;  %v229_v47 = vmul.f32 %v3186_v24, %v228_v40  ;;  %v235_v48 = vmul.f32 %v3188_v41, %v183_v25  ;;  %vm241_vm9 = vweird.f32 %v3188_v41 }
 0x1b1   :  { %v195_v49 = vmul.f32 %v3190_v46, %v179_v26  ;;  %3191 = vrsqrt.f32 %v180_v43  ;;  %v281_v51 = vsel %vm110_vm1, %v3607_v45, 0.0  ;;  %vm201_vm10 = vweird.f32 %v3190_v46  ;;  %vm242_vm12 = vmor %vm240_vm11, %vm241_vm9 }
 0x1b2   :  { %v236_v50 = vmul.f32 %v3188_v41, %v235_v48  ;;  %3193 = vrsqrt.f32 %v178_v44  ;;  %282 = vadd.xlane.f32.xlu0 %v281_v51  ;;  %v233_v55 = vsel %vm232_vm8, %v3186_v24, %v229_v47  ;;  %vm202_vm14 = vmor %vm200_vm13, %vm201_vm10  ;;  %vm210_vm3 = vweird.f32 %v180_v43 }
 0x1b3   :  { %v196_v53 = vmul.f32 %v3190_v46, %v195_v49  ;;  %v248_v57 = vmul.f32 %v233_v55, %v3560_v52  ;;  %vm190_vm5 = vweird.f32 %v178_v44 }
 0x1b4   :  { %v237_v56 = vmul.f32 0.5, %v236_v50 }
 0x1b5   :  { %v197_v58 = vmul.f32 0.5, %v196_v53  ;;  %v255_v61 = vmul.f32 %v3595_v29, %v248_v57 }
 0x1b6   :  { %v238_v59 = vsub.f32 1.5, %v237_v56 }
 0x1b7   :  { %v3192_v62 = vpop.eup %3191  ;;  %v198_v0 = vsub.f32 1.5, %v197_v58  ;;  %v3614_v5 = vadd.f32 %v3601_v33, %v255_v61 }
 0x1b8   :  { %v3194_v1 = vpop.eup %3193  ;;  %v239_v2 = vmul.f32 %v3188_v41, %v238_v59  ;;  %v205_v3 = vmul.f32 %v3192_v62, %v180_v43  ;;  %vm211_vm15 = vweird.f32 %v3192_v62 }
 0x1b9   :  { %v199_v6 = vmul.f32 %v3190_v46, %v198_v0  ;;  %v185_v7 = vmul.f32 %v3194_v1, %v178_v44  ;;  %v284_v8 = vsel %vm110_vm1, %v3614_v5, 0.0  ;;  %vm191_vm2 = vweird.f32 %v3194_v1  ;;  %vm212_vm4 = vmor %vm210_vm3, %vm211_vm15 }
 0x1ba   :  { %v206_v52 = vmul.f32 %v3192_v62, %v205_v3  ;;  %v243_v9 = vsel %vm242_vm12, %v3188_v41, %v239_v2  ;;  %285 = vadd.xlane.f32.xlu1 %v284_v8  ;;  %vm192_vm6 = vmor %vm190_vm5, %vm191_vm2  ;;  %v418_v8 = vld [vmem:[%s4865_s5] sm:$0xff] }
 0x1bb   :  { %v186_v10 = vmul.f32 %v3194_v1, %v185_v7  ;;  %v249_v11 = vmul.f32 %v243_v9, %v3569_v60  ;;  %v203_v12 = vsel %vm202_vm14, %v3190_v46, %v199_v6  ;;  %v421_v6 = vld [vmem:[%s4865_s5 + $0x18] sm:$0xff]  ;;  %v420_v7 = vld [vmem:[%s4865_s5 + $0x10] sm:$0xff] }
 0x1bc   :  { %v207_v13 = vmul.f32 0.5, %v206_v52  ;;  %v245_v14 = vmul.f32 %v203_v12, %v3564_v54  ;;  %3089 = vmatpush.msra.mxu3 %v421_v6  ;;  %454 = vmatpush.msra.mxu1 %v421_v6  ;;  %v419_v52 = vld [vmem:[%s4865_s5 + $0x8] sm:$0xff] }
 0x1bd   :  { %v187_v15 = vmul.f32 0.5, %v186_v10  ;;  %v256_v16 = vmul.f32 %v3595_v29, %v249_v11 }
 0x1be   :  { %v208_v17 = vsub.f32 1.5, %v207_v13  ;;  %v252_v18 = vmul.f32 %v3595_v29, %v245_v14  ;;  %3090 = vmatpush.msra.mxu3 %v420_v7  ;;  %455 = vmatpush.msra.mxu1 %v420_v7 }
 0x1bf   :  { %v188_v19 = vsub.f32 1.5, %v187_v15  ;;  %v3623_v20 = vadd.f32 %v3601_v33, %v256_v16 }
 0x1c0   :  { %v209_v21 = vmul.f32 %v3192_v62, %v208_v17  ;;  %v3626_v60 = vadd.f32 %v3601_v33, %v252_v18  ;;  %3091 = vmatpush.msra.mxu3 %v419_v52  ;;  %456 = vmatpush.msra.mxu1 %v419_v52 }
 0x1c1   :  { %v189_v22 = vmul.f32 %v3194_v1, %v188_v19  ;;  %v287_v54 = vsel %vm110_vm1, %v3623_v20, 0.0 }
 0x1c2   :  { %288 = vadd.xlane.f32.xlu2 %v287_v54  ;;  %v275_v23 = vsel %vm110_vm1, %v3626_v60, 0.0  ;;  %v213_v24 = vsel %vm212_vm4, %v3192_v62, %v209_v21  ;;  %3092 = vmatpush.msra.mxu3 %v418_v8 }
 0x1c3   :  { %276 = vadd.xlane.f32.xlu1 %v275_v23  ;;  %v246_v25 = vmul.f32 %v213_v24, %v3575_v63  ;;  %v193_v26 = vsel %vm192_vm6, %v3194_v1, %v189_v22  ;;  %457 = vmatpush.msra.mxu1 %v418_v8 }
 0x1c4   :  { %v244_v27 = vmul.f32 %v193_v26, %v3580_v4 }
 0x1c5   :  { %v253_v28 = vmul.f32 %v3595_v29, %v246_v25 }
 0x1c6   :  { %v251_v30 = vmul.f32 %v3595_v29, %v244_v27 }
 0x1c7   :  { %v3637_v31 = vadd.f32 %v3601_v33, %v253_v28 }
 0x1c8   :  { %v3640_v32 = vadd.f32 %v3601_v33, %v251_v30  ;;  %v3710_v30 = vld [vmem:[%s4863_s3 + $0x4] ss:$0 sm:$0xff] }
 0x1c9   :  { %v278_v34 = vsel %vm110_vm1, %v3637_v31, 0.0 }
 0x1ca   :  { %279 = vadd.xlane.f32.xlu2 %v278_v34  ;;  %v272_v63 = vsel %vm110_vm1, %v3640_v32, 0.0 }
 0x1cb   :  { %273 = vadd.xlane.f32.xlu0 %v272_v63 }
 0x225   :  { %v283_v35 = vpop.xlane.xlu0 %282 }
 0x226   :  { %v293_v4 = vmul.f32 %v283_v35, %v3550_v42 }
 0x228   :  { %v3648_v36 = vsub.f32 %v3607_v45, %v293_v4 }
 0x22a   :  { %v305_v29 = vmul.f32 %v3648_v36, %v3648_v36 }
 0x22c   :  { %v317_v33 = vsel %vm110_vm1, %v305_v29, 0.0  ;;  %v3716_v29 = vld [vmem:[%s4863_s3 + $0x5] ss:$0 sm:$0xff] }
 0x22d   :  { %318 = vadd.xlane.f32.xlu0 %v317_v33  ;;  %v286_v37 = vpop.xlane.xlu1 %285 }
 0x22e   :  { %v294_v38 = vmul.f32 %v286_v37, %v3550_v42 }
 0x230   :  { %v3655_v39 = vsub.f32 %v3614_v5, %v294_v38 }
 0x232   :  { %v306_v40 = vmul.f32 %v3655_v39, %v3655_v39 }
 0x234   :  { %v320_v43 = vsel %vm110_vm1, %v306_v40, 0.0 }
 0x235   :  { %v289_v41 = vpop.xlane.xlu2 %288  ;;  %321 = vadd.xlane.f32.xlu1 %v320_v43 }
 0x236   :  { %v295_v44 = vmul.f32 %v289_v41, %v3550_v42  ;;  %v277_v46 = vpop.xlane.xlu1 %276 }
 0x237   :  { %v291_v47 = vmul.f32 %v277_v46, %v3550_v42 }
 0x238   :  { %v3663_v48 = vsub.f32 %v3623_v20, %v295_v44 }
 0x239   :  { %v3666_v49 = vsub.f32 %v3626_v60, %v291_v47 }
 0x23a   :  { %v307_v50 = vmul.f32 %v3663_v48, %v3663_v48 }
 0x23b   :  { %v303_v51 = vmul.f32 %v3666_v49, %v3666_v49 }
 0x23c   :  { %v323_v53 = vsel %vm110_vm1, %v307_v50, 0.0 }
 0x23d   :  { %324 = vadd.xlane.f32.xlu2 %v323_v53  ;;  %v280_v55 = vpop.xlane.xlu2 %279  ;;  %v311_v56 = vsel %vm110_vm1, %v303_v51, 0.0 }
 0x23e   :  { %v292_v57 = vmul.f32 %v280_v55, %v3550_v42  ;;  %v274_v58 = vpop.xlane.xlu0 %273  ;;  %312 = vadd.xlane.f32.xlu1 %v311_v56 }
 0x23f   :  { %v290_v59 = vmul.f32 %v274_v58, %v3550_v42 }
 0x240   :  { %v3677_v61 = vsub.f32 %v3637_v31, %v292_v57 }
 0x241   :  { %v3680_v62 = vsub.f32 %v3640_v32, %v290_v59 }
 0x242   :  { %v304_v0 = vmul.f32 %v3677_v61, %v3677_v61 }
 0x243   :  { %v302_v1 = vmul.f32 %v3680_v62, %v3680_v62 }
 0x244   :  { %v314_v2 = vsel %vm110_vm1, %v304_v0, 0.0 }
 0x245   :  { %315 = vadd.xlane.f32.xlu2 %v314_v2  ;;  %v308_v3 = vsel %vm110_vm1, %v302_v1, 0.0 }
 0x246   :  { %309 = vadd.xlane.f32.xlu0 %v308_v3 }
 0x2a0   :  { %v319_v9 = vpop.xlane.xlu0 %318 }
 0x2a1   :  { %v329_v10 = vmul.f32 %v319_v9, %v3550_v42 }
 0x2a3   :  { %v335_v11 = vadd.f32 1e-05, %v329_v10 }
 0x2a5   :  { %3195 = vrsqrt.f32 %v335_v11  ;;  %vm374_vm8 = vweird.f32 %v335_v11 }
 0x2a8   :  { %v322_v12 = vpop.xlane.xlu1 %321 }
 0x2a9   :  { %v330_v13 = vmul.f32 %v322_v12, %v3550_v42 }
 0x2ab   :  { %v3196_v14 = vpop.eup %3195  ;;  %v336_v15 = vadd.f32 1e-05, %v330_v13 }
 0x2ac   :  { %v369_v16 = vmul.f32 %v3196_v14, %v335_v11  ;;  %vm375_vm7 = vweird.f32 %v3196_v14 }
 0x2ad   :  { %3197 = vrsqrt.f32 %v336_v15  ;;  %vm376_vm9 = vmor %vm374_vm8, %vm375_vm7  ;;  %vm384_vm11 = vweird.f32 %v336_v15 }
 0x2ae   :  { %v370_v17 = vmul.f32 %v3196_v14, %v369_v16 }
 0x2b0   :  { %v325_v18 = vpop.xlane.xlu2 %324  ;;  %v371_v19 = vmul.f32 0.5, %v370_v17 }
 0x2b1   :  { %v331_v21 = vmul.f32 %v325_v18, %v3550_v42  ;;  %v313_v22 = vpop.xlane.xlu1 %312 }
 0x2b2   :  { %v327_v54 = vmul.f32 %v313_v22, %v3550_v42  ;;  %v372_v23 = vsub.f32 1.5, %v371_v19 }
 0x2b3   :  { %v337_v24 = vadd.f32 1e-05, %v331_v21  ;;  %v3198_v25 = vpop.eup %3197 }
 0x2b4   :  { %v3704_v26 = vadd.f32 1e-05, %v327_v54  ;;  %v373_v27 = vmul.f32 %v3196_v14, %v372_v23  ;;  %v379_v28 = vmul.f32 %v3198_v25, %v336_v15  ;;  %vm385_vm10 = vweird.f32 %v3198_v25 }
 0x2b5   :  { %3199 = vrsqrt.f32 %v337_v24  ;;  %vm386_vm12 = vmor %vm384_vm11, %vm385_vm10  ;;  %vm394_vm14 = vweird.f32 %v337_v24  ;;  %vm495_vm11 = vcmask 130048  }
 0x2b6   :  { %3201 = vrsqrt.f32 %v3704_v26  ;;  %v377_v34 = vsel %vm376_vm9, %v3196_v14, %v373_v27  ;;  %v380_v63 = vmul.f32 %v3198_v25, %v379_v28  ;;  %vm354_vm6 = vweird.f32 %v3704_v26 }
 0x2b7   :  { %v401_v4 = vmul.f32 %v377_v34, %v3648_v36 }
 0x2b8   :  { %v316_v35 = vpop.xlane.xlu2 %315  ;;  %v381_v33 = vmul.f32 0.5, %v380_v63 }
 0x2b9   :  { %v328_v37 = vmul.f32 %v316_v35, %v3550_v42  ;;  %v310_v38 = vpop.xlane.xlu0 %309  ;;  %v408_v41 = vmul.f32 %v3710_v30, %v401_v4 }
 0x2ba   :  { %v326_v40 = vmul.f32 %v310_v38, %v3550_v42  ;;  %v382_v44 = vsub.f32 1.5, %v381_v33 }
 0x2bb   :  { %v3200_v43 = vpop.eup %3199  ;;  %v334_v46 = vadd.f32 1e-05, %v328_v37  ;;  %v415_v51 = vadd.f32 %v3716_v29, %v408_v41 }
 0x2bc   :  { %v3202_v47 = vpop.eup %3201  ;;  %v389_v50 = vmul.f32 %v3200_v43, %v337_v24  ;;  %v332_v36 = vadd.f32 1e-05, %v326_v40  ;;  %v383_v53 = vmul.f32 %v3198_v25, %v382_v44  ;;  %vm395_vm13 = vweird.f32 %v3200_v43 }
 0x2bd   :  { %v349_v55 = vmul.f32 %v3202_v47, %v3704_v26  ;;  %3203 = vrsqrt.f32 %v334_v46  ;;  %2943 = vmatmul.msk.f32.vlgmr.msra.gmra.mxu3 %vm110_vm1, %v415_v51  ;;  %vm396_vm15 = vmor %vm394_vm14, %vm395_vm13  ;;  %vm355_vm3 = vweird.f32 %v3202_v47  ;;  %vm364_vm9 = vweird.f32 %v334_v46 }
 0x2be   :  { %v390_v56 = vmul.f32 %v3200_v43, %v389_v50  ;;  %3205 = vrsqrt.f32 %v332_v36  ;;  %v387_v57 = vsel %vm386_vm12, %v3198_v25, %v383_v53  ;;  %vm344_vm4 = vweird.f32 %v332_v36  ;;  %vm356_vm7 = vmor %vm354_vm6, %vm355_vm3 }
 0x2bf   :  { %v402_v59 = vmul.f32 %v387_v57, %v3655_v39  ;;  %v350_v0 = vmul.f32 %v3202_v47, %v349_v55 }
 0x2c0   :  { %v391_v58 = vmul.f32 0.5, %v390_v56 }
 0x2c1   :  { %v409_v2 = vmul.f32 %v3710_v30, %v402_v59  ;;  %v351_v8 = vmul.f32 0.5, %v350_v0 }
 0x2c2   :  { %v392_v1 = vsub.f32 1.5, %v391_v58 }
 0x2c3   :  { %v3204_v3 = vpop.eup %3203  ;;  %v416_v52 = vadd.f32 %v3716_v29, %v409_v2  ;;  %v352_v13 = vsub.f32 1.5, %v351_v8 }
 0x2c4   :  { %v3206_v6 = vpop.eup %3205  ;;  %v393_v7 = vmul.f32 %v3200_v43, %v392_v1  ;;  %v359_v9 = vmul.f32 %v3204_v3, %v334_v46  ;;  %vm365_vm8 = vweird.f32 %v3204_v3 }
 0x2c5   :  { %v339_v10 = vmul.f32 %v3206_v6, %v332_v36  ;;  %2944 = vmatmul.msk.f32.gmra.mxu3 %vm110_vm1, %v416_v52  ;;  %vm345_vm2 = vweird.f32 %v3206_v6  ;;  %v353_v19 = vmul.f32 %v3202_v47, %v352_v13  ;;  %vm366_vm10 = vmor %vm364_vm9, %vm365_vm8 }
 0x2c6   :  { %v397_v11 = vsel %vm396_vm15, %v3200_v43, %v393_v7  ;;  %v360_v14 = vmul.f32 %v3204_v3, %v359_v9  ;;  %vm346_vm5 = vmor %vm344_vm4, %vm345_vm2 }
 0x2c7   :  { %v340_v12 = vmul.f32 %v3206_v6, %v339_v10  ;;  %v403_v39 = vmul.f32 %v397_v11, %v3663_v48  ;;  %v357_v23 = vsel %vm356_vm7, %v3202_v47, %v353_v19  ;;  %v265_v19 = vld [vmem:[%s4864_s4 + $0x8] sm:$0xff] }
 0x2c8   :  { %v361_v21 = vmul.f32 0.5, %v360_v14  ;;  %v399_v28 = vmul.f32 %v357_v23, %v3666_v49  ;;  %v3165_v49 = vld [vmem:[%s4863_s3 + $0x6] ss:$0 sm:$0xff] }
 0x2c9   :  { %v341_v15 = vmul.f32 0.5, %v340_v12  ;;  %v410_v16 = vmul.f32 %v3710_v30, %v403_v39  ;;  %v264_v14 = vld [vmem:[%s4864_s4] sm:$0xff] }
 0x2ca   :  { %v362_v24 = vsub.f32 1.5, %v361_v21  ;;  %v406_v26 = vmul.f32 %v3710_v30, %v399_v28 }
 0x2cb   :  { %v342_v17 = vsub.f32 1.5, %v341_v15  ;;  %v417_v18 = vadd.f32 %v3716_v29, %v410_v16 }
 0x2cc   :  { %v363_v34 = vmul.f32 %v3204_v3, %v362_v24  ;;  %v413_v35 = vadd.f32 %v3716_v29, %v406_v26 }
 0x2cd   :  { %v343_v22 = vmul.f32 %v3206_v6, %v342_v17  ;;  %2945 = vmatmul.msk.f32.gmra.mxu3 %vm110_vm1, %v417_v18 }
 0x2ce   :  { %v367_v63 = vsel %vm366_vm10, %v3204_v3, %v363_v34 }
 0x2cf   :  { %v347_v48 = vsel %vm346_vm5, %v3206_v6, %v343_v22 }
 0x2d0   :  { %v398_v54 = vmul.f32 %v347_v48, %v3680_v62  ;;  %v400_v62 = vmul.f32 %v367_v63, %v3677_v61 }
 0x2d2   :  { %v405_v25 = vmul.f32 %v3710_v30, %v398_v54  ;;  %v407_v4 = vmul.f32 %v3710_v30, %v400_v62  ;;  %v267_v62 = vld [vmem:[%s4864_s4 + $0x18] sm:$0xff] }
 0x2d4   :  { %v412_v27 = vadd.f32 %v3716_v29, %v405_v25  ;;  %v414_v33 = vadd.f32 %v3716_v29, %v407_v4  ;;  %v266_v25 = vld [vmem:[%s4864_s4 + $0x10] sm:$0xff] }
 0x2d6   :  { %2940 = vmatmul.msk.f32.vlgmr.msra.gmra.mxu1 %vm110_vm1, %v412_v27 }
 0x2de   :  { %2941 = vmatmul.msk.f32.gmra.mxu1 %vm110_vm1, %v413_v35 }
 0x2e6   :  { %2942 = vmatmul.msk.f32.gmra.mxu1 %vm110_vm1, %v414_v33 }
 0x340   :  { %v468_v37 = vpop.f32.mrf.mxu3 }
 0x341   :  { %v3748_v38 = vadd.f32 %v3165_v49, %v468_v37 }
 0x343   :  { %788 = vrot.lane.b32.xlu2 %v3748_v38, %s3422_s22 }
 0x348   :  { %v471_v61 = vpop.f32.mrf.mxu3 }
 0x349   :  { %v3752_v40 = vadd.f32 %v3165_v49, %v471_v61 }
 0x34b   :  { %790 = vrot.lane.b32.xlu1 %v3752_v40, %s3422_s22 }
 0x350   :  { %v474_v30 = vpop.f32.mrf.mxu3 }
 0x351   :  { %v3756_v29 = vadd.f32 %v3165_v49, %v474_v30  ;;  %v269_v30 = vld [vmem:[%s4864_s4 + $0x28] sm:$0xff] }
 0x353   :  { %v459_v41 = vpop.f32.mrf.mxu1  ;;  %792 = vrot.lane.b32.xlu0 %v3756_v29, %s3422_s22  ;;  %v3798_v36 = vpack.i.bf16 %v3752_v40, %v3756_v29 }
 0x354   :  { %v3758_v43 = vadd.f32 %v3165_v49, %v459_v41 }
 0x356   :  { %782 = vrot.lane.b32.xlu1 %v3758_v43, %s3422_s22 }
 0x35b   :  { %v462_v44 = vpop.f32.mrf.mxu1 }
 0x35c   :  { %v3764_v46 = vadd.f32 %v3165_v49, %v462_v44 }
 0x35e   :  { %491 = vrot.lane.b32.xlu1 %v3752_v40, %s3423_s23  ;;  %784 = vrot.lane.b32.xlu2 %v3764_v46, %s3422_s22  ;;  %v3863_v44 = vpack.i.bf16 %v3758_v43, %v3764_v46 }
 0x363   :  { %v465_v47 = vpop.f32.mrf.mxu1 }
 0x364   :  { %v3770_v50 = vadd.f32 %v3165_v49, %v465_v47 }
 0x366   :  { %487 = vrot.lane.b32.xlu1 %v3770_v50, %s3423_s23  ;;  %786 = vrot.lane.b32.xlu0 %v3770_v50, %s3422_s22 }
 0x367   :  { %493 = vrot.lane.b32.xlu2 %v3756_v29, %s3423_s23 }
 0x36e   :  { %483 = vrot.lane.b32.xlu1 %v3758_v43, %s3423_s23  ;;  %770 = vrot.lane.b32.xlu0 %v3758_v43, %s3424_s24 }
 0x36f   :  { %489 = vrot.lane.b32.xlu2 %v3748_v38, %s3423_s23 }
 0x376   :  { %780 = vrot.lane.b32.xlu1 %v3756_v29, %s3424_s24  ;;  %772 = vrot.lane.b32.xlu0 %v3764_v46, %s3424_s24 }
 0x377   :  { %485 = vrot.lane.b32.xlu2 %v3764_v46, %s3423_s23 }
 0x37e   :  { %774 = vrot.lane.b32.xlu0 %v3770_v50, %s3424_s24 }
 0x37f   :  { %778 = vrot.lane.b32.xlu2 %v3752_v40, %s3424_s24 }
 0x386   :  { %776 = vrot.lane.b32.xlu0 %v3748_v38, %s3424_s24 }
 0x38e   :  { %3102 = vrot.lane.b32.xlu0 %v3798_v36, %s3425_s25 }
 0x39d   :  { %v789_v51 = vpop.permute.xlu2 %788 }
 0x3b8   :  { %v785_v53 = vpop.permute.xlu2 %784 }
 0x3bd   :  { %v791_v55 = vpop.permute.xlu1 %790 }
 0x3c1   :  { %v494_v56 = vpop.permute.xlu2 %493 }
 0x3c2   :  { %2946 = vmatpush.xpose.msk.msra.mxu2 %vm495_vm11, %v494_v56 }
 0x3c5   :  { %v793_v57 = vpop.permute.xlu0 %792 }
 0x3c6   :  { %2964 = vmatpush.xpose.msk.msrb.mxu1 %vm495_vm11, %v793_v57 }
 0x3c8   :  { %v783_v58 = vpop.permute.xlu1 %782 }
 0x3c9   :  { %v490_v0 = vpop.permute.xlu2 %489 }
 0x3ca   :  { %2965 = vmatpush.xpose.msk.msrb.mxu1 %vm495_vm11, %v791_v55 }
 0x3ce   :  { %2966 = vmatpush.xpose.msk.msrb.mxu1 %vm495_vm11, %v789_v51  ;;  %v3869_v51 = vpack.i.bf16 %v3770_v50, %v3748_v38 }
 0x3d0   :  { %v492_v59 = vpop.permute.xlu1 %491 }
 0x3d1   :  { %2947 = vmatpush.xpose.msk.msra.mxu2 %vm495_vm11, %v492_v59  ;;  %v486_v3 = vpop.permute.xlu2 %485 }
 0x3d5   :  { %2948 = vmatpush.xpose.msk.msra.mxu2 %vm495_vm11, %v490_v0 }
 0x3d8   :  { %v787_v1 = vpop.permute.xlu0 %786  ;;  %v488_v2 = vpop.permute.xlu1 %487 }
 0x3d9   :  { %2949 = vmatpush.xpose.msk.msra.mxu2 %vm495_vm11, %v488_v2  ;;  %2967 = vmatpush.xpose.msk.msrb.mxu1 %vm495_vm11, %v787_v1  ;;  %v779_v12 = vpop.permute.xlu2 %778 }
 0x3dd   :  { %2950 = vmatpush.xpose.msk.msra.mxu2 %vm495_vm11, %v486_v3  ;;  %2968 = vmatpush.xpose.msk.msrb.mxu1 %vm495_vm11, %v785_v53 }
 0x3e0   :  { %v771_v6 = vpop.permute.xlu0 %770  ;;  %v484_v7 = vpop.permute.xlu1 %483 }
 0x3e1   :  { %2951 = vmatpush.xpose.msk.msra.mxu2 %vm495_vm11, %v484_v7  ;;  %2969 = vmatpush.xpose.msk.msrb.mxu1 %vm495_vm11, %v783_v58 }
 0x3e4   :  { %2952 = vmatmul.msk.f32.vlgmr.msra.gmra.mxu2 %vm495_vm11, %v3758_v43  ;;  %2970 = vmatmul.msk.f32.vlgmr.msrb.gmra.mxu1 %vm495_vm11, %v771_v6 }
 0x3e8   :  { %v773_v52 = vpop.permute.xlu0 %772  ;;  %v781_v13 = vpop.permute.xlu1 %780 }
 0x3ec   :  { %2953 = vmatmul.msk.f32.gmra.mxu2 %vm495_vm11, %v3764_v46  ;;  %2971 = vmatmul.msk.f32.gmra.mxu1 %vm495_vm11, %v773_v52 }
 0x3f0   :  { %v775_v8 = vpop.permute.xlu0 %774 }
 0x3f4   :  { %2954 = vmatmul.msk.f32.gmra.mxu2 %vm495_vm11, %v3770_v50  ;;  %2972 = vmatmul.msk.f32.gmra.mxu1 %vm495_vm11, %v775_v8  ;;  %v268_v50 = vld [vmem:[%s4864_s4 + $0x20] sm:$0xff] }
 0x3f8   :  { %v777_v9 = vpop.permute.xlu0 %776 }
 0x3fc   :  { %2955 = vmatmul.msk.f32.gmra.mxu2 %vm495_vm11, %v3748_v38  ;;  %2973 = vmatmul.msk.f32.gmra.mxu1 %vm495_vm11, %v777_v9 }
 0x400   :  { %v3103_v10 = vpop.permute.xlu0 %3102 }
 0x401   :  { %v3104_v11 = vunpack.i.l.bf16 %v3103_v10  ;;  %v3105_v39 = vunpack.i.h.bf16 %v3103_v10 }
 0x403   :  { %1043 = vmatpush.msrb.mxu0 %v3104_v11 }
 0x404   :  { %2956 = vmatmul.msk.f32.gmra.mxu2 %vm495_vm11, %v3752_v40  ;;  %2974 = vmatmul.msk.f32.gmra.mxu1 %vm495_vm11, %v779_v12 }
 0x405   :  { %1044 = vmatpush.msrb.mxu0 %v3105_v39 }
 0x40c   :  { %2957 = vmatmul.msk.f32.gmra.mxu2 %vm495_vm11, %v3756_v29  ;;  %2975 = vmatmul.msk.f32.gmra.mxu1 %vm495_vm11, %v781_v13 }
 0x461   :  { %v835_v15 = vpop.f32.mrf.mxu1 }
 0x462   :  { %v836_v16 = vadd.f32 %v835_v15, %v264_v14 }
 0x464   :  { %v853_v17 = vsel %vm54_vm0, %v836_v16, -inf }
 0x465   :  { %854 = vmax.xlane.f32.xlu0 %v853_v17 }
 0x467   :  { %v537_v18 = vpop.f32.mrf.mxu2 }
 0x468   :  { %v538_v21 = vadd.f32 %v537_v18, %v264_v14 }
 0x469   :  { %v838_v22 = vpop.f32.mrf.mxu1 }
 0x46a   :  { %v839_v48 = vadd.f32 %v838_v22, %v265_v19  ;;  %v555_v54 = vsel %vm54_vm0, %v538_v21, -inf }
 0x46b   :  { %556 = vmax.xlane.f32.xlu1 %v555_v54 }
 0x46c   :  { %v856_v23 = vsel %vm54_vm0, %v839_v48, -inf }
 0x46d   :  { %857 = vmax.xlane.f32.xlu2 %v856_v23 }
 0x46f   :  { %v540_v24 = vpop.f32.mrf.mxu2 }
 0x470   :  { %v3844_v27 = vadd.f32 %v540_v24, %v265_v19 }
 0x471   :  { %v841_v28 = vpop.f32.mrf.mxu1 }
 0x472   :  { %v842_v34 = vadd.f32 %v841_v28, %v266_v25  ;;  %v558_v26 = vsel %vm54_vm0, %v3844_v27, -inf }
 0x474   :  { %v859_v63 = vsel %vm54_vm0, %v842_v34, -inf }
 0x475   :  { %559 = vmax.xlane.f32.xlu2 %v558_v26  ;;  %860 = vmax.xlane.f32.xlu1 %v859_v63 }
 0x477   :  { %v543_v35 = vpop.f32.mrf.mxu2 }
 0x478   :  { %v3881_v56 = vadd.f32 %v543_v35, %v266_v25 }
 0x479   :  { %v844_v4 = vpop.f32.mrf.mxu1 }
 0x47a   :  { %v3852_v33 = vadd.f32 %v844_v4, %v267_v62  ;;  %v561_v57 = vsel %vm54_vm0, %v3881_v56, -inf }
 0x47c   :  { %v862_v49 = vsel %vm54_vm0, %v3852_v33, -inf }
 0x47d   :  { %863 = vmax.xlane.f32.xlu0 %v862_v49 }
 0x47f   :  { %v546_v37 = vpop.f32.mrf.mxu2 }
 0x480   :  { %v3879_v46 = vadd.f32 %v546_v37, %v267_v62 }
 0x481   :  { %v847_v61 = vpop.f32.mrf.mxu1 }
 0x482   :  { %v564_v38 = vsel %vm54_vm0, %v3879_v46, -inf  ;;  %v3890_v58 = vadd.f32 %v847_v61, %v268_v50 }
 0x484   :  { %v865_v59 = vsel %vm54_vm0, %v3890_v58, -inf }
 0x487   :  { %v549_v40 = vpop.f32.mrf.mxu2 }
 0x488   :  { %v3894_v0 = vadd.f32 %v549_v40, %v268_v50 }
 0x489   :  { %v850_v29 = vpop.f32.mrf.mxu1 }
 0x48a   :  { %v3859_v41 = vadd.f32 %v850_v29, %v269_v30  ;;  %v567_v1 = vsel %vm54_vm0, %v3894_v0, -inf }
 0x48c   :  { %v868_v47 = vsel %vm54_vm0, %v3859_v41, -inf }
 0x48d   :  { %3112 = vrot.lane.b32.xlu2 %v3863_v44, %s3425_s25  ;;  %869 = vmax.xlane.f32.xlu0 %v868_v47 }
 0x48e   :  { %3107 = vrot.lane.b32.xlu1 %v3869_v51, %s3425_s25 }
 0x48f   :  { %v552_v53 = vpop.f32.mrf.mxu2 }
 0x490   :  { %v3875_v55 = vadd.f32 %v552_v53, %v269_v30 }
 0x492   :  { %v570_v43 = vsel %vm54_vm0, %v3875_v55, -inf }
 0x495   :  { %571 = vmax.xlane.f32.xlu0 %v570_v43 }
 0x4b6   :  { %565 = vmax.xlane.f32.xlu2 %v564_v38 }
 0x4b8   :  { %562 = vmax.xlane.f32.xlu1 %v561_v57 }
 0x4be   :  { %866 = vmax.xlane.f32.xlu2 %v865_v59 }
 0x4c6   :  { %568 = vmax.xlane.f32.xlu2 %v567_v1 }
 0x4d8   :  { %v855_v2 = vpop.xlane.xlu0 %854 }
 0x4d9   :  { %v871_v3 = vsub.f32 %v836_v16, %v855_v2 }
 0x4db   :  { %v877_v6 = vmul.f32 1.442695, %v871_v3 }
 0x4dd   :  { %3207 = vpow2.f32 %v877_v6 }
 0x4de   :  { %v557_v7 = vpop.xlane.xlu1 %556 }
 0x4df   :  { %v573_v52 = vsub.f32 %v538_v21, %v557_v7 }
 0x4e0   :  { %v858_v8 = vpop.xlane.xlu2 %857 }
 0x4e1   :  { %v579_v9 = vmul.f32 1.442695, %v573_v52  ;;  %v872_v10 = vsub.f32 %v839_v48, %v858_v8 }
 0x4e3   :  { %v3898_v11 = vpop.eup %3207  ;;  %3209 = vpow2.f32 %v579_v9  ;;  %v879_v12 = vmul.f32 1.442695, %v872_v10 }
 0x4e4   :  { %v889_v39 = vsel %vm54_vm0, %v3898_v11, 0.0 }
 0x4e5   :  { %3211 = vpow2.f32 %v879_v12  ;;  %890 = vadd.xlane.f32.xlu0 %v889_v39 }
 0x4e8   :  { %v560_v13 = vpop.xlane.xlu2 %559  ;;  %v861_v14 = vpop.xlane.xlu1 %860 }
 0x4e9   :  { %v3902_v15 = vpop.eup %3209  ;;  %v574_v16 = vsub.f32 %v3844_v27, %v560_v13  ;;  %v873_v17 = vsub.f32 %v842_v34, %v861_v14 }
 0x4ea   :  { %v591_v48 = vsel %vm54_vm0, %v3902_v15, 0.0 }
 0x4eb   :  { %v3905_v18 = vpop.eup %3211  ;;  %v581_v19 = vmul.f32 1.442695, %v574_v16  ;;  %v881_v21 = vmul.f32 1.442695, %v873_v17 }
 0x4ec   :  { %v892_v22 = vsel %vm54_vm0, %v3905_v18, 0.0 }
 0x4ed   :  { %3213 = vpow2.f32 %v581_v19  ;;  %893 = vadd.xlane.f32.xlu1 %v892_v22  ;;  %592 = vadd.xlane.f32.xlu0 %v591_v48 }
 0x4ee   :  { %3215 = vpow2.f32 %v881_v21 }
 0x4f0   :  { %v864_v54 = vpop.xlane.xlu0 %863  ;;  %v3113_v49 = vpop.permute.xlu2 %3112 }
 0x4f1   :  { %v874_v23 = vsub.f32 %v3852_v33, %v864_v54  ;;  %v3114_v40 = vunpack.i.l.bf16 %v3113_v49  ;;  %v3115_v30 = vunpack.i.h.bf16 %v3113_v49 }
 0x4f3   :  { %v3912_v24 = vpop.eup %3213  ;;  %v883_v25 = vmul.f32 1.442695, %v874_v23 }
 0x4f4   :  { %v3914_v27 = vpop.eup %3215  ;;  %v594_v28 = vsel %vm54_vm0, %v3912_v24, 0.0 }
 0x4f5   :  { %3217 = vpow2.f32 %v883_v25  ;;  %595 = vadd.xlane.f32.xlu1 %v594_v28  ;;  %v895_v34 = vsel %vm54_vm0, %v3914_v27, 0.0 }
 0x4f6   :  { %896 = vadd.xlane.f32.xlu2 %v895_v34 }
 0x4fb   :  { %v3920_v26 = vpop.eup %3217 }
 0x4fc   :  { %v898_v63 = vsel %vm54_vm0, %v3920_v26, 0.0 }
 0x4fd   :  { %899 = vadd.xlane.f32.xlu1 %v898_v63 }
 0x500   :  { %v870_v35 = vpop.xlane.xlu0 %869  ;;  %v3108_v62 = vpop.permute.xlu1 %3107 }
 0x501   :  { %v876_v4 = vsub.f32 %v3859_v41, %v870_v35  ;;  %v3109_v33 = vunpack.i.l.bf16 %v3108_v62  ;;  %v3110_v61 = vunpack.i.h.bf16 %v3108_v62 }
 0x503   :  { %v887_v37 = vmul.f32 1.442695, %v876_v4  ;;  %1045 = vmatpush.msrb.mxu0 %v3109_v33 }
 0x505   :  { %3219 = vpow2.f32 %v887_v37  ;;  %1046 = vmatpush.msrb.mxu0 %v3110_v61 }
 0x507   :  { %1047 = vmatpush.msrb.mxu0 %v3114_v40 }
 0x508   :  { %v572_v9 = vpop.xlane.xlu0 %571 }
 0x509   :  { %1048 = vmatpush.msrb.mxu0 %v3115_v30 }
 0x50b   :  { %v3925_v29 = vpop.eup %3219 }
 0x50c   :  { %v904_v47 = vsel %vm54_vm0, %v3925_v29, 0.0 }
 0x50d   :  { %905 = vadd.xlane.f32.xlu0 %v904_v47 }
 0x516   :  { %3122 = vrot.lane.b32.xlu1 %v3869_v51, %s3426_s16 }
 0x521   :  { %3117 = vrot.lane.b32.xlu0 %v3798_v36, %s3426_s16 }
 0x529   :  { %v566_v41 = vpop.xlane.xlu2 %565 }
 0x52a   :  { %v576_v1 = vsub.f32 %v3879_v46, %v566_v41 }
 0x52b   :  { %v563_v53 = vpop.xlane.xlu1 %562 }
 0x52c   :  { %v575_v50 = vsub.f32 %v3881_v56, %v563_v53  ;;  %v585_v36 = vmul.f32 1.442695, %v576_v1 }
 0x52e   :  { %v583_v59 = vmul.f32 1.442695, %v575_v50 }
 0x531   :  { %v867_v43 = vpop.xlane.xlu2 %866 }
 0x532   :  { %v875_v38 = vsub.f32 %v3890_v58, %v867_v43  ;;  %v578_v43 = vsub.f32 %v3875_v55, %v572_v9 }
 0x534   :  { %v885_v57 = vmul.f32 1.442695, %v875_v38 }
 0x536   :  { %3221 = vpow2.f32 %v885_v57 }
 0x537   :  { %3223 = vpow2.f32 %v583_v59 }
 0x539   :  { %v569_v2 = vpop.xlane.xlu2 %568 }
 0x53a   :  { %v577_v3 = vsub.f32 %v3894_v0, %v569_v2 }
 0x53c   :  { %v3937_v6 = vpop.eup %3221  ;;  %v587_v51 = vmul.f32 1.442695, %v577_v3  ;;  %v589_v3 = vmul.f32 1.442695, %v578_v43 }
 0x53d   :  { %v901_v7 = vsel %vm54_vm0, %v3937_v6, 0.0  ;;  %v3941_v56 = vpop.eup %3223 }
 0x53e   :  { %3225 = vpow2.f32 %v587_v51  ;;  %902 = vadd.xlane.f32.xlu2 %v901_v7  ;;  %v597_v0 = vsel %vm54_vm0, %v3941_v56, 0.0 }
 0x53f   :  { %3227 = vpow2.f32 %v585_v36 }
 0x544   :  { %v3943_v58 = vpop.eup %3225 }
 0x545   :  { %v603_v46 = vsel %vm54_vm0, %v3943_v58, 0.0  ;;  %v3949_v52 = vpop.eup %3227 }
 0x546   :  { %604 = vadd.xlane.f32.xlu1 %v603_v46  ;;  %598 = vadd.xlane.f32.xlu2 %v597_v0  ;;  %v600_v8 = vsel %vm54_vm0, %v3949_v52, 0.0 }
 0x54b   :  { %601 = vadd.xlane.f32.xlu0 %v600_v8 }
 0x558   :  { %v891_v10 = vpop.xlane.xlu0 %890 }
 0x559   :  { %3229 = vrcp.f32 %v891_v10  ;;  %v918_v17 = vand.u32 2147483648, %v891_v10  ;;  %vm912_vm13 = vweird.f32 %v891_v10  ;;  %v916_v21 = vand.u32 2147483647, %v891_v10 }
 0x55b   :  { %v919_v23 = vor.u32 1.1754944e-38, %v918_v17  ;;  %vm917_vm15 = vcmp.eq.f32.partialorder %v916_v21, 8.507059e+37 }
 0x55e   :  { %3127 = vrot.lane.b32.xlu2 %v3863_v44, %s3426_s16 }
 0x55f   :  { %v3230_v12 = vpop.eup %3229 }
 0x560   :  { %v908_v39 = vmul.f32 %v3230_v12, %v891_v10  ;;  %v894_v13 = vpop.xlane.xlu1 %893  ;;  %vm913_vm12 = vweird.f32 %v3230_v12 }
 0x561   :  { %3231 = vrcp.f32 %v894_v13  ;;  %vm914_vm14 = vmor %vm912_vm13, %vm913_vm12  ;;  %v933_v62 = vand.u32 2147483648, %v894_v13  ;;  %v931_v4 = vand.u32 2147483647, %v894_v13  ;;  %vm927_vm3 = vweird.f32 %v894_v13 }
 0x562   :  { %v909_v14 = vsub.f32 1.0, %v908_v39 }
 0x563   :  { %v934_v61 = vor.u32 1.1754944e-38, %v933_v62  ;;  %vm932_vm5 = vcmp.eq.f32.partialorder %v931_v4, 8.507059e+37 }
 0x564   :  { %v910_v16 = vmul.f32 %v3230_v12, %v909_v14  ;;  %v593_v14 = vpop.xlane.xlu0 %592 }
 0x566   :  { %v911_v19 = vadd.f32 %v3230_v12, %v910_v16 }
 0x567   :  { %v3232_v22 = vpop.eup %3231 }
 0x568   :  { %v3955_v48 = vpop.xlane.xlu1 %595  ;;  %v915_v54 = vsel %vm914_vm14, %v3230_v12, %v911_v19  ;;  %v923_v25 = vmul.f32 %v3232_v22, %v894_v13  ;;  %vm928_vm2 = vweird.f32 %v3232_v22 }
 0x569   :  { %v897_v28 = vpop.xlane.xlu2 %896  ;;  %v920_v34 = vsel %vm917_vm15, %v919_v23, %v915_v54  ;;  %vm929_vm4 = vmor %vm927_vm3, %vm928_vm2  ;;  %vm614_vm2 = vweird.f32 %v593_v14 }
 0x56a   :  { %3233 = vrcp.f32 %v897_v28  ;;  %v924_v44 = vsub.f32 1.0, %v923_v25  ;;  %v921_v63 = vmul.f32 %v3898_v11, %v920_v34  ;;  %v948_v53 = vand.u32 2147483648, %v897_v28 }
 0x56b   :  { %v946_v50 = vand.u32 2147483647, %v897_v28  ;;  %vm942_vm7 = vweird.f32 %v897_v28 }
 0x56c   :  { %v925_v35 = vmul.f32 %v3232_v22, %v924_v44  ;;  %2976 = vmatmul.msk.f32.vlgmr.msrb.gmra.mxu0 %vm54_vm0, %v921_v63  ;;  %v949_v1 = vor.u32 1.1754944e-38, %v948_v53  ;;  %v618_v53 = vand.u32 2147483647, %v593_v14 }
 0x56d   :  { %vm947_vm9 = vcmp.eq.f32.partialorder %v946_v50, 8.507059e+37 }
 0x56e   :  { %v926_v33 = vadd.f32 %v3232_v22, %v925_v35 }
 0x570   :  { %v3234_v49 = vpop.eup %3233  ;;  %v900_v37 = vpop.xlane.xlu1 %899  ;;  %v930_v30 = vsel %vm929_vm4, %v3232_v22, %v926_v33 }
 0x571   :  { %v938_v40 = vmul.f32 %v3234_v49, %v897_v28  ;;  %3235 = vrcp.f32 %v900_v37  ;;  %v935_v41 = vsel %vm932_vm5, %v934_v61, %v930_v30  ;;  %vm943_vm6 = vweird.f32 %v3234_v49 }
 0x572   :  { %v936_v11 = vmul.f32 %v3905_v18, %v935_v41  ;;  %vm944_vm8 = vmor %vm942_vm7, %vm943_vm6  ;;  %v963_v46 = vand.u32 2147483648, %v900_v37  ;;  %v961_v0 = vand.u32 2147483647, %v900_v37  ;;  %3237 = vpow2.f32 %v589_v3 }
 0x573   :  { %v939_v47 = vsub.f32 1.0, %v938_v40  ;;  %vm957_vm12 = vweird.f32 %v900_v37  ;;  %3239 = vrcp.f32 %v593_v14  ;;  %v620_v30 = vand.u32 2147483648, %v593_v14 }
 0x574   :  { %2977 = vmatmul.msk.f32.gmra.mxu0 %vm54_vm0, %v936_v11  ;;  %v964_v9 = vor.u32 1.1754944e-38, %v963_v46  ;;  %vm962_vm14 = vcmp.eq.f32.partialorder %v961_v0, 8.507059e+37  ;;  %vm619_vm5 = vcmp.eq.f32.partialorder %v618_v53, 8.507059e+37 }
 0x575   :  { %v940_v38 = vmul.f32 %v3234_v49, %v939_v47 }
 0x577   :  { %v3236_v57 = vpop.eup %3235  ;;  %v941_v59 = vadd.f32 %v3234_v49, %v940_v38 }
 0x578   :  { %v953_v2 = vmul.f32 %v3236_v57, %v900_v37  ;;  %vm958_vm10 = vweird.f32 %v3236_v57  ;;  %v3965_v13 = vpop.eup %3237 }
 0x579   :  { %v945_v51 = vsel %vm944_vm8, %v3234_v49, %v941_v59  ;;  %vm959_vm13 = vmor %vm957_vm12, %vm958_vm10  ;;  %v3240_v23 = vpop.eup %3239 }
 0x57a   :  { %v954_v36 = vsub.f32 1.0, %v953_v2  ;;  %v950_v7 = vsel %vm947_vm9, %v949_v1, %v945_v51  ;;  %v610_v25 = vmul.f32 %v3240_v23, %v593_v14  ;;  %vm615_vm15 = vweird.f32 %v3240_v23 }
 0x57b   :  { %v951_v18 = vmul.f32 %v3914_v27, %v950_v7  ;;  %v606_v27 = vsel %vm54_vm0, %v3965_v13, 0.0  ;;  %vm3985_vm3 = vmor %vm614_vm2, %vm615_vm15  ;;  %v621_v1 = vor.u32 1.1754944e-38, %v620_v30 }
 0x57c   :  { %v955_v55 = vmul.f32 %v3236_v57, %v954_v36  ;;  %v611_v28 = vsub.f32 1.0, %v610_v25 }
 0x57d   :  { %2978 = vmatmul.msk.f32.gmra.mxu0 %vm54_vm0, %v951_v18 }
 0x57e   :  { %v956_v8 = vadd.f32 %v3236_v57, %v955_v55  ;;  %v612_v35 = vmul.f32 %v3240_v23, %v611_v28 }
 0x580   :  { %v960_v10 = vsel %vm959_vm13, %v3236_v57, %v956_v8  ;;  %v3970_v16 = vpop.xlane.xlu0 %905  ;;  %v613_v49 = vadd.f32 %v3240_v23, %v612_v35 }
 0x581   :  { %v965_v12 = vsel %vm962_vm14, %v964_v9, %v960_v10  ;;  %3241 = vrcp.f32 %v3970_v16  ;;  %v993_v9 = vand.u32 2147483648, %v3970_v16  ;;  %vm987_vm12 = vweird.f32 %v3970_v16 }
 0x582   :  { %v966_v39 = vmul.f32 %v3920_v26, %v965_v12  ;;  %3243 = vrcp.f32 %v3955_v48  ;;  %v617_v38 = vsel %vm3985_vm3, %v3240_v23, %v613_v49  ;;  %vm629_vm14 = vweird.f32 %v3955_v48 }
 0x583   :  { %v622_v46 = vsel %vm619_vm5, %v621_v1, %v617_v38  ;;  %v994_v25 = vor.u32 1.1754944e-38, %v993_v9 }
 0x584   :  { %v623_v23 = vmul.f32 %v3902_v15, %v622_v46 }
 0x585   :  { %2979 = vmatmul.msk.f32.gmra.mxu0 %vm54_vm0, %v966_v39 }
 0x587   :  { %607 = vadd.xlane.f32.xlu2 %v606_v27  ;;  %v3974_v34 = vpop.eup %3241 }
 0x588   :  { %v3123_v21 = vpop.permute.xlu1 %3122  ;;  %v3976_v63 = vpop.eup %3243  ;;  %v983_v62 = vmul.f32 %v3974_v34, %v3970_v16  ;;  %vm988_vm8 = vweird.f32 %v3974_v34 }
 0x589   :  { %v3124_v54 = vunpack.i.l.bf16 %v3123_v21  ;;  %v3125_v26 = vunpack.i.h.bf16 %v3123_v21  ;;  %v625_v4 = vmul.f32 %v3976_v63, %v3955_v48  ;;  %vm630_vm9 = vweird.f32 %v3976_v63  ;;  %vm4010_vm13 = vmor %vm987_vm12, %vm988_vm8 }
 0x58a   :  { %v984_v37 = vsub.f32 1.0, %v983_v62  ;;  %v635_v21 = vand.u32 2147483648, %v3955_v48  ;;  %vm631_vm15 = vmor %vm629_vm14, %vm630_vm9 }
 0x58b   :  { %v626_v47 = vsub.f32 1.0, %v625_v4 }
 0x58c   :  { %v985_v50 = vmul.f32 %v3974_v34, %v984_v37  ;;  %v636_v35 = vor.u32 1.1754944e-38, %v635_v21 }
 0x58d   :  { %v627_v2 = vmul.f32 %v3976_v63, %v626_v47 }
 0x58e   :  { %v986_v8 = vadd.f32 %v3974_v34, %v985_v50 }
 0x58f   :  { %v628_v39 = vadd.f32 %v3976_v63, %v627_v2 }
 0x591   :  { %v632_v15 = vsel %vm631_vm15, %v3976_v63, %v628_v39 }
 0x593   :  { %v3118_v17 = vpop.permute.xlu0 %3117 }
 0x594   :  { %v3119_v19 = vunpack.i.l.bf16 %v3118_v17  ;;  %v3120_v22 = vunpack.i.h.bf16 %v3118_v17 }
 0x596   :  { %745 = vmatpush.msrb.mxu3 %v3119_v19  ;;  %v991_v19 = vand.u32 2147483647, %v3970_v16  ;;  %v633_v16 = vand.u32 2147483647, %v3955_v48 }
 0x598   :  { %746 = vmatpush.msrb.mxu3 %v3120_v22  ;;  %vm992_vm2 = vcmp.eq.f32.partialorder %v991_v19, 8.507059e+37  ;;  %vm634_vm3 = vcmp.eq.f32.partialorder %v633_v16, 8.507059e+37 }
 0x59a   :  { %747 = vmatpush.msrb.mxu3 %v3124_v54 }
 0x59c   :  { %748 = vmatpush.msrb.mxu3 %v3125_v26 }
 0x5b1   :  { %v903_v44 = vpop.xlane.xlu2 %902 }
 0x5b2   :  { %3245 = vrcp.f32 %v903_v44  ;;  %v978_v43 = vand.u32 2147483648, %v903_v44  ;;  %v976_v59 = vand.u32 2147483647, %v903_v44  ;;  %vm972_vm6 = vweird.f32 %v903_v44 }
 0x5b4   :  { %v979_v7 = vor.u32 1.1754944e-38, %v978_v43  ;;  %vm977_vm10 = vcmp.eq.f32.partialorder %v976_v59, 8.507059e+37 }
 0x5b8   :  { %v3246_v33 = vpop.eup %3245 }
 0x5b9   :  { %v968_v61 = vmul.f32 %v3246_v33, %v903_v44  ;;  %v3982_v40 = vpop.xlane.xlu2 %598  ;;  %vm973_vm4 = vweird.f32 %v3246_v33  ;;  %v4003_v27 = vpop.xlane.xlu1 %604 }
 0x5ba   :  { %3247 = vrcp.f32 %v3982_v40  ;;  %vm974_vm7 = vmor %vm972_vm6, %vm973_vm4  ;;  %v650_v37 = vand.u32 2147483648, %v3982_v40  ;;  %vm644_vm5 = vweird.f32 %v3982_v40  ;;  %v648_v63 = vand.u32 2147483647, %v3982_v40 }
 0x5bb   :  { %v969_v11 = vsub.f32 1.0, %v968_v61  ;;  %vm674_vm14 = vweird.f32 %v4003_v27 }
 0x5bc   :  { %v651_v41 = vor.u32 1.1754944e-38, %v650_v37 }
 0x5bd   :  { %v970_v57 = vmul.f32 %v3246_v33, %v969_v11 }
 0x5be   :  { %v3993_v3 = vpop.xlane.xlu0 %601 }
 0x5bf   :  { %3249 = vrcp.f32 %v3993_v3  ;;  %v971_v51 = vadd.f32 %v3246_v33, %v970_v57  ;;  %v665_v38 = vand.u32 2147483648, %v3993_v3  ;;  %vm659_vm9 = vweird.f32 %v3993_v3 }
 0x5c0   :  { %v3248_v36 = vpop.eup %3247  ;;  %3251 = vrcp.f32 %v4003_v27 }
 0x5c1   :  { %v640_v18 = vmul.f32 %v3248_v36, %v3982_v40  ;;  %v3128_v55 = vpop.permute.xlu2 %3127  ;;  %v975_v0 = vsel %vm974_vm7, %v3246_v33, %v971_v51  ;;  %vm645_vm4 = vweird.f32 %v3248_v36  ;;  %vm649_vm7 = vcmp.eq.f32.partialorder %v648_v63, 8.507059e+37 }
 0x5c2   :  { %v3129_v10 = vunpack.i.l.bf16 %v3128_v55  ;;  %v980_v12 = vsel %vm977_vm10, %v979_v7, %v975_v0  ;;  %v3130_v22 = vunpack.i.h.bf16 %v3128_v55  ;;  %vm646_vm6 = vmor %vm644_vm5, %vm645_vm4  ;;  %v663_v40 = vand.u32 2147483647, %v3993_v3 }
 0x5c3   :  { %v641_v14 = vsub.f32 1.0, %v640_v18  ;;  %v981_v17 = vmul.f32 %v3937_v6, %v980_v12  ;;  %v990_v6 = vsel %vm4010_vm13, %v3974_v34, %v986_v8  ;;  %v637_v34 = vsel %vm634_vm3, %v636_v35, %v632_v15 }
 0x5c4   :  { %749 = vmatpush.msrb.mxu3 %v3129_v10  ;;  %v995_v62 = vsel %vm992_vm2, %v994_v25, %v990_v6  ;;  %v638_v61 = vmul.f32 %v3912_v24, %v637_v34  ;;  %v666_v59 = vor.u32 1.1754944e-38, %v665_v38  ;;  %vm664_vm12 = vcmp.eq.f32.partialorder %v663_v40, 8.507059e+37  ;;  %v1099_v6 = vld [vmem:[%s4866_s6 + $0x8] sm:$0xff] }
 0x5c5   :  { %v3250_v26 = vpop.eup %3249  ;;  %2980 = vmatmul.msk.f32.gmra.mxu0 %vm54_vm0, %v981_v17  ;;  %v642_v28 = vmul.f32 %v3248_v36, %v641_v14  ;;  %v996_v4 = vmul.f32 %v3925_v29, %v995_v62  ;;  %v680_v51 = vand.u32 2147483648, %v4003_v27 }
 0x5c6   :  { %750 = vmatpush.msrb.mxu3 %v3130_v22  ;;  %v655_v44 = vmul.f32 %v3250_v26, %v3993_v3  ;;  %v3252_v49 = vpop.eup %3251  ;;  %vm660_vm8 = vweird.f32 %v3250_v26 }
 0x5c7   :  { %2958 = vmatmul.msk.f32.vlgmr.msrb.gmra.mxu3 %vm54_vm0, %v623_v23  ;;  %v643_v33 = vadd.f32 %v3248_v36, %v642_v28  ;;  %v670_v30 = vmul.f32 %v3252_v49, %v4003_v27  ;;  %vm661_vm10 = vmor %vm659_vm9, %vm660_vm8  ;;  %vm675_vm13 = vweird.f32 %v3252_v49  ;;  %v681_v7 = vor.u32 1.1754944e-38, %v680_v51  ;;  %v1100_v23 = vld [vmem:[%s4866_s6 + $0x10] sm:$0xff] }
 0x5c8   :  { %v656_v48 = vsub.f32 1.0, %v655_v44  ;;  %vm676_vm15 = vmor %vm674_vm14, %vm675_vm13 }
 0x5c9   :  { %v647_v29 = vsel %vm646_vm6, %v3248_v36, %v643_v33  ;;  %v671_v11 = vsub.f32 1.0, %v670_v30 }
 0x5ca   :  { %v657_v47 = vmul.f32 %v3250_v26, %v656_v48  ;;  %v652_v53 = vsel %vm649_vm7, %v651_v41, %v647_v29 }
 0x5cb   :  { %v653_v24 = vmul.f32 %v3941_v56, %v652_v53  ;;  %v672_v50 = vmul.f32 %v3252_v49, %v671_v11  ;;  %v678_v56 = vand.u32 2147483647, %v4003_v27  ;;  %v3166_v11 = vld [vmem:[%s4863_s3 + $0x7] ss:$0 sm:$0xff] }
 0x5cc   :  { %v658_v43 = vadd.f32 %v3250_v26, %v657_v47 }
 0x5cd   :  { %2981 = vmatmul.msk.f32.gmra.mxu0 %vm54_vm0, %v996_v4  ;;  %v673_v2 = vadd.f32 %v3252_v49, %v672_v50  ;;  %vm679_vm2 = vcmp.eq.f32.partialorder %v678_v56, 8.507059e+37 }
 0x5ce   :  { %v662_v57 = vsel %vm661_vm10, %v3250_v26, %v658_v43  ;;  %v1101_v26 = vld [vmem:[%s4866_s6 + $0x18] sm:$0xff] }
 0x5cf   :  { %2959 = vmatmul.msk.f32.gmra.mxu3 %vm54_vm0, %v638_v61  ;;  %v667_v1 = vsel %vm664_vm12, %v666_v59, %v662_v57  ;;  %v677_v3 = vsel %vm676_vm15, %v3252_v49, %v673_v2 }
 0x5d0   :  { %v668_v36 = vmul.f32 %v3949_v52, %v667_v1  ;;  %v682_v46 = vsel %vm679_vm2, %v681_v7, %v677_v3  ;;  %1132 = vmatpush.msra.mxu3 %v1101_v26 }
 0x5d1   :  { %v683_v18 = vmul.f32 %v3943_v58, %v682_v46 }
 0x5d2   :  { %1133 = vmatpush.msra.mxu3 %v1100_v23 }
 0x5d4   :  { %1134 = vmatpush.msra.mxu3 %v1099_v6 }
 0x5d7   :  { %2960 = vmatmul.msk.f32.gmra.mxu3 %vm54_vm0, %v653_v24 }
 0x5df   :  { %2961 = vmatmul.msk.f32.gmra.mxu3 %vm54_vm0, %v668_v36 }
 0x5e7   :  { %2962 = vmatmul.msk.f32.gmra.mxu3 %vm54_vm0, %v683_v18 }
 0x5e9   :  { %v1050_v55 = vpop.f32.mrf.mxu0 }
 0x5ea   :  { %1074 = vrot.lane.b32.xlu0 %v1050_v55, %s3427_s17 }
 0x5f1   :  { %v1053_v0 = vpop.f32.mrf.mxu0 }
 0x5f2   :  { %1076 = vrot.lane.b32.xlu1 %v1053_v0, %s3427_s17 }
 0x5fa   :  { %v608_v52 = vpop.xlane.xlu2 %607  ;;  %v1056_v8 = vpop.f32.mrf.mxu0 }
 0x5fb   :  { %3253 = vrcp.f32 %v608_v52  ;;  %1078 = vrot.lane.b32.xlu2 %v1056_v8, %s3427_s17  ;;  %v695_v58 = vand.u32 2147483648, %v608_v52  ;;  %v693_v27 = vand.u32 2147483647, %v608_v52  ;;  %vm689_vm4 = vweird.f32 %v608_v52 }
 0x5fd   :  { %v696_v19 = vor.u32 1.1754944e-38, %v695_v58  ;;  %vm694_vm6 = vcmp.eq.f32.partialorder %v693_v27, 8.507059e+37 }
 0x601   :  { %v3254_v9 = vpop.eup %3253 }
 0x602   :  { %v685_v10 = vmul.f32 %v3254_v9, %v608_v52  ;;  %v1059_v12 = vpop.f32.mrf.mxu0  ;;  %vm690_vm3 = vweird.f32 %v3254_v9 }
 0x603   :  { %1080 = vrot.lane.b32.xlu0 %v1059_v12, %s3427_s17  ;;  %vm691_vm5 = vmor %vm689_vm4, %vm690_vm3 }
 0x604   :  { %v686_v39 = vsub.f32 1.0, %v685_v10 }
 0x606   :  { %v687_v14 = vmul.f32 %v3254_v9, %v686_v39 }
 0x608   :  { %v688_v17 = vadd.f32 %v3254_v9, %v687_v14 }
 0x60a   :  { %v692_v21 = vsel %vm691_vm5, %v3254_v9, %v688_v17 }
 0x60b   :  { %v697_v22 = vsel %vm694_vm6, %v696_v19, %v692_v21 }
 0x60c   :  { %v698_v54 = vmul.f32 %v3965_v13, %v697_v22  ;;  %v1098_v13 = vld [vmem:[%s4866_s6] sm:$0xff] }
 0x60d   :  { %1135 = vmatpush.msra.mxu3 %v1098_v13 }
 0x60e   :  { %2963 = vmatmul.msk.f32.gmra.mxu3 %vm54_vm0, %v698_v54 }
 0x642   :  { %v1062_v16 = vpop.f32.mrf.mxu0 }
 0x643   :  { %1082 = vrot.lane.b32.xlu0 %v1062_v16, %s3427_s17 }
 0x64a   :  { %v1065_v25 = vpop.f32.mrf.mxu0  ;;  %v752_v28 = vpop.f32.mrf.mxu3 }
 0x64b   :  { %1084 = vrot.lane.b32.xlu1 %v1065_v25, %s3427_s17 }
 0x652   :  { %v755_v35 = vpop.f32.mrf.mxu3 }
 0x655   :  { %v1079_v4 = vpop.permute.xlu2 %1078 }
 0x65a   :  { %v758_v48 = vpop.f32.mrf.mxu3 }
 0x65b   :  { %v1094_v33 = vsel %vm495_vm11, %v758_v48, %v1079_v4 }
 0x65c   :  { %v1075_v44 = vpop.permute.xlu0 %1074 }
 0x65d   :  { %v1092_v15 = vsel %vm495_vm11, %v752_v28, %v1075_v44 }
 0x65e   :  { %2982 = vmatmul.msk.f32.vlgmr.msra.gmra.mxu3 %vm110_vm1, %v1092_v15 }
 0x662   :  { %v761_v49 = vpop.f32.mrf.mxu3 }
 0x664   :  { %v1077_v62 = vpop.permute.xlu1 %1076 }
 0x665   :  { %v1093_v34 = vsel %vm495_vm11, %v755_v35, %v1077_v62 }
 0x666   :  { %2983 = vmatmul.msk.f32.gmra.mxu3 %vm110_vm1, %v1093_v34 }
 0x66a   :  { %v764_v63 = vpop.f32.mrf.mxu3 }
 0x66e   :  { %2984 = vmatmul.msk.f32.gmra.mxu3 %vm110_vm1, %v1094_v33 }
 0x675   :  { %v1081_v37 = vpop.permute.xlu0 %1080 }
 0x676   :  { %v1095_v61 = vsel %vm495_vm11, %v761_v49, %v1081_v37  ;;  %v1320_v37 = vld [vmem:[%s4867_s7 + $0x18] sm:$0xff] }
 0x677   :  { %2985 = vmatmul.msk.f32.gmra.mxu3 %vm110_vm1, %v1095_v61  ;;  %1353 = vmatpush.msrb.mxu2 %v1320_v37  ;;  %v1319_v61 = vld [vmem:[%s4867_s7 + $0x10] sm:$0xff] }
 0x679   :  { %1354 = vmatpush.msrb.mxu2 %v1319_v61 }
 0x691   :  { %v767_v29 = vpop.f32.mrf.mxu3 }
 0x6b5   :  { %v1083_v30 = vpop.permute.xlu0 %1082 }
 0x6b6   :  { %v1096_v47 = vsel %vm495_vm11, %v764_v63, %v1083_v30  ;;  %v1318_v63 = vld [vmem:[%s4867_s7 + $0x8] sm:$0xff]  ;;  %v1317_v30 = vld [vmem:[%s4867_s7] sm:$0xff] }
 0x6b7   :  { %2986 = vmatmul.msk.f32.gmra.mxu3 %vm110_vm1, %v1096_v47  ;;  %1355 = vmatpush.msrb.mxu2 %v1318_v63 }
 0x6b9   :  { %1356 = vmatpush.msrb.mxu2 %v1317_v30 }
 0x6bd   :  { %v1085_v41 = vpop.permute.xlu1 %1084 }
 0x6be   :  { %v1097_v53 = vsel %vm495_vm11, %v767_v29, %v1085_v41 }
 0x6bf   :  { %2987 = vmatmul.msk.f32.gmra.mxu3 %vm110_vm1, %v1097_v53 }
 0x6e1   :  { %v1137_v43 = vpop.f32.mrf.mxu3 }
 0x6e2   :  { %v1155_v38 = vadd.f32 %v1137_v43, %v3640_v32 }
 0x6e4   :  { %v4083_v24 = vadd.f32 %v3166_v11, %v1155_v38 }
 0x6e6   :  { %v1171_v40 = vsel %vm110_vm1, %v4083_v24, 0.0 }
 0x6e7   :  { %1172 = vadd.xlane.f32.xlu0 %v1171_v40 }
 0x6e9   :  { %v1140_v50 = vpop.f32.mrf.mxu3 }
 0x6ea   :  { %v1156_v57 = vadd.f32 %v1140_v50, %v3626_v60 }
 0x6ec   :  { %v4088_v59 = vadd.f32 %v3166_v11, %v1156_v57 }
 0x6ee   :  { %v1174_v1 = vsel %vm110_vm1, %v4088_v59, 0.0 }
 0x6ef   :  { %1175 = vadd.xlane.f32.xlu1 %v1174_v1 }
 0x6f1   :  { %v1143_v2 = vpop.f32.mrf.mxu3 }
 0x6f2   :  { %v1157_v51 = vadd.f32 %v1143_v2, %v3637_v31 }
 0x6f4   :  { %v4093_v36 = vadd.f32 %v3166_v11, %v1157_v51 }
 0x6f6   :  { %v1177_v32 = vsel %vm110_vm1, %v4093_v36, 0.0 }
 0x6f7   :  { %1178 = vadd.xlane.f32.xlu2 %v1177_v32 }
 0x6fa   :  { %v1146_v56 = vpop.f32.mrf.mxu3 }
 0x6fb   :  { %v1158_v3 = vadd.f32 %v1146_v56, %v3607_v45 }
 0x6fd   :  { %v4098_v7 = vadd.f32 %v3166_v11, %v1158_v3 }
 0x6ff   :  { %v1180_v60 = vsel %vm110_vm1, %v4098_v7, 0.0 }
 0x700   :  { %1181 = vadd.xlane.f32.xlu0 %v1180_v60 }
 0x73a   :  { %v1149_v46 = vpop.f32.mrf.mxu3 }
 0x73b   :  { %v1159_v18 = vadd.f32 %v1149_v46, %v3614_v5  ;;  %v4172_v46 = vld [vmem:[%s4863_s3 + $0x8] ss:$0 sm:$0xff] }
 0x73d   :  { %v4103_v55 = vadd.f32 %v3166_v11, %v1159_v18 }
 0x73f   :  { %v1183_v31 = vsel %vm110_vm1, %v4103_v55, 0.0 }
 0x740   :  { %1184 = vadd.xlane.f32.xlu1 %v1183_v31 }
 0x742   :  { %v1152_v0 = vpop.f32.mrf.mxu3 }
 0x743   :  { %v1160_v52 = vadd.f32 %v1152_v0, %v3623_v20 }
 0x745   :  { %v4108_v8 = vadd.f32 %v3166_v11, %v1160_v52  ;;  %v4178_v52 = vld [vmem:[%s4863_s3 + $0x9] ss:$0 sm:$0xff] }
 0x747   :  { %v1186_v45 = vsel %vm110_vm1, %v4108_v8, 0.0 }
 0x748   :  { %1187 = vadd.xlane.f32.xlu2 %v1186_v45 }
 0x75a   :  { %v1173_v9 = vpop.xlane.xlu0 %1172 }
 0x75b   :  { %v1189_v10 = vmul.f32 %v1173_v9, %v3550_v42 }
 0x75d   :  { %v4114_v5 = vsub.f32 %v4083_v24, %v1189_v10 }
 0x75f   :  { %v1201_v12 = vmul.f32 %v4114_v5, %v4114_v5 }
 0x761   :  { %v1207_v39 = vsel %vm110_vm1, %v1201_v12, 0.0 }
 0x762   :  { %1208 = vadd.xlane.f32.xlu0 %v1207_v39  ;;  %v1176_v58 = vpop.xlane.xlu1 %1175 }
 0x763   :  { %v1190_v20 = vmul.f32 %v1176_v58, %v3550_v42 }
 0x765   :  { %v4121_v14 = vsub.f32 %v4088_v59, %v1190_v20 }
 0x767   :  { %v1202_v27 = vmul.f32 %v4121_v14, %v4121_v14 }
 0x769   :  { %v1210_v17 = vsel %vm110_vm1, %v1202_v27, 0.0 }
 0x76a   :  { %v1179_v19 = vpop.xlane.xlu2 %1178  ;;  %1211 = vadd.xlane.f32.xlu1 %v1210_v17 }
 0x76b   :  { %v1191_v21 = vmul.f32 %v1179_v19, %v3550_v42 }
 0x76d   :  { %v4128_v22 = vsub.f32 %v4093_v36, %v1191_v21 }
 0x76f   :  { %v1203_v54 = vmul.f32 %v4128_v22, %v4128_v22 }
 0x771   :  { %v1213_v26 = vsel %vm110_vm1, %v1203_v54, 0.0 }
 0x772   :  { %1214 = vadd.xlane.f32.xlu2 %v1213_v26 }
 0x773   :  { %v1182_v23 = vpop.xlane.xlu0 %1181 }
 0x774   :  { %v1192_v6 = vmul.f32 %v1182_v23, %v3550_v42 }
 0x776   :  { %v4135_v13 = vsub.f32 %v4098_v7, %v1192_v6 }
 0x778   :  { %v1204_v16 = vmul.f32 %v4135_v13, %v4135_v13 }
 0x77a   :  { %v1216_v25 = vsel %vm110_vm1, %v1204_v16, 0.0 }
 0x77b   :  { %1217 = vadd.xlane.f32.xlu0 %v1216_v25 }
 0x7b3   :  { %v1185_v28 = vpop.xlane.xlu1 %1184 }
 0x7b4   :  { %v1193_v44 = vmul.f32 %v1185_v28, %v3550_v42 }
 0x7b6   :  { %v4142_v15 = vsub.f32 %v4103_v55, %v1193_v44 }
 0x7b8   :  { %v1205_v35 = vmul.f32 %v4142_v15, %v4142_v15 }
 0x7ba   :  { %v1219_v62 = vsel %vm110_vm1, %v1205_v35, 0.0 }
 0x7bb   :  { %v1188_v34 = vpop.xlane.xlu2 %1187  ;;  %1220 = vadd.xlane.f32.xlu1 %v1219_v62 }
 0x7bc   :  { %v1194_v48 = vmul.f32 %v1188_v34, %v3550_v42 }
 0x7be   :  { %v4149_v4 = vsub.f32 %v4108_v8, %v1194_v48 }
 0x7c0   :  { %v1206_v33 = vmul.f32 %v4149_v4, %v4149_v4 }
 0x7c2   :  { %v1222_v49 = vsel %vm110_vm1, %v1206_v33, 0.0 }
 0x7c3   :  { %1223 = vadd.xlane.f32.xlu2 %v1222_v49 }
 0x7d5   :  { %v1209_v47 = vpop.xlane.xlu0 %1208 }
 0x7d6   :  { %v1225_v29 = vmul.f32 %v1209_v47, %v3550_v42 }
 0x7d8   :  { %v1231_v41 = vadd.f32 1e-05, %v1225_v29 }
 0x7da   :  { %3255 = vrsqrt.f32 %v1231_v41  ;;  %vm1243_vm8 = vweird.f32 %v1231_v41 }
 0x7dd   :  { %v1212_v53 = vpop.xlane.xlu1 %1211 }
 0x7de   :  { %v1226_v11 = vmul.f32 %v1212_v53, %v3550_v42 }
 0x7e0   :  { %v3256_v43 = vpop.eup %3255  ;;  %v1232_v38 = vadd.f32 1e-05, %v1226_v11 }
 0x7e1   :  { %v1238_v40 = vmul.f32 %v3256_v43, %v1231_v41  ;;  %vm1244_vm7 = vweird.f32 %v3256_v43 }
 0x7e2   :  { %3257 = vrsqrt.f32 %v1232_v38  ;;  %vm1245_vm9 = vmor %vm1243_vm8, %vm1244_vm7  ;;  %vm1253_vm12 = vweird.f32 %v1232_v38 }
 0x7e3   :  { %v1239_v50 = vmul.f32 %v3256_v43, %v1238_v40 }
 0x7e5   :  { %v1240_v57 = vmul.f32 0.5, %v1239_v50  ;;  %v1215_v1 = vpop.xlane.xlu2 %1214 }
 0x7e6   :  { %v1227_v2 = vmul.f32 %v1215_v1, %v3550_v42 }
 0x7e7   :  { %v1241_v51 = vsub.f32 1.5, %v1240_v57 }
 0x7e8   :  { %v3258_v32 = vpop.eup %3257  ;;  %v1233_v56 = vadd.f32 1e-05, %v1227_v2 }
 0x7e9   :  { %v1242_v3 = vmul.f32 %v3256_v43, %v1241_v51  ;;  %v1248_v60 = vmul.f32 %v3258_v32, %v1232_v38  ;;  %vm1254_vm10 = vweird.f32 %v3258_v32 }
 0x7ea   :  { %3259 = vrsqrt.f32 %v1233_v56  ;;  %vm1255_vm13 = vmor %vm1253_vm12, %vm1254_vm10  ;;  %vm1263_vm15 = vweird.f32 %v1233_v56 }
 0x7eb   :  { %v1246_v18 = vsel %vm1245_vm9, %v3256_v43, %v1242_v3  ;;  %v1249_v31 = vmul.f32 %v3258_v32, %v1248_v60 }
 0x7ec   :  { %v1297_v0 = vmul.f32 %v1246_v18, %v4114_v5 }
 0x7ed   :  { %v1250_v45 = vmul.f32 0.5, %v1249_v31 }
 0x7ee   :  { %v1218_v9 = vpop.xlane.xlu0 %1217  ;;  %v1304_v12 = vmul.f32 %v4172_v46, %v1297_v0 }
 0x7ef   :  { %v1228_v10 = vmul.f32 %v1218_v9, %v3550_v42  ;;  %v1251_v39 = vsub.f32 1.5, %v1250_v45 }
 0x7f0   :  { %v3260_v58 = vpop.eup %3259  ;;  %v1311_v27 = vadd.f32 %v4178_v52, %v1304_v12 }
 0x7f1   :  { %v1234_v20 = vadd.f32 1e-05, %v1228_v10  ;;  %v1252_v17 = vmul.f32 %v3258_v32, %v1251_v39  ;;  %v1258_v5 = vmul.f32 %v3260_v58, %v1233_v56  ;;  %vm1264_vm14 = vweird.f32 %v3260_v58 }
 0x7f2   :  { %2988 = vmatmul.msk.f32.vlgmr.msrb.gmra.mxu2 %vm110_vm1, %v1311_v27  ;;  %vm1265_vm2 = vmor %vm1263_vm15, %vm1264_vm14  ;;  %v1511_v27 = vld [vmem:[%s4868_s8 + $0x48] sm:$0xff] }
 0x7f3   :  { %3261 = vrsqrt.f32 %v1234_v20  ;;  %v1256_v19 = vsel %vm1255_vm13, %v3258_v32, %v1252_v17  ;;  %v1259_v21 = vmul.f32 %v3260_v58, %v1258_v5  ;;  %vm1273_vm4 = vweird.f32 %v1234_v20  ;;  %v1510_v17 = vld [vmem:[%s4868_s8 + $0x40] sm:$0xff]  ;;  %v1509_v5 = vld [vmem:[%s4868_s8 + $0x38] sm:$0xff] }
 0x7f4   :  { %v1298_v54 = vmul.f32 %v1256_v19, %v4121_v14  ;;  %v1508_v19 = vld [vmem:[%s4868_s8 + $0x30] sm:$0xff] }
 0x7f5   :  { %v1260_v26 = vmul.f32 0.5, %v1259_v21  ;;  %v1507_v21 = vld [vmem:[%s4868_s8 + $0x28] sm:$0xff] }
 0x7f6   :  { %v1305_v23 = vmul.f32 %v4172_v46, %v1298_v54  ;;  %v1506_v54 = vld [vmem:[%s4868_s8 + $0x20] sm:$0xff] }
 0x7f7   :  { %v1261_v6 = vsub.f32 1.5, %v1260_v26  ;;  %v4245_v26 = vld [vmem:[%s4863_s3 + $0xa] ss:$0 sm:$0xff] }
 0x7f8   :  { %v1312_v25 = vadd.f32 %v4178_v52, %v1305_v23  ;;  %v1505_v23 = vld [vmem:[%s4868_s8 + $0x18] sm:$0xff] }
 0x7f9   :  { %v3262_v16 = vpop.eup %3261  ;;  %v1262_v28 = vmul.f32 %v3260_v58, %v1261_v6  ;;  %v1504_v6 = vld [vmem:[%s4868_s8 + $0x10] sm:$0xff] }
 0x7fa   :  { %v1268_v44 = vmul.f32 %v3262_v16, %v1234_v20  ;;  %2989 = vmatmul.msk.f32.gmra.mxu2 %vm110_vm1, %v1312_v25  ;;  %vm1274_vm3 = vweird.f32 %v3262_v16  ;;  %v1512_v20 = vld [vmem:[%s4868_s8 + $0x50] sm:$0xff] }
 0x7fb   :  { %v1266_v35 = vsel %vm1265_vm2, %v3260_v58, %v1262_v28  ;;  %vm1275_vm5 = vmor %vm1273_vm4, %vm1274_vm3  ;;  %v1516_v58 = vld [vmem:[%s4868_s8 + $0x70] sm:$0xff]  ;;  %v1503_v28 = vld [vmem:[%s4868_s8 + $0x8] sm:$0xff] }
 0x7fc   :  { %v1269_v62 = vmul.f32 %v3262_v16, %v1268_v44  ;;  %v1299_v34 = vmul.f32 %v1266_v35, %v4128_v22  ;;  %v1502_v35 = vld [vmem:[%s4868_s8] sm:$0xff] }
 0x7fe   :  { %v1270_v48 = vmul.f32 0.5, %v1269_v62  ;;  %v1306_v14 = vmul.f32 %v4172_v46, %v1299_v34 }
 0x800   :  { %v1271_v33 = vsub.f32 1.5, %v1270_v48  ;;  %v1313_v49 = vadd.f32 %v4178_v52, %v1306_v14 }
 0x802   :  { %v1272_v37 = vmul.f32 %v3262_v16, %v1271_v33  ;;  %2990 = vmatmul.msk.f32.gmra.mxu2 %vm110_vm1, %v1313_v49 }
 0x804   :  { %v1276_v61 = vsel %vm1275_vm5, %v3262_v16, %v1272_v37 }
 0x805   :  { %v1300_v63 = vmul.f32 %v1276_v61, %v4135_v13 }
 0x807   :  { %v1307_v30 = vmul.f32 %v4172_v46, %v1300_v63 }
 0x809   :  { %v1314_v47 = vadd.f32 %v4178_v52, %v1307_v30 }
 0x80b   :  { %2991 = vmatmul.msk.f32.gmra.mxu2 %vm110_vm1, %v1314_v47 }
 0x82e   :  { %v1221_v22 = vpop.xlane.xlu1 %1220 }
 0x82f   :  { %v1229_v29 = vmul.f32 %v1221_v22, %v3550_v42 }
 0x831   :  { %v1235_v41 = vadd.f32 1e-05, %v1229_v29 }
 0x833   :  { %3263 = vrsqrt.f32 %v1235_v41  ;;  %vm1283_vm7 = vweird.f32 %v1235_v41 }
 0x836   :  { %v1224_v53 = vpop.xlane.xlu2 %1223 }
 0x837   :  { %v1230_v11 = vmul.f32 %v1224_v53, %v3550_v42 }
 0x839   :  { %v3264_v43 = vpop.eup %3263  ;;  %v1236_v38 = vadd.f32 1e-05, %v1230_v11 }
 0x83a   :  { %v1278_v40 = vmul.f32 %v3264_v43, %v1235_v41  ;;  %vm1284_vm6 = vweird.f32 %v3264_v43 }
 0x83b   :  { %3265 = vrsqrt.f32 %v1236_v38  ;;  %vm1285_vm8 = vmor %vm1283_vm7, %vm1284_vm6  ;;  %vm1293_vm10 = vweird.f32 %v1236_v38 }
 0x83c   :  { %v1279_v50 = vmul.f32 %v3264_v43, %v1278_v40 }
 0x83e   :  { %v1280_v13 = vmul.f32 0.5, %v1279_v50 }
 0x840   :  { %v1281_v57 = vsub.f32 1.5, %v1280_v13 }
 0x841   :  { %v3266_v1 = vpop.eup %3265 }
 0x842   :  { %v1282_v2 = vmul.f32 %v3264_v43, %v1281_v57  ;;  %v1288_v51 = vmul.f32 %v3266_v1, %v1236_v38  ;;  %vm1294_vm9 = vweird.f32 %v3266_v1 }
 0x843   :  { %vm1295_vm12 = vmor %vm1293_vm10, %vm1294_vm9 }
 0x844   :  { %v1286_v32 = vsel %vm1285_vm8, %v3264_v43, %v1282_v2  ;;  %v1289_v56 = vmul.f32 %v3266_v1, %v1288_v51 }
 0x845   :  { %v1301_v3 = vmul.f32 %v1286_v32, %v4142_v15  ;;  %v1517_v15 = vld [vmem:[%s4868_s8 + $0x78] sm:$0xff] }
 0x846   :  { %v1290_v60 = vmul.f32 0.5, %v1289_v56  ;;  %1518 = vmatpush.msra.mxu1 %v1517_v15 }
 0x847   :  { %v1308_v18 = vmul.f32 %v4172_v46, %v1301_v3 }
 0x848   :  { %v1291_v31 = vsub.f32 1.5, %v1290_v60  ;;  %1519 = vmatpush.msra.mxu1 %v1516_v58 }
 0x849   :  { %v1315_v0 = vadd.f32 %v4178_v52, %v1308_v18 }
 0x84a   :  { %v1292_v45 = vmul.f32 %v3266_v1, %v1291_v31 }
 0x84b   :  { %2992 = vmatmul.msk.f32.gmra.mxu2 %vm110_vm1, %v1315_v0 }
 0x84c   :  { %v1296_v9 = vsel %vm1295_vm12, %v3266_v1, %v1292_v45 }
 0x84d   :  { %v1302_v10 = vmul.f32 %v1296_v9, %v4149_v4  ;;  %v1515_v4 = vld [vmem:[%s4868_s8 + $0x68] sm:$0xff] }
 0x84e   :  { %1520 = vmatpush.msra.mxu1 %v1515_v4 }
 0x84f   :  { %v1309_v12 = vmul.f32 %v4172_v46, %v1302_v10  ;;  %v1514_v46 = vld [vmem:[%s4868_s8 + $0x60] sm:$0xff] }
 0x850   :  { %1521 = vmatpush.msra.mxu1 %v1514_v46 }
 0x851   :  { %v1316_v39 = vadd.f32 %v4178_v52, %v1309_v12  ;;  %v1513_v52 = vld [vmem:[%s4868_s8 + $0x58] sm:$0xff] }
 0x852   :  { %1522 = vmatpush.msra.mxu1 %v1513_v52 }
 0x853   :  { %2993 = vmatmul.msk.f32.gmra.mxu2 %vm110_vm1, %v1316_v39 }
 0x854   :  { %1523 = vmatpush.msra.mxu1 %v1512_v20 }
 0x856   :  { %1524 = vmatpush.msra.mxu1 %v1511_v27 }
 0x858   :  { %1525 = vmatpush.msra.mxu1 %v1510_v17 }
 0x85a   :  { %1526 = vmatpush.msra.mxu1 %v1509_v5 }
 0x85c   :  { %1527 = vmatpush.msra.mxu1 %v1508_v19 }
 0x85e   :  { %1528 = vmatpush.msra.mxu1 %v1507_v21 }
 0x860   :  { %1529 = vmatpush.msra.mxu1 %v1506_v54 }
 0x862   :  { %1530 = vmatpush.msra.mxu1 %v1505_v23 }
 0x864   :  { %1531 = vmatpush.msra.mxu1 %v1504_v6 }
 0x866   :  { %1532 = vmatpush.msra.mxu1 %v1503_v28 }
 0x868   :  { %1533 = vmatpush.msra.mxu1 %v1502_v35 }
 0x875   :  { %v1358_v16 = vpop.f32.mrf.mxu2 }
 0x876   :  { %v1359_v25 = vadd.f32 %v4245_v26, %v1358_v16 }
 0x878   :  { %v2994_v44 = vmul.f32 -1.702, %v1359_v25 }
 0x87a   :  { %v1388_v62 = vmul.f32 1.442695, %v2994_v44 }
 0x87c   :  { %3267 = vpow2.f32 %v1388_v62 }
 0x87d   :  { %v1361_v34 = vpop.f32.mrf.mxu2 }
 0x87e   :  { %v1362_v48 = vadd.f32 %v4245_v26, %v1361_v34 }
 0x880   :  { %v2995_v14 = vmul.f32 -1.702, %v1362_v48 }
 0x882   :  { %v3268_v33 = vpop.eup %3267  ;;  %v1390_v49 = vmul.f32 1.442695, %v2995_v14 }
 0x883   :  { %v1400_v37 = vadd.f32 1.0, %v3268_v33 }
 0x884   :  { %3269 = vpow2.f32 %v1390_v49 }
 0x885   :  { %3271 = vrcp.f32 %v1400_v37  ;;  %v1364_v61 = vpop.f32.mrf.mxu2  ;;  %v1417_v40 = vand.u32 2147483648, %v1400_v37  ;;  %v1415_v13 = vand.u32 2147483647, %v1400_v37  ;;  %vm1411_vm14 = vweird.f32 %v1400_v37 }
 0x886   :  { %v4262_v63 = vadd.f32 %v4245_v26, %v1364_v61 }
 0x887   :  { %v1418_v56 = vor.u32 1.1754944e-38, %v1417_v40  ;;  %vm1416_vm2 = vcmp.eq.f32.partialorder %v1415_v13, 8.507059e+37 }
 0x888   :  { %v2996_v30 = vmul.f32 -1.702, %v4262_v63 }
 0x88a   :  { %v3270_v47 = vpop.eup %3269  ;;  %v1392_v22 = vmul.f32 1.442695, %v2996_v30 }
 0x88b   :  { %v3272_v29 = vpop.eup %3271  ;;  %v1401_v41 = vadd.f32 1.0, %v3270_v47 }
 0x88c   :  { %v1407_v53 = vmul.f32 %v3272_v29, %v1400_v37  ;;  %3273 = vpow2.f32 %v1392_v22  ;;  %vm1412_vm13 = vweird.f32 %v3272_v29 }
 0x88d   :  { %3275 = vrcp.f32 %v1401_v41  ;;  %vm1413_vm15 = vmor %vm1411_vm14, %vm1412_vm13  ;;  %v1432_v9 = vand.u32 2147483648, %v1401_v41  ;;  %v1430_v12 = vand.u32 2147483647, %v1401_v41  ;;  %vm1426_vm4 = vweird.f32 %v1401_v41 }
 0x88e   :  { %v1367_v11 = vpop.f32.mrf.mxu2  ;;  %v1408_v43 = vsub.f32 1.0, %v1407_v53 }
 0x88f   :  { %v4266_v38 = vadd.f32 %v4245_v26, %v1367_v11  ;;  %v1433_v46 = vor.u32 1.1754944e-38, %v1432_v9  ;;  %vm1431_vm6 = vcmp.eq.f32.partialorder %v1430_v12, 8.507059e+37 }
 0x890   :  { %v1409_v50 = vmul.f32 %v3272_v29, %v1408_v43 }
 0x891   :  { %v2997_v57 = vmul.f32 -1.702, %v4266_v38 }
 0x892   :  { %v3274_v1 = vpop.eup %3273  ;;  %v1410_v2 = vadd.f32 %v3272_v29, %v1409_v50 }
 0x893   :  { %v1394_v51 = vmul.f32 1.442695, %v2997_v57  ;;  %v3276_v32 = vpop.eup %3275  ;;  %v1402_v3 = vadd.f32 1.0, %v3274_v1 }
 0x894   :  { %v1414_v60 = vsel %vm1413_vm15, %v3272_v29, %v1410_v2  ;;  %v1422_v18 = vmul.f32 %v3276_v32, %v1401_v41  ;;  %vm1427_vm3 = vweird.f32 %v3276_v32 }
 0x895   :  { %3277 = vpow2.f32 %v1394_v51  ;;  %v1419_v31 = vsel %vm1416_vm2, %v1418_v56, %v1414_v60  ;;  %vm1428_vm5 = vmor %vm1426_vm4, %vm1427_vm3  ;;  %v1447_v19 = vand.u32 2147483648, %v1402_v3  ;;  %v1445_v54 = vand.u32 2147483647, %v1402_v3 }
 0x896   :  { %3279 = vrcp.f32 %v1402_v3  ;;  %v1496_v0 = vmul.f32 %v1419_v31, %v1359_v25  ;;  %v1423_v45 = vsub.f32 1.0, %v1422_v18  ;;  %vm1441_vm8 = vweird.f32 %v1402_v3 }
 0x897   :  { %v1448_v16 = vor.u32 1.1754944e-38, %v1447_v19  ;;  %vm1446_vm10 = vcmp.eq.f32.partialorder %v1445_v54, 8.507059e+37 }
 0x898   :  { %1534 = vmatmul.f32.vlgmr.msra.gmra.mxu1 %v1496_v0  ;;  %v1424_v10 = vmul.f32 %v3276_v32, %v1423_v45 }
 0x89a   :  { %v1425_v15 = vadd.f32 %v3276_v32, %v1424_v10 }
 0x89b   :  { %v3278_v39 = vpop.eup %3277 }
 0x89c   :  { %v3280_v58 = vpop.eup %3279  ;;  %v1403_v4 = vadd.f32 1.0, %v3278_v39  ;;  %v1429_v52 = vsel %vm1428_vm5, %v3276_v32, %v1425_v15 }
 0x89d   :  { %v1437_v20 = vmul.f32 %v3280_v58, %v1402_v3  ;;  %v1434_v27 = vsel %vm1431_vm6, %v1433_v46, %v1429_v52  ;;  %vm1442_vm7 = vweird.f32 %v3280_v58 }
 0x89e   :  { %3281 = vrcp.f32 %v1403_v4  ;;  %v1497_v17 = vmul.f32 %v1434_v27, %v1362_v48  ;;  %vm1443_vm9 = vmor %vm1441_vm8, %vm1442_vm7  ;;  %v1462_v34 = vand.u32 2147483648, %v1403_v4  ;;  %v1460_v14 = vand.u32 2147483647, %v1403_v4 }
 0x89f   :  { %v1438_v5 = vsub.f32 1.0, %v1437_v20  ;;  %vm1456_vm13 = vweird.f32 %v1403_v4  ;;  %v3170_v20 = vld [vmem:[%s4863_s3 + $0xb] ss:$0 sm:$0xff] }
 0x8a0   :  { %1537 = vmatmul.f32.gmra.mxu1 %v1497_v17  ;;  %v1463_v49 = vor.u32 1.1754944e-38, %v1462_v34  ;;  %vm1461_vm15 = vcmp.eq.f32.partialorder %v1460_v14, 8.507059e+37 }
 0x8a1   :  { %v1439_v21 = vmul.f32 %v3280_v58, %v1438_v5 }
 0x8a3   :  { %v1440_v23 = vadd.f32 %v3280_v58, %v1439_v21 }
 0x8a4   :  { %v3282_v6 = vpop.eup %3281 }
 0x8a5   :  { %v1444_v25 = vsel %vm1443_vm9, %v3280_v58, %v1440_v23  ;;  %v1452_v28 = vmul.f32 %v3282_v6, %v1403_v4  ;;  %vm1457_vm12 = vweird.f32 %v3282_v6 }
 0x8a6   :  { %v1449_v44 = vsel %vm1446_vm10, %v1448_v16, %v1444_v25  ;;  %vm1458_vm14 = vmor %vm1456_vm13, %vm1457_vm12 }
 0x8a7   :  { %v1498_v35 = vmul.f32 %v1449_v44, %v4262_v63  ;;  %v1453_v62 = vsub.f32 1.0, %v1452_v28 }
 0x8a9   :  { %1540 = vmatmul.f32.gmra.mxu1 %v1498_v35  ;;  %v1454_v48 = vmul.f32 %v3282_v6, %v1453_v62 }
 0x8ab   :  { %v1455_v33 = vadd.f32 %v3282_v6, %v1454_v48 }
 0x8ad   :  { %v1459_v37 = vsel %vm1458_vm14, %v3282_v6, %v1455_v33 }
 0x8ae   :  { %v1464_v61 = vsel %vm1461_vm15, %v1463_v49, %v1459_v37 }
 0x8af   :  { %v1499_v30 = vmul.f32 %v1464_v61, %v4266_v38 }
 0x8b1   :  { %1543 = vmatmul.f32.gmra.mxu1 %v1499_v30 }
 0x8ce   :  { %v1370_v47 = vpop.f32.mrf.mxu2 }
 0x8cf   :  { %v1371_v22 = vadd.f32 %v4245_v26, %v1370_v47 }
 0x8d1   :  { %v2998_v63 = vmul.f32 -1.702, %v1371_v22 }
 0x8d3   :  { %v1396_v29 = vmul.f32 1.442695, %v2998_v63 }
 0x8d5   :  { %3283 = vpow2.f32 %v1396_v29 }
 0x8d6   :  { %v1373_v41 = vpop.f32.mrf.mxu2 }
 0x8d7   :  { %v1374_v53 = vadd.f32 %v4245_v26, %v1373_v41 }
 0x8d9   :  { %v2999_v11 = vmul.f32 -1.702, %v1374_v53 }
 0x8db   :  { %v3284_v43 = vpop.eup %3283  ;;  %v1398_v40 = vmul.f32 1.442695, %v2999_v11 }
 0x8dc   :  { %v1404_v50 = vadd.f32 1.0, %v3284_v43 }
 0x8dd   :  { %3285 = vpow2.f32 %v1398_v40 }
 0x8de   :  { %3287 = vrcp.f32 %v1404_v50  ;;  %v1477_v51 = vand.u32 2147483648, %v1404_v50  ;;  %v1475_v56 = vand.u32 2147483647, %v1404_v50  ;;  %vm1471_vm3 = vweird.f32 %v1404_v50 }
 0x8e0   :  { %v1478_v26 = vor.u32 1.1754944e-38, %v1477_v51  ;;  %vm1476_vm5 = vcmp.eq.f32.partialorder %v1475_v56, 8.507059e+37 }
 0x8e3   :  { %v3286_v13 = vpop.eup %3285 }
 0x8e4   :  { %v3288_v57 = vpop.eup %3287  ;;  %v1405_v1 = vadd.f32 1.0, %v3286_v13 }
 0x8e5   :  { %v1467_v38 = vmul.f32 %v3288_v57, %v1404_v50  ;;  %vm1472_vm2 = vweird.f32 %v3288_v57 }
 0x8e6   :  { %3289 = vrcp.f32 %v1405_v1  ;;  %vm1473_vm4 = vmor %vm1471_vm3, %vm1472_vm2  ;;  %v1492_v10 = vand.u32 2147483648, %v1405_v1  ;;  %v1490_v39 = vand.u32 2147483647, %v1405_v1  ;;  %vm1486_vm7 = vweird.f32 %v1405_v1 }
 0x8e7   :  { %v1468_v2 = vsub.f32 1.0, %v1467_v38 }
 0x8e8   :  { %v1493_v58 = vor.u32 1.1754944e-38, %v1492_v10  ;;  %vm1491_vm9 = vcmp.eq.f32.partialorder %v1490_v39, 8.507059e+37  ;;  %v3003_v10 = vld [vmem:[%s4865_s5 + $0x38] sm:$0xff]  ;;  %v3001_v39 = vld [vmem:[%s4865_s5 + $0x28] sm:$0xff] }
 0x8e9   :  { %v1469_v32 = vmul.f32 %v3288_v57, %v1468_v2  ;;  %1752 = vmatpush.msra.mxu0 %v3003_v10 }
 0x8eb   :  { %v1470_v3 = vadd.f32 %v3288_v57, %v1469_v32 }
 0x8ec   :  { %v3290_v60 = vpop.eup %3289 }
 0x8ed   :  { %v1474_v18 = vsel %vm1473_vm4, %v3288_v57, %v1470_v3  ;;  %v1482_v31 = vmul.f32 %v3290_v60, %v1405_v1  ;;  %vm1487_vm6 = vweird.f32 %v3290_v60 }
 0x8ee   :  { %v1479_v0 = vsel %vm1476_vm5, %v1478_v26, %v1474_v18  ;;  %vm1488_vm8 = vmor %vm1486_vm7, %vm1487_vm6 }
 0x8ef   :  { %v1500_v45 = vmul.f32 %v1479_v0, %v1371_v22  ;;  %v1483_v9 = vsub.f32 1.0, %v1482_v31 }
 0x8f1   :  { %1546 = vmatmul.f32.gmra.mxu1 %v1500_v45  ;;  %v1484_v12 = vmul.f32 %v3290_v60, %v1483_v9 }
 0x8f3   :  { %v1485_v15 = vadd.f32 %v3290_v60, %v1484_v12  ;;  %v3002_v12 = vld [vmem:[%s4865_s5 + $0x30] sm:$0xff] }
 0x8f4   :  { %1753 = vmatpush.msra.mxu0 %v3002_v12 }
 0x8f5   :  { %v1489_v4 = vsel %vm1488_vm8, %v3290_v60, %v1485_v15  ;;  %v3000_v15 = vld [vmem:[%s4865_s5 + $0x20] sm:$0xff] }
 0x8f6   :  { %v1494_v46 = vsel %vm1491_vm9, %v1493_v58, %v1489_v4  ;;  %1754 = vmatpush.msra.mxu0 %v3001_v39 }
 0x8f7   :  { %v1501_v52 = vmul.f32 %v1494_v46, %v1374_v53 }
 0x8f8   :  { %1755 = vmatpush.msra.mxu0 %v3000_v15 }
 0x8f9   :  { %1549 = vmatmul.f32.gmra.mxu1 %v1501_v52 }
 0x915   :  { %v1535_v27 = vpop.f32.mrf.mxu1 }
 0x916   :  { %v1553_v17 = vadd.f32 %v1535_v27, %v4083_v24 }
 0x918   :  { %v4277_v5 = vadd.f32 %v3170_v20, %v1553_v17 }
 0x91a   :  { %v1569_v19 = vsel %vm110_vm1, %v4277_v5, 0.0 }
 0x91b   :  { %1570 = vadd.xlane.f32.xlu0 %v1569_v19 }
 0x91d   :  { %v1538_v21 = vpop.f32.mrf.mxu1 }
 0x91e   :  { %v1554_v54 = vadd.f32 %v1538_v21, %v4088_v59 }
 0x920   :  { %v4282_v23 = vadd.f32 %v3170_v20, %v1554_v54 }
 0x922   :  { %v1572_v6 = vsel %vm110_vm1, %v4282_v23, 0.0 }
 0x923   :  { %1573 = vadd.xlane.f32.xlu1 %v1572_v6 }
 0x926   :  { %v1541_v16 = vpop.f32.mrf.mxu1 }
 0x927   :  { %v1555_v25 = vadd.f32 %v1541_v16, %v4093_v36 }
 0x929   :  { %v4287_v28 = vadd.f32 %v3170_v20, %v1555_v25 }
 0x92b   :  { %v1575_v24 = vsel %vm110_vm1, %v4287_v28, 0.0 }
 0x92c   :  { %1576 = vadd.xlane.f32.xlu2 %v1575_v24 }
 0x92e   :  { %v1544_v44 = vpop.f32.mrf.mxu1 }
 0x92f   :  { %v1556_v35 = vadd.f32 %v1544_v44, %v4098_v7 }
 0x931   :  { %v4292_v62 = vadd.f32 %v3170_v20, %v1556_v35 }
 0x933   :  { %v1578_v59 = vsel %vm110_vm1, %v4292_v62, 0.0 }
 0x934   :  { %1579 = vadd.xlane.f32.xlu0 %v1578_v59 }
 0x96e   :  { %v1547_v34 = vpop.f32.mrf.mxu1 }
 0x96f   :  { %v1557_v48 = vadd.f32 %v1547_v34, %v4103_v55  ;;  %v4366_v34 = vld [vmem:[%s4863_s3 + $0xc] ss:$0 sm:$0xff] }
 0x971   :  { %v4297_v14 = vadd.f32 %v3170_v20, %v1557_v48 }
 0x973   :  { %v1581_v36 = vsel %vm110_vm1, %v4297_v14, 0.0 }
 0x974   :  { %1582 = vadd.xlane.f32.xlu1 %v1581_v36 }
 0x976   :  { %v1550_v33 = vpop.f32.mrf.mxu1 }
 0x977   :  { %v1558_v49 = vadd.f32 %v1550_v33, %v4108_v8 }
 0x979   :  { %v4302_v37 = vadd.f32 %v3170_v20, %v1558_v49  ;;  %v4372_v49 = vld [vmem:[%s4863_s3 + $0xd] ss:$0 sm:$0xff] }
 0x97b   :  { %v1584_v7 = vsel %vm110_vm1, %v4302_v37, 0.0 }
 0x97c   :  { %1585 = vadd.xlane.f32.xlu2 %v1584_v7 }
 0x98e   :  { %v1571_v61 = vpop.xlane.xlu0 %1570 }
 0x98f   :  { %v1587_v30 = vmul.f32 %v1571_v61, %v3550_v42 }
 0x991   :  { %v4308_v55 = vsub.f32 %v4277_v5, %v1587_v30 }
 0x993   :  { %v1599_v47 = vmul.f32 %v4308_v55, %v4308_v55 }
 0x995   :  { %v1605_v22 = vsel %vm110_vm1, %v1599_v47, 0.0 }
 0x996   :  { %1606 = vadd.xlane.f32.xlu0 %v1605_v22  ;;  %v1574_v63 = vpop.xlane.xlu1 %1573 }
 0x997   :  { %v1588_v8 = vmul.f32 %v1574_v63, %v3550_v42 }
 0x999   :  { %v4315_v29 = vsub.f32 %v4282_v23, %v1588_v8 }
 0x99b   :  { %v1600_v41 = vmul.f32 %v4315_v29, %v4315_v29 }
 0x99d   :  { %v1608_v53 = vsel %vm110_vm1, %v1600_v41, 0.0 }
 0x99e   :  { %1609 = vadd.xlane.f32.xlu1 %v1608_v53 }
 0x99f   :  { %v1577_v11 = vpop.xlane.xlu2 %1576 }
 0x9a0   :  { %v1589_v43 = vmul.f32 %v1577_v11, %v3550_v42 }
 0x9a2   :  { %v4322_v40 = vsub.f32 %v4287_v28, %v1589_v43 }
 0x9a4   :  { %v1601_v50 = vmul.f32 %v4322_v40, %v4322_v40 }
 0x9a6   :  { %v1611_v13 = vsel %vm110_vm1, %v1601_v50, 0.0 }
 0x9a7   :  { %v1580_v57 = vpop.xlane.xlu0 %1579  ;;  %1612 = vadd.xlane.f32.xlu2 %v1611_v13 }
 0x9a8   :  { %v1590_v1 = vmul.f32 %v1580_v57, %v3550_v42 }
 0x9aa   :  { %v4329_v38 = vsub.f32 %v4292_v62, %v1590_v1 }
 0x9ac   :  { %v1602_v2 = vmul.f32 %v4329_v38, %v4329_v38 }
 0x9ae   :  { %v1614_v51 = vsel %vm110_vm1, %v1602_v2, 0.0 }
 0x9af   :  { %1615 = vadd.xlane.f32.xlu0 %v1614_v51 }
 0x9e7   :  { %v1583_v32 = vpop.xlane.xlu1 %1582 }
 0x9e8   :  { %v1591_v56 = vmul.f32 %v1583_v32, %v3550_v42 }
 0x9ea   :  { %v4336_v3 = vsub.f32 %v4297_v14, %v1591_v56 }
 0x9ec   :  { %v1603_v60 = vmul.f32 %v4336_v3, %v4336_v3 }
 0x9ee   :  { %v1617_v26 = vsel %vm110_vm1, %v1603_v60, 0.0 }
 0x9ef   :  { %v1586_v18 = vpop.xlane.xlu2 %1585  ;;  %1618 = vadd.xlane.f32.xlu1 %v1617_v26 }
 0x9f0   :  { %v1592_v31 = vmul.f32 %v1586_v18, %v3550_v42 }
 0x9f2   :  { %v4343_v0 = vsub.f32 %v4302_v37, %v1592_v31 }
 0x9f4   :  { %v1604_v45 = vmul.f32 %v4343_v0, %v4343_v0 }
 0x9f6   :  { %v1620_v9 = vsel %vm110_vm1, %v1604_v45, 0.0 }
 0x9f7   :  { %1621 = vadd.xlane.f32.xlu2 %v1620_v9 }
 0xa09   :  { %v1607_v58 = vpop.xlane.xlu0 %1606 }
 0xa0a   :  { %v1623_v4 = vmul.f32 %v1607_v58, %v3550_v42 }
 0xa0c   :  { %v1629_v46 = vadd.f32 1e-05, %v1623_v4 }
 0xa0e   :  { %3291 = vrsqrt.f32 %v1629_v46  ;;  %vm1641_vm12 = vweird.f32 %v1629_v46 }
 0xa11   :  { %v1610_v52 = vpop.xlane.xlu1 %1609 }
 0xa12   :  { %v1624_v20 = vmul.f32 %v1610_v52, %v3550_v42 }
 0xa14   :  { %v3292_v27 = vpop.eup %3291  ;;  %v1630_v17 = vadd.f32 1e-05, %v1624_v20 }
 0xa15   :  { %v1636_v19 = vmul.f32 %v3292_v27, %v1629_v46  ;;  %vm1642_vm10 = vweird.f32 %v3292_v27 }
 0xa16   :  { %3293 = vrsqrt.f32 %v1630_v17  ;;  %vm1643_vm13 = vmor %vm1641_vm12, %vm1642_vm10  ;;  %vm1651_vm15 = vweird.f32 %v1630_v17 }
 0xa17   :  { %v1637_v21 = vmul.f32 %v3292_v27, %v1636_v19 }
 0xa19   :  { %v1638_v54 = vmul.f32 0.5, %v1637_v21 }
 0xa1a   :  { %v1613_v6 = vpop.xlane.xlu2 %1612 }
 0xa1b   :  { %v1625_v16 = vmul.f32 %v1613_v6, %v3550_v42  ;;  %v1639_v25 = vsub.f32 1.5, %v1638_v54 }
 0xa1c   :  { %v3294_v24 = vpop.eup %3293 }
 0xa1d   :  { %v1631_v44 = vadd.f32 1e-05, %v1625_v16  ;;  %v1640_v35 = vmul.f32 %v3292_v27, %v1639_v25  ;;  %v1646_v59 = vmul.f32 %v3294_v24, %v1630_v17  ;;  %vm1652_vm14 = vweird.f32 %v3294_v24 }
 0xa1e   :  { %vm1653_vm2 = vmor %vm1651_vm15, %vm1652_vm14 }
 0xa1f   :  { %3295 = vrsqrt.f32 %v1631_v44  ;;  %v1644_v48 = vsel %vm1643_vm13, %v3292_v27, %v1640_v35  ;;  %v1647_v36 = vmul.f32 %v3294_v24, %v1646_v59  ;;  %vm1661_vm4 = vweird.f32 %v1631_v44 }
 0xa20   :  { %v1695_v33 = vmul.f32 %v1644_v48, %v4308_v55 }
 0xa21   :  { %v1648_v7 = vmul.f32 0.5, %v1647_v36 }
 0xa22   :  { %v1616_v61 = vpop.xlane.xlu0 %1615  ;;  %v1702_v30 = vmul.f32 %v4366_v34, %v1695_v33 }
 0xa23   :  { %v1626_v47 = vmul.f32 %v1616_v61, %v3550_v42  ;;  %v1649_v22 = vsub.f32 1.5, %v1648_v7 }
 0xa24   :  { %v1709_v41 = vadd.f32 %v4372_v49, %v1702_v30 }
 0xa25   :  { %v3296_v63 = vpop.eup %3295  ;;  %v1632_v8 = vadd.f32 1e-05, %v1626_v47  ;;  %v1650_v53 = vmul.f32 %v3294_v24, %v1649_v22 }
 0xa26   :  { %v1656_v55 = vmul.f32 %v3296_v63, %v1631_v44  ;;  %3004 = vmatmul.msk.f32.vlgmr.msra.gmra.mxu0 %vm110_vm1, %v1709_v41  ;;  %vm1662_vm3 = vweird.f32 %v3296_v63  ;;  %v3173_v41 = vld [vmem:[%s4863_s3 + $0xe] ss:$0 sm:$0xff] }
 0xa27   :  { %3297 = vrsqrt.f32 %v1632_v8  ;;  %v1654_v11 = vsel %vm1653_vm2, %v3294_v24, %v1650_v53  ;;  %vm1663_vm5 = vmor %vm1661_vm4, %vm1662_vm3  ;;  %vm1671_vm7 = vweird.f32 %v1632_v8 }
 0xa28   :  { %v1657_v43 = vmul.f32 %v3296_v63, %v1656_v55  ;;  %v1696_v50 = vmul.f32 %v1654_v11, %v4315_v29 }
 0xa2a   :  { %v1658_v13 = vmul.f32 0.5, %v1657_v43  ;;  %v1703_v57 = vmul.f32 %v4366_v34, %v1696_v50 }
 0xa2c   :  { %v1659_v1 = vsub.f32 1.5, %v1658_v13  ;;  %v1710_v51 = vadd.f32 %v4372_v49, %v1703_v57 }
 0xa2d   :  { %v3298_v2 = vpop.eup %3297 }
 0xa2e   :  { %v1660_v32 = vmul.f32 %v3296_v63, %v1659_v1  ;;  %v1666_v56 = vmul.f32 %v3298_v2, %v1632_v8  ;;  %3005 = vmatmul.msk.f32.gmra.mxu0 %vm110_vm1, %v1710_v51  ;;  %vm1672_vm6 = vweird.f32 %v3298_v2 }
 0xa2f   :  { %vm1673_vm8 = vmor %vm1671_vm7, %vm1672_vm6 }
 0xa30   :  { %v1664_v60 = vsel %vm1663_vm5, %v3296_v63, %v1660_v32  ;;  %v1667_v26 = vmul.f32 %v3298_v2, %v1666_v56 }
 0xa31   :  { %v1697_v18 = vmul.f32 %v1664_v60, %v4322_v40 }
 0xa32   :  { %v1668_v31 = vmul.f32 0.5, %v1667_v26 }
 0xa33   :  { %v1704_v29 = vmul.f32 %v4366_v34, %v1697_v18 }
 0xa34   :  { %v1669_v45 = vsub.f32 1.5, %v1668_v31 }
 0xa35   :  { %v1711_v9 = vadd.f32 %v4372_v49, %v1704_v29 }
 0xa36   :  { %v1670_v10 = vmul.f32 %v3298_v2, %v1669_v45 }
 0xa37   :  { %3006 = vmatmul.msk.f32.gmra.mxu0 %vm110_vm1, %v1711_v9 }
 0xa38   :  { %v1674_v12 = vsel %vm1673_vm8, %v3298_v2, %v1670_v10 }
 0xa39   :  { %v1698_v39 = vmul.f32 %v1674_v12, %v4329_v38 }
 0xa3b   :  { %v1705_v15 = vmul.f32 %v4366_v34, %v1698_v39 }
 0xa3d   :  { %v1712_v58 = vadd.f32 %v4372_v49, %v1705_v15 }
 0xa3f   :  { %3007 = vmatmul.msk.f32.gmra.mxu0 %vm110_vm1, %v1712_v58  ;;  %v3389_v58 = vld [vmem:[%s4864_s4] sm:$0xff] }
 0xa62   :  { %v1619_v40 = vpop.xlane.xlu1 %1618 }
 0xa63   :  { %v1627_v4 = vmul.f32 %v1619_v40, %v3550_v42 }
 0xa65   :  { %v1633_v46 = vadd.f32 1e-05, %v1627_v4 }
 0xa67   :  { %3299 = vrsqrt.f32 %v1633_v46  ;;  %vm1681_vm10 = vweird.f32 %v1633_v46 }
 0xa6a   :  { %v1622_v52 = vpop.xlane.xlu2 %1621 }
 0xa6b   :  { %v1628_v20 = vmul.f32 %v1622_v52, %v3550_v42  ;;  %v3390_v52 = vld [vmem:[%s4864_s4 + $0x8] sm:$0xff] }
 0xa6d   :  { %v3300_v27 = vpop.eup %3299  ;;  %v1634_v17 = vadd.f32 1e-05, %v1628_v20 }
 0xa6e   :  { %v1676_v19 = vmul.f32 %v3300_v27, %v1633_v46  ;;  %vm1682_vm9 = vweird.f32 %v3300_v27 }
 0xa6f   :  { %3301 = vrsqrt.f32 %v1634_v17  ;;  %vm1683_vm12 = vmor %vm1681_vm10, %vm1682_vm9  ;;  %vm1691_vm14 = vweird.f32 %v1634_v17 }
 0xa70   :  { %v1677_v21 = vmul.f32 %v3300_v27, %v1676_v19 }
 0xa72   :  { %v1678_v38 = vmul.f32 0.5, %v1677_v21 }
 0xa74   :  { %v1679_v54 = vsub.f32 1.5, %v1678_v38 }
 0xa75   :  { %v3302_v6 = vpop.eup %3301 }
 0xa76   :  { %v1680_v16 = vmul.f32 %v3300_v27, %v1679_v54  ;;  %v1686_v25 = vmul.f32 %v3302_v6, %v1634_v17  ;;  %vm1692_vm13 = vweird.f32 %v3302_v6 }
 0xa77   :  { %vm1693_vm15 = vmor %vm1691_vm14, %vm1692_vm13 }
 0xa78   :  { %v1684_v24 = vsel %vm1683_vm12, %v3300_v27, %v1680_v16  ;;  %v1687_v44 = vmul.f32 %v3302_v6, %v1686_v25  ;;  %v3391_v25 = vld [vmem:[%s4864_s4 + $0x10] sm:$0xff] }
 0xa79   :  { %v1699_v35 = vmul.f32 %v1684_v24, %v4336_v3 }
 0xa7a   :  { %v1688_v59 = vmul.f32 0.5, %v1687_v44 }
 0xa7b   :  { %v1706_v48 = vmul.f32 %v4366_v34, %v1699_v35 }
 0xa7c   :  { %v1689_v36 = vsub.f32 1.5, %v1688_v59 }
 0xa7d   :  { %v1713_v33 = vadd.f32 %v4372_v49, %v1706_v48 }
 0xa7e   :  { %v1690_v7 = vmul.f32 %v3302_v6, %v1689_v36 }
 0xa7f   :  { %3008 = vmatmul.msk.f32.gmra.mxu0 %vm110_vm1, %v1713_v33 }
 0xa80   :  { %v1694_v61 = vsel %vm1693_vm15, %v3302_v6, %v1690_v7 }
 0xa81   :  { %v1700_v30 = vmul.f32 %v1694_v61, %v4343_v0 }
 0xa83   :  { %v1707_v47 = vmul.f32 %v4366_v34, %v1700_v30  ;;  %v3392_v30 = vld [vmem:[%s4864_s4 + $0x18] sm:$0xff] }
 0xa85   :  { %v1714_v22 = vadd.f32 %v4372_v49, %v1707_v47 }
 0xa87   :  { %3009 = vmatmul.msk.f32.gmra.mxu0 %vm110_vm1, %v1714_v22 }
 0xaa3   :  { %v1757_v3 = vpop.f32.mrf.mxu0 }
 0xaa4   :  { %v4407_v0 = vadd.f32 %v3173_v41, %v1757_v3 }
 0xaab   :  { %v1760_v63 = vpop.f32.mrf.mxu0 }
 0xaac   :  { %v1761_v13 = vadd.f32 %v3173_v41, %v1760_v63 }
 0xaae   :  { %v4484_v21 = vpack.i.bf16 %v4407_v0, %v1761_v13 }
 0xab4   :  { %v1763_v8 = vpop.f32.mrf.mxu0 }
 0xab5   :  { %v4417_v43 = vadd.f32 %v3173_v41, %v1763_v8 }
 0xabc   :  { %v1766_v53 = vpop.f32.mrf.mxu0 }
 0xabd   :  { %v4403_v55 = vadd.f32 %v3173_v41, %v1766_v53 }
 0xabf   :  { %2085 = vrot.lane.b32.xlu2 %v4403_v55, %s3422_s22  ;;  %v4498_v33 = vpack.i.bf16 %v4417_v43, %v4403_v55 }
 0xac7   :  { %2079 = vrot.lane.b32.xlu2 %v4407_v0, %s3422_s22 }
 0xafc   :  { %v1769_v34 = vpop.f32.mrf.mxu0 }
 0xafd   :  { %v4411_v49 = vadd.f32 %v3173_v41, %v1769_v34 }
 0xaff   :  { %1789 = vrot.lane.b32.xlu2 %v4411_v49, %s3423_s23  ;;  %2087 = vrot.lane.b32.xlu1 %v4411_v49, %s3422_s22 }
 0xb04   :  { %v1772_v11 = vpop.f32.mrf.mxu0 }
 0xb05   :  { %v4419_v50 = vadd.f32 %v3173_v41, %v1772_v11 }
 0xb07   :  { %2089 = vrot.lane.b32.xlu0 %v4419_v50, %s3422_s22  ;;  %1785 = vrot.lane.b32.xlu2 %v4417_v43, %s3423_s23  ;;  %v4479_v17 = vpack.i.bf16 %v4411_v49, %v4419_v50 }
 0xb08   :  { %2067 = vrot.lane.b32.xlu1 %v4407_v0, %s3424_s24 }
 0xb0f   :  { %2083 = vrot.lane.b32.xlu0 %v4417_v43, %s3422_s22  ;;  %1781 = vrot.lane.b32.xlu2 %v4407_v0, %s3423_s23 }
 0xb10   :  { %2069 = vrot.lane.b32.xlu1 %v1761_v13, %s3424_s24 }
 0xb17   :  { %2081 = vrot.lane.b32.xlu0 %v1761_v13, %s3422_s22 }
 0xb18   :  { %2071 = vrot.lane.b32.xlu1 %v4417_v43, %s3424_s24 }
 0xb19   :  { %v2086_v2 = vpop.permute.xlu2 %2085 }
 0xb1f   :  { %1791 = vrot.lane.b32.xlu0 %v4419_v50, %s3423_s23 }
 0xb20   :  { %2073 = vrot.lane.b32.xlu1 %v4403_v55, %s3424_s24 }
 0xb21   :  { %v2080_v32 = vpop.permute.xlu2 %2079 }
 0xb27   :  { %1787 = vrot.lane.b32.xlu0 %v4403_v55, %s3423_s23 }
 0xb2f   :  { %1783 = vrot.lane.b32.xlu0 %v1761_v13, %s3423_s23 }
 0xb59   :  { %v1790_v26 = vpop.permute.xlu2 %1789 }
 0xb61   :  { %v1786_v45 = vpop.permute.xlu2 %1785 }
 0xb69   :  { %v1782_v12 = vpop.permute.xlu2 %1781 }
 0xb71   :  { %v2088_v1 = vpop.permute.xlu1 %2087 }
 0xb79   :  { %v2090_v57 = vpop.permute.xlu0 %2089 }
 0xb7a   :  { %3028 = vmatpush.xpose.msk.msrb.mxu1 %vm495_vm11, %v2090_v57  ;;  %v2068_v60 = vpop.permute.xlu1 %2067 }
 0xb7e   :  { %3029 = vmatpush.xpose.msk.msrb.mxu1 %vm495_vm11, %v2088_v1 }
 0xb81   :  { %v2084_v51 = vpop.permute.xlu0 %2083 }
 0xb82   :  { %3030 = vmatpush.xpose.msk.msrb.mxu1 %vm495_vm11, %v2086_v2  ;;  %v2070_v31 = vpop.permute.xlu1 %2069 }
 0xb86   :  { %3031 = vmatpush.xpose.msk.msrb.mxu1 %vm495_vm11, %v2084_v51 }
 0xb89   :  { %v2082_v56 = vpop.permute.xlu0 %2081 }
 0xb8a   :  { %3032 = vmatpush.xpose.msk.msrb.mxu1 %vm495_vm11, %v2082_v56  ;;  %v2072_v9 = vpop.permute.xlu1 %2071 }
 0xb8e   :  { %3033 = vmatpush.xpose.msk.msrb.mxu1 %vm495_vm11, %v2080_v32 }
 0xb91   :  { %v1792_v18 = vpop.permute.xlu0 %1791  ;;  %3034 = vmatmul.msk.f32.vlgmr.msrb.gmra.mxu1 %vm495_vm11, %v2068_v60 }
 0xb92   :  { %3010 = vmatpush.xpose.msk.msrb.mxu3 %vm495_vm11, %v1792_v18  ;;  %v2074_v39 = vpop.permute.xlu1 %2073 }
 0xb96   :  { %3011 = vmatpush.xpose.msk.msrb.mxu3 %vm495_vm11, %v1790_v26 }
 0xb99   :  { %v1788_v29 = vpop.permute.xlu0 %1787  ;;  %3035 = vmatmul.msk.f32.gmra.mxu1 %vm495_vm11, %v2070_v31 }
 0xb9a   :  { %3012 = vmatpush.xpose.msk.msrb.mxu3 %vm495_vm11, %v1788_v29 }
 0xb9e   :  { %3013 = vmatpush.xpose.msk.msrb.mxu3 %vm495_vm11, %v1786_v45 }
 0xba1   :  { %v1784_v10 = vpop.permute.xlu0 %1783  ;;  %3036 = vmatmul.msk.f32.gmra.mxu1 %vm495_vm11, %v2072_v9 }
 0xba2   :  { %3014 = vmatpush.xpose.msk.msrb.mxu3 %vm495_vm11, %v1784_v10 }
 0xba6   :  { %3015 = vmatpush.xpose.msk.msrb.mxu3 %vm495_vm11, %v1782_v12 }
 0xba9   :  { %3016 = vmatmul.msk.f32.vlgmr.msrb.gmra.mxu3 %vm495_vm11, %v4407_v0  ;;  %3037 = vmatmul.msk.f32.gmra.mxu1 %vm495_vm11, %v2074_v39 }
 0xbb1   :  { %3017 = vmatmul.msk.f32.gmra.mxu3 %vm495_vm11, %v1761_v13 }
 0xbb9   :  { %3018 = vmatmul.msk.f32.gmra.mxu3 %vm495_vm11, %v4417_v43 }
 0xbc1   :  { %3019 = vmatmul.msk.f32.gmra.mxu3 %vm495_vm11, %v4403_v55 }
 0xbc9   :  { %3020 = vmatmul.msk.f32.gmra.mxu3 %vm495_vm11, %v4411_v49 }
 0xbd1   :  { %3021 = vmatmul.msk.f32.gmra.mxu3 %vm495_vm11, %v4419_v50 }
 0xc0e   :  { %v2132_v15 = vpop.f32.mrf.mxu1 }
 0xc0f   :  { %v2133_v40 = vadd.f32 %v3389_v58, %v2132_v15 }
 0xc11   :  { %v2150_v4 = vsel %vm54_vm0, %v2133_v40, -inf }
 0xc12   :  { %2151 = vmax.xlane.f32.xlu0 %v2150_v4 }
 0xc16   :  { %v2135_v46 = vpop.f32.mrf.mxu1 }
 0xc17   :  { %v2136_v20 = vadd.f32 %v3390_v52, %v2135_v46 }
 0xc19   :  { %v2153_v27 = vsel %vm54_vm0, %v2136_v20, -inf }
 0xc1a   :  { %2154 = vmax.xlane.f32.xlu2 %v2153_v27 }
 0xc1e   :  { %v2138_v16 = vpop.f32.mrf.mxu1 }
 0xc1f   :  { %v2139_v24 = vadd.f32 %v3391_v25, %v2138_v16 }
 0xc21   :  { %v2156_v44 = vsel %vm54_vm0, %v2139_v24, -inf }
 0xc26   :  { %3132 = vrot.lane.b32.xlu0 %v4479_v17, %s3425_s25  ;;  %v2141_v61 = vpop.f32.mrf.mxu1 }
 0xc27   :  { %v2142_v47 = vadd.f32 %v3392_v30, %v2141_v61 }
 0xc29   :  { %v2159_v22 = vsel %vm54_vm0, %v2142_v47, -inf }
 0xc2c   :  { %v1834_v19 = vpop.f32.mrf.mxu3 }
 0xc2d   :  { %v1835_v35 = vadd.f32 %v3389_v58, %v1834_v19 }
 0xc2f   :  { %v1852_v59 = vsel %vm54_vm0, %v1835_v35, -inf }
 0xc32   :  { %3142 = vrot.lane.b32.xlu2 %v4484_v21, %s3425_s25 }
 0xc34   :  { %v1837_v38 = vpop.f32.mrf.mxu3 }
 0xc35   :  { %v1838_v54 = vadd.f32 %v3390_v52, %v1837_v38 }
 0xc37   :  { %v1855_v6 = vsel %vm54_vm0, %v1838_v54, -inf }
 0xc38   :  { %1856 = vmax.xlane.f32.xlu1 %v1855_v6 }
 0xc3c   :  { %v1840_v48 = vpop.f32.mrf.mxu3 }
 0xc3d   :  { %v4494_v36 = vadd.f32 %v3391_v25, %v1840_v48 }
 0xc3f   :  { %v1858_v7 = vsel %vm54_vm0, %v4494_v36, -inf }
 0xc40   :  { %2157 = vmax.xlane.f32.xlu1 %v2156_v44 }
 0xc44   :  { %v1843_v3 = vpop.f32.mrf.mxu3 }
 0xc45   :  { %v4508_v63 = vadd.f32 %v3392_v30, %v1843_v3 }
 0xc47   :  { %v1861_v8 = vsel %vm54_vm0, %v4508_v63, -inf }
 0xc50   :  { %1853 = vmax.xlane.f32.xlu0 %v1852_v59 }
 0xc59   :  { %3137 = vrot.lane.b32.xlu1 %v4498_v33, %s3425_s25 }
 0xc5b   :  { %1859 = vmax.xlane.f32.xlu2 %v1858_v7  ;;  %v1846_v7 = vpop.f32.mrf.mxu3 }
 0xc63   :  { %2160 = vmax.xlane.f32.xlu2 %v2159_v22  ;;  %v1849_v30 = vpop.f32.mrf.mxu3 }
 0xc83   :  { %1862 = vmax.xlane.f32.xlu1 %v1861_v8 }
 0xc85   :  { %v2152_v41 = vpop.xlane.xlu0 %2151 }
 0xc86   :  { %v2168_v53 = vsub.f32 %v2133_v40, %v2152_v41 }
 0xc88   :  { %v2174_v55 = vmul.f32 1.442695, %v2168_v53 }
 0xc8a   :  { %3303 = vpow2.f32 %v2174_v55 }
 0xc8d   :  { %v2155_v0 = vpop.xlane.xlu2 %2154 }
 0xc8e   :  { %v2169_v34 = vsub.f32 %v2136_v20, %v2155_v0 }
 0xc90   :  { %v4512_v11 = vpop.eup %3303  ;;  %v2176_v43 = vmul.f32 1.442695, %v2169_v34 }
 0xc91   :  { %v2186_v13 = vsel %vm54_vm0, %v4512_v11, 0.0 }
 0xc92   :  { %3305 = vpow2.f32 %v2176_v43  ;;  %2187 = vadd.xlane.f32.xlu0 %v2186_v13 }
 0xc95   :  { %v3143_v58 = vpop.permute.xlu2 %3142 }
 0xc96   :  { %v3144_v38 = vunpack.i.l.bf16 %v3143_v58 }
 0xc98   :  { %v4516_v57 = vpop.eup %3305  ;;  %v3133_v1 = vpop.permute.xlu0 %3132 }
 0xc99   :  { %v3134_v2 = vunpack.i.l.bf16 %v3133_v1  ;;  %v2189_v51 = vsel %vm54_vm0, %v4516_v57, 0.0  ;;  %v3135_v32 = vunpack.i.h.bf16 %v3133_v1 }
 0xc9a   :  { %2190 = vadd.xlane.f32.xlu2 %v2189_v51 }
 0xc9b   :  { %2340 = vmatpush.msrb.mxu0 %v3134_v2 }
 0xc9d   :  { %2341 = vmatpush.msrb.mxu0 %v3135_v32 }
 0xcab   :  { %v1857_v56 = vpop.xlane.xlu1 %1856 }
 0xcac   :  { %v1871_v60 = vsub.f32 %v1838_v54, %v1857_v56  ;;  %v3145_v54 = vunpack.i.h.bf16 %v3143_v58 }
 0xcae   :  { %v1878_v26 = vmul.f32 1.442695, %v1871_v60 }
 0xcb0   :  { %3307 = vpow2.f32 %v1878_v26 }
 0xcb3   :  { %v2158_v18 = vpop.xlane.xlu1 %2157 }
 0xcb4   :  { %v2170_v31 = vsub.f32 %v2139_v24, %v2158_v18 }
 0xcb6   :  { %v4520_v29 = vpop.eup %3307  ;;  %v2178_v45 = vmul.f32 1.442695, %v2170_v31 }
 0xcb7   :  { %v1891_v9 = vsel %vm54_vm0, %v4520_v29, 0.0 }
 0xcb8   :  { %3309 = vpow2.f32 %v2178_v45  ;;  %1892 = vadd.xlane.f32.xlu2 %v1891_v9 }
 0xcbe   :  { %v4524_v10 = vpop.eup %3309 }
 0xcbf   :  { %v2192_v12 = vsel %vm54_vm0, %v4524_v10, 0.0 }
 0xcc0   :  { %2193 = vadd.xlane.f32.xlu2 %v2192_v12 }
 0xcc3   :  { %v1854_v39 = vpop.xlane.xlu0 %1853 }
 0xcc4   :  { %v1870_v15 = vsub.f32 %v1835_v35, %v1854_v39 }
 0xcc6   :  { %v1876_v40 = vmul.f32 1.442695, %v1870_v15 }
 0xcc8   :  { %3311 = vpow2.f32 %v1876_v40 }
 0xccb   :  { %v3138_v4 = vpop.permute.xlu1 %3137 }
 0xccc   :  { %v3139_v46 = vunpack.i.l.bf16 %v3138_v4  ;;  %v3140_v20 = vunpack.i.h.bf16 %v3138_v4 }
 0xcce   :  { %v4528_v52 = vpop.eup %3311  ;;  %v1860_v27 = vpop.xlane.xlu2 %1859  ;;  %2342 = vmatpush.msrb.mxu0 %v3139_v46 }
 0xccf   :  { %v1888_v19 = vsel %vm54_vm0, %v4528_v52, 0.0  ;;  %v1872_v41 = vsub.f32 %v4494_v36, %v1860_v27 }
 0xcd0   :  { %1889 = vadd.xlane.f32.xlu1 %v1888_v19  ;;  %2343 = vmatpush.msrb.mxu0 %v3140_v20 }
 0xcd1   :  { %v1880_v13 = vmul.f32 1.442695, %v1872_v41 }
 0xcd2   :  { %2344 = vmatpush.msrb.mxu0 %v3144_v38 }
 0xcd4   :  { %2345 = vmatpush.msrb.mxu0 %v3145_v54 }
 0xcd6   :  { %v2161_v6 = vpop.xlane.xlu2 %2160 }
 0xcd7   :  { %v2171_v16 = vsub.f32 %v2142_v47, %v2161_v6 }
 0xcd8   :  { %2075 = vrot.lane.b32.xlu2 %v4411_v49, %s3424_s24 }
 0xcd9   :  { %v2180_v25 = vmul.f32 1.442695, %v2171_v16 }
 0xcdb   :  { %3313 = vpow2.f32 %v2180_v25 }
 0xce1   :  { %v4534_v24 = vpop.eup %3313 }
 0xce2   :  { %v2195_v44 = vsel %vm54_vm0, %v4534_v24, 0.0 }
 0xce3   :  { %2196 = vadd.xlane.f32.xlu0 %v2195_v44 }
 0xce9   :  { %3152 = vrot.lane.b32.xlu1 %v4498_v33, %s3426_s16 }
 0xcf1   :  { %3157 = vrot.lane.b32.xlu1 %v4484_v21, %s3426_s16  ;;  %v4554_v21 = vld [vmem:[%s4864_s4 + $0x20] sm:$0xff] }
 0xcf6   :  { %v1863_v35 = vpop.xlane.xlu1 %1862 }
 0xcf7   :  { %v1873_v59 = vsub.f32 %v4508_v63, %v1863_v35  ;;  %3147 = vrot.lane.b32.xlu0 %v4479_v17, %s3426_s16  ;;  %v4557_v17 = vadd.f32 %v4554_v21, %v1846_v7  ;;  %v4564_v63 = vld [vmem:[%s4864_s4 + $0x28] sm:$0xff] }
 0xcf8   :  { %v4567_v8 = vadd.f32 %v4564_v63, %v1849_v30 }
 0xcf9   :  { %v1882_v49 = vmul.f32 1.442695, %v1873_v59  ;;  %2077 = vrot.lane.b32.xlu1 %v4419_v50, %s3424_s24  ;;  %v1864_v50 = vsel %vm54_vm0, %v4557_v17, -inf }
 0xcfa   :  { %v1867_v43 = vsel %vm54_vm0, %v4567_v8, -inf }
 0xcfb   :  { %3315 = vpow2.f32 %v1882_v49 }
 0xd01   :  { %v4547_v48 = vpop.eup %3315 }
 0xd02   :  { %v1897_v33 = vsel %vm54_vm0, %v4547_v48, 0.0 }
 0xd03   :  { %1898 = vadd.xlane.f32.xlu2 %v1897_v33 }
 0xd05   :  { %v2188_v61 = vpop.xlane.xlu0 %2187 }
 0xd06   :  { %3317 = vrcp.f32 %v2188_v61  ;;  %v2215_v55 = vand.u32 2147483648, %v2188_v61  ;;  %v2213_v34 = vand.u32 2147483647, %v2188_v61  ;;  %vm2209_vm3 = vweird.f32 %v2188_v61 }
 0xd08   :  { %v2216_v51 = vor.u32 1.1754944e-38, %v2215_v55  ;;  %vm2214_vm5 = vcmp.eq.f32.partialorder %v2213_v34, 8.507059e+37 }
 0xd0b   :  { %1865 = vmax.xlane.f32.xlu2 %v1864_v50 }
 0xd0c   :  { %v3318_v47 = vpop.eup %3317 }
 0xd0d   :  { %v2205_v22 = vmul.f32 %v3318_v47, %v2188_v61  ;;  %v2191_v3 = vpop.xlane.xlu2 %2190  ;;  %vm2210_vm2 = vweird.f32 %v3318_v47 }
 0xd0e   :  { %3319 = vrcp.f32 %v2191_v3  ;;  %vm2211_vm4 = vmor %vm2209_vm3, %vm2210_vm2  ;;  %v2230_v18 = vand.u32 2147483648, %v2191_v3  ;;  %v2228_v45 = vand.u32 2147483647, %v2191_v3  ;;  %vm2224_vm7 = vweird.f32 %v2191_v3 }
 0xd0f   :  { %v2206_v53 = vsub.f32 1.0, %v2205_v22  ;;  %3321 = vpow2.f32 %v1880_v13 }
 0xd10   :  { %v2231_v12 = vor.u32 1.1754944e-38, %v2230_v18  ;;  %vm2229_vm9 = vcmp.eq.f32.partialorder %v2228_v45, 8.507059e+37 }
 0xd11   :  { %v2207_v0 = vmul.f32 %v3318_v47, %v2206_v53 }
 0xd13   :  { %v2208_v1 = vadd.f32 %v3318_v47, %v2207_v0  ;;  %1868 = vmax.xlane.f32.xlu2 %v1867_v43 }
 0xd14   :  { %v3320_v2 = vpop.eup %3319 }
 0xd15   :  { %v2212_v32 = vsel %vm2211_vm4, %v3318_v47, %v2208_v1  ;;  %v2220_v56 = vmul.f32 %v3320_v2, %v2191_v3  ;;  %vm2225_vm6 = vweird.f32 %v3320_v2  ;;  %v4574_v39 = vpop.eup %3321 }
 0xd16   :  { %v2217_v60 = vsel %vm2214_vm5, %v2216_v51, %v2212_v32  ;;  %vm2226_vm8 = vmor %vm2224_vm7, %vm2225_vm6 }
 0xd17   :  { %v2221_v36 = vsub.f32 1.0, %v2220_v56  ;;  %v2218_v26 = vmul.f32 %v4512_v11, %v2217_v60  ;;  %v1894_v11 = vsel %vm54_vm0, %v4574_v39, 0.0 }
 0xd19   :  { %v2222_v31 = vmul.f32 %v3320_v2, %v2221_v36  ;;  %3040 = vmatmul.msk.f32.vlgmr.msrb.gmra.mxu0 %vm54_vm0, %v2218_v26 }
 0xd1b   :  { %v2223_v9 = vadd.f32 %v3320_v2, %v2222_v31 }
 0xd1d   :  { %v2227_v15 = vsel %vm2226_vm8, %v3320_v2, %v2223_v9 }
 0xd1e   :  { %v2232_v58 = vsel %vm2229_vm9, %v2231_v12, %v2227_v15 }
 0xd1f   :  { %v2233_v40 = vmul.f32 %v4516_v57, %v2232_v58 }
 0xd21   :  { %1895 = vadd.xlane.f32.xlu0 %v1894_v11  ;;  %3041 = vmatmul.msk.f32.gmra.mxu0 %vm54_vm0, %v2233_v40 }
 0xd2b   :  { %v4580_v4 = vpop.xlane.xlu2 %1892 }
 0xd33   :  { %v2194_v46 = vpop.xlane.xlu2 %2193 }
 0xd34   :  { %3323 = vrcp.f32 %v2194_v46  ;;  %v2245_v6 = vand.u32 2147483648, %v2194_v46  ;;  %v2243_v57 = vand.u32 2147483647, %v2194_v46  ;;  %vm2239_vm12 = vweird.f32 %v2194_v46 }
 0xd36   :  { %v2246_v25 = vor.u32 1.1754944e-38, %v2245_v6  ;;  %vm2244_vm14 = vcmp.eq.f32.partialorder %v2243_v57, 8.507059e+37 }
 0xd3a   :  { %v3324_v20 = vpop.eup %3323 }
 0xd3b   :  { %v2235_v27 = vmul.f32 %v3324_v20, %v2194_v46  ;;  %v2076_v19 = vpop.permute.xlu2 %2075  ;;  %vm2240_vm10 = vweird.f32 %v3324_v20 }
 0xd3c   :  { %3038 = vmatmul.msk.f32.gmra.mxu1 %vm495_vm11, %v2076_v19  ;;  %vm2241_vm13 = vmor %vm2239_vm12, %vm2240_vm10  ;;  %vm1926_vm10 = vweird.f32 %v4580_v4 }
 0xd3d   :  { %v2236_v38 = vsub.f32 1.0, %v2235_v27  ;;  %v1932_v27 = vand.u32 2147483648, %v4580_v4 }
 0xd3f   :  { %v2237_v54 = vmul.f32 %v3324_v20, %v2236_v38  ;;  %v1933_v57 = vor.u32 1.1754944e-38, %v1932_v27 }
 0xd41   :  { %v2238_v16 = vadd.f32 %v3324_v20, %v2237_v54  ;;  %v1930_v54 = vand.u32 2147483647, %v4580_v4 }
 0xd43   :  { %v2242_v44 = vsel %vm2241_vm13, %v3324_v20, %v2238_v16  ;;  %v1890_v49 = vpop.xlane.xlu1 %1889  ;;  %vm1931_vm13 = vcmp.eq.f32.partialorder %v1930_v54, 8.507059e+37 }
 0xd44   :  { %v2247_v35 = vsel %vm2244_vm14, %v2246_v25, %v2242_v44  ;;  %3325 = vrcp.f32 %v1890_v49  ;;  %v1917_v31 = vand.u32 2147483648, %v1890_v49  ;;  %vm1911_vm6 = vweird.f32 %v1890_v49 }
 0xd45   :  { %v2248_v59 = vmul.f32 %v4524_v10, %v2247_v35  ;;  %v1915_v9 = vand.u32 2147483647, %v1890_v49 }
 0xd46   :  { %v1918_v58 = vor.u32 1.1754944e-38, %v1917_v31 }
 0xd47   :  { %3042 = vmatmul.msk.f32.gmra.mxu0 %vm54_vm0, %v2248_v59  ;;  %vm1916_vm8 = vcmp.eq.f32.partialorder %v1915_v9, 8.507059e+37 }
 0xd4a   :  { %v3326_v61 = vpop.eup %3325 }
 0xd4b   :  { %v1907_v47 = vmul.f32 %v3326_v61, %v1890_v49  ;;  %vm1912_vm5 = vweird.f32 %v3326_v61 }
 0xd4c   :  { %vm1913_vm7 = vmor %vm1911_vm6, %vm1912_vm5 }
 0xd4d   :  { %v1908_v55 = vsub.f32 1.0, %v1907_v47 }
 0xd4f   :  { %v1909_v2 = vmul.f32 %v3326_v61, %v1908_v55 }
 0xd51   :  { %v1910_v26 = vadd.f32 %v3326_v61, %v1909_v2 }
 0xd56   :  { %v2197_v7 = vpop.xlane.xlu0 %2196 }
 0xd57   :  { %3327 = vrcp.f32 %v2197_v7  ;;  %v2260_v3 = vand.u32 2147483648, %v2197_v7  ;;  %v2258_v53 = vand.u32 2147483647, %v2197_v7  ;;  %vm2254_vm2 = vweird.f32 %v2197_v7 }
 0xd58   :  { %3329 = vrcp.f32 %v4580_v4 }
 0xd59   :  { %v2261_v43 = vor.u32 1.1754944e-38, %v2260_v3  ;;  %vm2259_vm4 = vcmp.eq.f32.partialorder %v2258_v53, 8.507059e+37 }
 0xd5b   :  { %v3153_v33 = vpop.permute.xlu1 %3152 }
 0xd5c   :  { %v3154_v12 = vunpack.i.l.bf16 %v3153_v33  ;;  %v3155_v40 = vunpack.i.h.bf16 %v3153_v33 }
 0xd5d   :  { %v3328_v50 = vpop.eup %3327 }
 0xd5e   :  { %v2250_v30 = vmul.f32 %v3328_v50, %v2197_v7  ;;  %vm2255_vm15 = vweird.f32 %v3328_v50  ;;  %v3330_v0 = vpop.eup %3329 }
 0xd5f   :  { %vm2256_vm3 = vmor %vm2254_vm2, %vm2255_vm15  ;;  %v1922_v1 = vmul.f32 %v3330_v0, %v4580_v4  ;;  %vm1927_vm9 = vweird.f32 %v3330_v0 }
 0xd60   :  { %v2251_v22 = vsub.f32 1.0, %v2250_v30  ;;  %vm1928_vm12 = vmor %vm1926_vm10, %vm1927_vm9 }
 0xd61   :  { %v1923_v36 = vsub.f32 1.0, %v1922_v1 }
 0xd62   :  { %v2252_v41 = vmul.f32 %v3328_v50, %v2251_v22 }
 0xd63   :  { %v3158_v10 = vpop.permute.xlu1 %3157  ;;  %v1924_v15 = vmul.f32 %v3330_v0, %v1923_v36  ;;  %v3047_v36 = vld [vmem:[%s4866_s6 + $0x28] sm:$0xff] }
 0xd64   :  { %v2253_v34 = vadd.f32 %v3328_v50, %v2252_v41  ;;  %v3159_v46 = vunpack.i.l.bf16 %v3158_v10  ;;  %v3160_v19 = vunpack.i.h.bf16 %v3158_v10 }
 0xd65   :  { %v1925_v20 = vadd.f32 %v3330_v0, %v1924_v15 }
 0xd66   :  { %v2257_v13 = vsel %vm2256_vm3, %v3328_v50, %v2253_v34 }
 0xd67   :  { %v2262_v51 = vsel %vm2259_vm4, %v2261_v43, %v2257_v13  ;;  %v1929_v6 = vsel %vm1928_vm12, %v3330_v0, %v1925_v20 }
 0xd68   :  { %v2263_v32 = vmul.f32 %v4534_v24, %v2262_v51  ;;  %v1914_v24 = vsel %vm1913_vm7, %v3326_v61, %v1910_v26  ;;  %v1934_v16 = vsel %vm1931_vm13, %v1933_v57, %v1929_v6 }
 0xd69   :  { %v3148_v56 = vpop.permute.xlu0 %3147  ;;  %v1919_v11 = vsel %vm1916_vm8, %v1918_v58, %v1914_v24  ;;  %v1935_v25 = vmul.f32 %v4520_v29, %v1934_v16 }
 0xd6a   :  { %v3149_v60 = vunpack.i.l.bf16 %v3148_v56  ;;  %3043 = vmatmul.msk.f32.gmra.mxu0 %vm54_vm0, %v2263_v32  ;;  %v3150_v45 = vunpack.i.h.bf16 %v3148_v56  ;;  %v1920_v38 = vmul.f32 %v4528_v52, %v1919_v11 }
 0xd6b   :  { %v2078_v18 = vpop.permute.xlu1 %2077 }
 0xd6c   :  { %2042 = vmatpush.msra.mxu2 %v3149_v60  ;;  %3039 = vmatmul.msk.f32.gmra.mxu1 %vm495_vm11, %v2078_v18  ;;  %v3048_v60 = vld [vmem:[%s4866_s6 + $0x30] sm:$0xff]  ;;  %v3046_v18 = vld [vmem:[%s4866_s6 + $0x20] sm:$0xff] }
 0xd6e   :  { %2043 = vmatpush.msra.mxu2 %v3150_v45 }
 0xd70   :  { %2044 = vmatpush.msra.mxu2 %v3154_v12 }
 0xd72   :  { %2045 = vmatpush.msra.mxu2 %v3155_v40 }
 0xd74   :  { %2046 = vmatpush.msra.mxu2 %v3159_v46 }
 0xd76   :  { %2047 = vmatpush.msra.mxu2 %v3160_v19  ;;  %v1899_v44 = vpop.xlane.xlu2 %1898 }
 0xd77   :  { %3022 = vmatmul.msk.f32.vlgmr.msra.gmra.mxu2 %vm54_vm0, %v1920_v38  ;;  %3331 = vrcp.f32 %v1899_v44  ;;  %v1962_v10 = vand.u32 2147483648, %v1899_v44  ;;  %vm1956_vm5 = vweird.f32 %v1899_v44  ;;  %v1960_v43 = vand.u32 2147483647, %v1899_v44 }
 0xd79   :  { %v1963_v1 = vor.u32 1.1754944e-38, %v1962_v10  ;;  %vm1961_vm7 = vcmp.eq.f32.partialorder %v1960_v43, 8.507059e+37 }
 0xd7d   :  { %v3332_v59 = vpop.eup %3331 }
 0xd7e   :  { %v1952_v4 = vmul.f32 %v3332_v59, %v1899_v44  ;;  %vm1957_vm4 = vweird.f32 %v3332_v59  ;;  %v1866_v9 = vpop.xlane.xlu2 %1865 }
 0xd7f   :  { %3023 = vmatmul.msk.f32.gmra.mxu2 %vm54_vm0, %v1935_v25  ;;  %vm1958_vm6 = vmor %vm1956_vm5, %vm1957_vm4  ;;  %v1874_v15 = vsub.f32 %v4557_v17, %v1866_v9 }
 0xd80   :  { %v1953_v7 = vsub.f32 1.0, %v1952_v4 }
 0xd81   :  { %v1884_v40 = vmul.f32 1.442695, %v1874_v15 }
 0xd82   :  { %v1954_v29 = vmul.f32 %v3332_v59, %v1953_v7 }
 0xd84   :  { %v1955_v55 = vadd.f32 %v3332_v59, %v1954_v29 }
 0xd86   :  { %v1959_v13 = vsel %vm1958_vm6, %v3332_v59, %v1955_v55 }
 0xd87   :  { %v1964_v2 = vsel %vm1961_vm7, %v1963_v1, %v1959_v13 }
 0xd88   :  { %v1965_v51 = vmul.f32 %v4547_v48, %v1964_v2 }
 0xd94   :  { %v1896_v35 = vpop.xlane.xlu0 %1895 }
 0xd95   :  { %3333 = vrcp.f32 %v1896_v35  ;;  %v1947_v30 = vand.u32 2147483648, %v1896_v35  ;;  %v1945_v22 = vand.u32 2147483647, %v1896_v35  ;;  %vm1941_vm15 = vweird.f32 %v1896_v35 }
 0xd96   :  { %v2347_v52 = vpop.f32.mrf.mxu0  ;;  %3335 = vpow2.f32 %v1884_v40 }
 0xd97   :  { %2371 = vrot.lane.b32.xlu1 %v2347_v52, %s3427_s17  ;;  %v1948_v41 = vor.u32 1.1754944e-38, %v1947_v30  ;;  %vm1946_vm3 = vcmp.eq.f32.partialorder %v1945_v22, 8.507059e+37 }
 0xd9b   :  { %v3334_v49 = vpop.eup %3333 }
 0xd9c   :  { %v1937_v33 = vmul.f32 %v3334_v49, %v1896_v35  ;;  %vm1942_vm14 = vweird.f32 %v3334_v49  ;;  %v3336_v19 = vpop.eup %3335 }
 0xd9d   :  { %vm1943_vm2 = vmor %vm1941_vm15, %vm1942_vm14  ;;  %v1900_v17 = vsel %vm54_vm0, %v3336_v19, 0.0 }
 0xd9e   :  { %v1938_v61 = vsub.f32 1.0, %v1937_v33  ;;  %v2350_v50 = vpop.f32.mrf.mxu0  ;;  %v4634_v33 = vld [vmem:[%s4863_s3 + $0xf] ss:$0 sm:$0xff] }
 0xd9f   :  { %2373 = vrot.lane.b32.xlu1 %v2350_v50, %s3427_s17 }
 0xda0   :  { %v1939_v47 = vmul.f32 %v3334_v49, %v1938_v61 }
 0xda2   :  { %v1940_v3 = vadd.f32 %v3334_v49, %v1939_v47 }
 0xda4   :  { %v1944_v53 = vsel %vm1943_vm2, %v3334_v49, %v1940_v3  ;;  %v1869_v49 = vpop.xlane.xlu2 %1868 }
 0xda5   :  { %v1949_v0 = vsel %vm1946_vm3, %v1948_v41, %v1944_v53  ;;  %v1875_v29 = vsub.f32 %v4567_v8, %v1869_v49 }
 0xda6   :  { %v1950_v34 = vmul.f32 %v4574_v39, %v1949_v0  ;;  %v3049_v39 = vld [vmem:[%s4866_s6 + $0x38] sm:$0xff] }
 0xda7   :  { %2430 = vmatpush.msra.mxu3 %v3049_v39  ;;  %v1886_v53 = vmul.f32 1.442695, %v1875_v29 }
 0xda8   :  { %3024 = vmatmul.msk.f32.gmra.mxu2 %vm54_vm0, %v1950_v34 }
 0xda9   :  { %2431 = vmatpush.msra.mxu3 %v3048_v60 }
 0xdab   :  { %2432 = vmatpush.msra.mxu3 %v3047_v36 }
 0xdad   :  { %2433 = vmatpush.msra.mxu3 %v3046_v18 }
 0xdb0   :  { %3025 = vmatmul.msk.f32.gmra.mxu2 %vm54_vm0, %v1965_v51 }
 0xdb9   :  { %v2144_v56 = vpop.f32.mrf.mxu1 }
 0xdba   :  { %v2145_v11 = vadd.f32 %v4554_v21, %v2144_v56 }
 0xdc4   :  { %v2353_v32 = vpop.f32.mrf.mxu0 }
 0xdc5   :  { %2375 = vrot.lane.b32.xlu0 %v2353_v32, %s3427_s17 }
 0xde7   :  { %v2356_v48 = vpop.f32.mrf.mxu0 }
 0xde8   :  { %2377 = vrot.lane.b32.xlu1 %v2356_v48, %s3427_s17 }
 0xde9   :  { %v2147_v26 = vpop.f32.mrf.mxu1 }
 0xdea   :  { %v2148_v31 = vadd.f32 %v4564_v63, %v2147_v26  ;;  %v2162_v63 = vsel %vm54_vm0, %v2145_v11, -inf }
 0xdec   :  { %v2165_v45 = vsel %vm54_vm0, %v2148_v31, -inf }
 0xdef   :  { %2166 = vmax.xlane.f32.xlu0 %v2165_v45 }
 0xdfa   :  { %v2049_v12 = vpop.f32.mrf.mxu2 }
 0xe02   :  { %v2052_v46 = vpop.f32.mrf.mxu2 }
 0xe09   :  { %v2372_v24 = vpop.permute.xlu1 %2371 }
 0xe0a   :  { %v2389_v58 = vsel %vm495_vm11, %v2049_v12, %v2372_v24 }
 0xe0b   :  { %3050 = vmatmul.msk.f32.vlgmr.msra.gmra.mxu3 %vm110_vm1, %v2389_v58 }
 0xe11   :  { %v2374_v20 = vpop.permute.xlu1 %2373 }
 0xe12   :  { %2163 = vmax.xlane.f32.xlu1 %v2162_v63  ;;  %v2390_v27 = vsel %vm495_vm11, %v2052_v46, %v2374_v20 }
 0xe13   :  { %3051 = vmatmul.msk.f32.gmra.mxu3 %vm110_vm1, %v2390_v27 }
 0xe1a   :  { %1901 = vadd.xlane.f32.xlu1 %v1900_v17 }
 0xe2b   :  { %v2055_v38 = vpop.f32.mrf.mxu2 }
 0xe33   :  { %v2058_v21 = vpop.f32.mrf.mxu2 }
 0xe37   :  { %v2376_v54 = vpop.permute.xlu0 %2375 }
 0xe38   :  { %v2391_v6 = vsel %vm495_vm11, %v2055_v38, %v2376_v54 }
 0xe39   :  { %3052 = vmatmul.msk.f32.gmra.mxu3 %vm110_vm1, %v2391_v6 }
 0xe5a   :  { %v2378_v57 = vpop.permute.xlu1 %2377 }
 0xe5b   :  { %v2392_v16 = vsel %vm495_vm11, %v2058_v21, %v2378_v57 }
 0xe5c   :  { %3053 = vmatmul.msk.f32.gmra.mxu3 %vm110_vm1, %v2392_v16 }
 0xe62   :  { %v2167_v25 = vpop.xlane.xlu0 %2166 }
 0xe63   :  { %v2173_v59 = vsub.f32 %v2148_v31, %v2167_v25 }
 0xe65   :  { %v2184_v4 = vmul.f32 1.442695, %v2173_v59 }
 0xe85   :  { %v2164_v44 = vpop.xlane.xlu1 %2163 }
 0xe86   :  { %v2172_v35 = vsub.f32 %v2145_v11, %v2164_v44 }
 0xe88   :  { %v2182_v52 = vmul.f32 1.442695, %v2172_v35 }
 0xe8a   :  { %3337 = vpow2.f32 %v2182_v52 }
 0xe8d   :  { %v1902_v7 = vpop.xlane.xlu1 %1901 }
 0xe8e   :  { %3339 = vrcp.f32 %v1902_v7  ;;  %v2435_v61 = vpop.f32.mrf.mxu3  ;;  %v1977_v8 = vand.u32 2147483648, %v1902_v7  ;;  %v1975_v43 = vand.u32 2147483647, %v1902_v7  ;;  %vm1971_vm9 = vweird.f32 %v1902_v7 }
 0xe8f   :  { %v2453_v50 = vadd.f32 %v2435_v61, %v4277_v5  ;;  %3341 = vpow2.f32 %v2184_v4 }
 0xe90   :  { %v4637_v30 = vpop.eup %3337  ;;  %3343 = vpow2.f32 %v1886_v53  ;;  %v1978_v1 = vor.u32 1.1754944e-38, %v1977_v8  ;;  %vm1976_vm12 = vcmp.eq.f32.partialorder %v1975_v43, 8.507059e+37 }
 0xe91   :  { %v4641_v47 = vadd.f32 %v4634_v33, %v2453_v50  ;;  %v2198_v22 = vsel %vm54_vm0, %v4637_v30, 0.0 }
 0xe92   :  { %2199 = vadd.xlane.f32.xlu2 %v2198_v22 }
 0xe93   :  { %v2469_v3 = vsel %vm110_vm1, %v4641_v47, 0.0 }
 0xe94   :  { %v3340_v41 = vpop.eup %3339  ;;  %2470 = vadd.xlane.f32.xlu1 %v2469_v3 }
 0xe95   :  { %v1967_v55 = vmul.f32 %v3340_v41, %v1902_v7  ;;  %v4647_v5 = vpop.eup %3341  ;;  %vm1972_vm8 = vweird.f32 %v3340_v41 }
 0xe96   :  { %v2201_v34 = vsel %vm54_vm0, %v4647_v5, 0.0  ;;  %vm1973_vm10 = vmor %vm1971_vm9, %vm1972_vm8  ;;  %v4651_v51 = vpop.eup %3343  ;;  %v2438_v32 = vpop.f32.mrf.mxu3 }
 0xe97   :  { %v1968_v10 = vsub.f32 1.0, %v1967_v55  ;;  %v2454_v60 = vadd.f32 %v2438_v32, %v4282_v23  ;;  %v1903_v36 = vsel %vm54_vm0, %v4651_v51, 0.0 }
 0xe99   :  { %v1969_v0 = vmul.f32 %v3340_v41, %v1968_v10  ;;  %v2462_v48 = vadd.f32 %v4634_v33, %v2454_v60 }
 0xe9a   :  { %2202 = vadd.xlane.f32.xlu2 %v2201_v34 }
 0xe9b   :  { %v1970_v13 = vadd.f32 %v3340_v41, %v1969_v0  ;;  %v2472_v26 = vsel %vm110_vm1, %v2462_v48, 0.0 }
 0xe9d   :  { %v1974_v2 = vsel %vm1973_vm10, %v3340_v41, %v1970_v13 }
 0xe9e   :  { %v1979_v56 = vsel %vm1976_vm12, %v1978_v1, %v1974_v2 }
 0xe9f   :  { %v1980_v39 = vmul.f32 %v3336_v19, %v1979_v56 }
 0xea1   :  { %3026 = vmatmul.msk.f32.gmra.mxu2 %vm54_vm0, %v1980_v39 }
 0xea2   :  { %1904 = vadd.xlane.f32.xlu2 %v1903_v36 }
 0xeaa   :  { %2473 = vadd.xlane.f32.xlu2 %v2472_v26 }
 0xebc   :  { %v2441_v18 = vpop.f32.mrf.mxu3 }
 0xebd   :  { %v2455_v31 = vadd.f32 %v2441_v18, %v4287_v28 }
 0xebf   :  { %v4661_v45 = vadd.f32 %v4634_v33, %v2455_v31 }
 0xec1   :  { %v2475_v23 = vsel %vm110_vm1, %v4661_v45, 0.0 }
 0xec2   :  { %2476 = vadd.xlane.f32.xlu0 %v2475_v23 }
 0xedf   :  { %v2444_v9 = vpop.f32.mrf.mxu3 }
 0xee0   :  { %v2456_v12 = vadd.f32 %v2444_v9, %v4292_v62 }
 0xee2   :  { %v4667_v15 = vadd.f32 %v4634_v33, %v2456_v12 }
 0xee4   :  { %v2478_v24 = vsel %vm110_vm1, %v4667_v15, 0.0 }
 0xee5   :  { %2479 = vadd.xlane.f32.xlu1 %v2478_v24  ;;  %v3058_v24 = vld [vmem:[%s4867_s7 + $0x30] sm:$0xff] }
 0xf05   :  { %v2200_v58 = vpop.xlane.xlu2 %2199 }
 0xf06   :  { %3345 = vrcp.f32 %v2200_v58  ;;  %v2275_v17 = vand.u32 2147483648, %v2200_v58  ;;  %v2273_v54 = vand.u32 2147483647, %v2200_v58  ;;  %vm2269_vm14 = vweird.f32 %v2200_v58 }
 0xf07   :  { %v2471_v28 = vpop.xlane.xlu1 %2470 }
 0xf08   :  { %v2487_v40 = vmul.f32 %v2471_v28, %v3550_v42  ;;  %v2276_v57 = vor.u32 1.1754944e-38, %v2275_v17  ;;  %vm2274_vm2 = vcmp.eq.f32.partialorder %v2273_v54, 8.507059e+37  ;;  %v3056_v28 = vld [vmem:[%s4867_s7 + $0x20] sm:$0xff] }
 0xf0a   :  { %v4673_v11 = vsub.f32 %v4641_v47, %v2487_v40 }
 0xf0c   :  { %v3346_v46 = vpop.eup %3345  ;;  %v2499_v20 = vmul.f32 %v4673_v11, %v4673_v11 }
 0xf0d   :  { %v2265_v62 = vmul.f32 %v3346_v46, %v2200_v58  ;;  %v2203_v63 = vpop.xlane.xlu2 %2202  ;;  %vm2270_vm13 = vweird.f32 %v3346_v46  ;;  %v3057_v58 = vld [vmem:[%s4867_s7 + $0x28] sm:$0xff] }
 0xf0e   :  { %3347 = vrcp.f32 %v2203_v63  ;;  %v2505_v27 = vsel %vm110_vm1, %v2499_v20, 0.0  ;;  %vm2271_vm15 = vmor %vm2269_vm14, %vm2270_vm13  ;;  %v2290_v4 = vand.u32 2147483648, %v2203_v63  ;;  %v2288_v7 = vand.u32 2147483647, %v2203_v63 }
 0xf0f   :  { %v2266_v19 = vsub.f32 1.0, %v2265_v62  ;;  %2506 = vadd.xlane.f32.xlu2 %v2505_v27  ;;  %vm2284_vm4 = vweird.f32 %v2203_v63 }
 0xf10   :  { %v2291_v29 = vor.u32 1.1754944e-38, %v2290_v4  ;;  %vm2289_vm6 = vcmp.eq.f32.partialorder %v2288_v7, 8.507059e+37 }
 0xf11   :  { %v2267_v38 = vmul.f32 %v3346_v46, %v2266_v19 }
 0xf13   :  { %v2268_v6 = vadd.f32 %v3346_v46, %v2267_v38 }
 0xf14   :  { %v3348_v21 = vpop.eup %3347 }
 0xf15   :  { %v2280_v16 = vmul.f32 %v3348_v21, %v2203_v63  ;;  %v1905_v25 = vpop.xlane.xlu2 %1904  ;;  %v2272_v44 = vsel %vm2271_vm15, %v3346_v46, %v2268_v6  ;;  %vm2285_vm3 = vweird.f32 %v3348_v21  ;;  %v4720_v6 = vld [vmem:[%s4863_s3 + $0x10] ss:$0 sm:$0xff] }
 0xf16   :  { %3349 = vrcp.f32 %v1905_v25  ;;  %v2277_v35 = vsel %vm2274_vm2, %v2276_v57, %v2272_v44  ;;  %vm2286_vm5 = vmor %vm2284_vm4, %vm2285_vm3  ;;  %v1992_v8 = vand.u32 2147483648, %v1905_v25  ;;  %v1990_v43 = vand.u32 2147483647, %v1905_v25  ;;  %v4728_v44 = vld [vmem:[%s4863_s3 + $0x11] ss:$0 sm:$0xff] }
 0xf17   :  { %v2281_v59 = vsub.f32 1.0, %v2280_v16  ;;  %v2278_v52 = vmul.f32 %v4637_v30, %v2277_v35  ;;  %vm1986_vm8 = vweird.f32 %v1905_v25 }
 0xf18   :  { %v1993_v2 = vor.u32 1.1754944e-38, %v1992_v8  ;;  %vm1991_vm10 = vcmp.eq.f32.partialorder %v1990_v43, 8.507059e+37 }
 0xf19   :  { %v2282_v49 = vmul.f32 %v3348_v21, %v2281_v59  ;;  %3044 = vmatmul.msk.f32.gmra.mxu0 %vm54_vm0, %v2278_v52 }
 0xf1b   :  { %v2283_v61 = vadd.f32 %v3348_v21, %v2282_v49 }
 0xf1c   :  { %v3350_v50 = vpop.eup %3349 }
 0xf1d   :  { %v1982_v22 = vmul.f32 %v3350_v50, %v1905_v25  ;;  %v2474_v3 = vpop.xlane.xlu2 %2473  ;;  %v2287_v41 = vsel %vm2286_vm5, %v3348_v21, %v2283_v61  ;;  %vm1987_vm7 = vweird.f32 %v3350_v50 }
 0xf1e   :  { %v2488_v53 = vmul.f32 %v2474_v3, %v3550_v42  ;;  %v2292_v55 = vsel %vm2289_vm6, %v2291_v29, %v2287_v41  ;;  %vm1988_vm9 = vmor %vm1986_vm8, %vm1987_vm7 }
 0xf1f   :  { %v1983_v10 = vsub.f32 1.0, %v1982_v22  ;;  %v2293_v30 = vmul.f32 %v4647_v5, %v2292_v55 }
 0xf20   :  { %v4682_v0 = vsub.f32 %v2462_v48, %v2488_v53 }
 0xf21   :  { %v1984_v34 = vmul.f32 %v3350_v50, %v1983_v10  ;;  %3045 = vmatmul.msk.f32.gmra.mxu0 %vm54_vm0, %v2293_v30 }
 0xf22   :  { %v2500_v13 = vmul.f32 %v4682_v0, %v4682_v0 }
 0xf23   :  { %v1985_v1 = vadd.f32 %v3350_v50, %v1984_v34 }
 0xf24   :  { %v2508_v32 = vsel %vm110_vm1, %v2500_v13, 0.0 }
 0xf25   :  { %2509 = vadd.xlane.f32.xlu0 %v2508_v32  ;;  %v1989_v56 = vsel %vm1988_vm9, %v3350_v50, %v1985_v1 }
 0xf26   :  { %v1994_v5 = vsel %vm1991_vm10, %v1993_v2, %v1989_v56 }
 0xf27   :  { %v1995_v39 = vmul.f32 %v4651_v51, %v1994_v5 }
 0xf29   :  { %3027 = vmatmul.msk.f32.gmra.mxu2 %vm54_vm0, %v1995_v39 }
 0xf35   :  { %v2477_v60 = vpop.xlane.xlu0 %2476 }
 0xf36   :  { %v2489_v36 = vmul.f32 %v2477_v60, %v3550_v42 }
 0xf38   :  { %v4692_v48 = vsub.f32 %v4661_v45, %v2489_v36  ;;  %v3059_v45 = vld [vmem:[%s4867_s7 + $0x38] sm:$0xff] }
 0xf39   :  { %2652 = vmatpush.msrb.mxu2 %v3059_v45 }
 0xf3a   :  { %v2501_v26 = vmul.f32 %v4692_v48, %v4692_v48 }
 0xf3b   :  { %2653 = vmatpush.msrb.mxu2 %v3058_v24 }
 0xf3c   :  { %v2511_v18 = vsel %vm110_vm1, %v2501_v26, 0.0 }
 0xf3d   :  { %2512 = vadd.xlane.f32.xlu1 %v2511_v18  ;;  %2654 = vmatpush.msrb.mxu2 %v3057_v58 }
 0xf3f   :  { %2655 = vmatpush.msrb.mxu2 %v3056_v28  ;;  %v2061_v28 = vpop.f32.mrf.mxu2 }
 0xf58   :  { %v2480_v31 = vpop.xlane.xlu1 %2479 }
 0xf59   :  { %v2490_v23 = vmul.f32 %v2480_v31, %v3550_v42 }
 0xf5b   :  { %v4699_v9 = vsub.f32 %v4667_v15, %v2490_v23 }
 0xf5d   :  { %v2502_v51 = vmul.f32 %v4699_v9, %v4699_v9 }
 0xf5f   :  { %v2514_v12 = vsel %vm110_vm1, %v2502_v51, 0.0 }
 0xf60   :  { %2515 = vadd.xlane.f32.xlu2 %v2514_v12 }
 0xf82   :  { %v2507_v40 = vpop.xlane.xlu2 %2506 }
 0xf83   :  { %v2523_v46 = vmul.f32 %v2507_v40, %v3550_v42 }
 0xf85   :  { %v2529_v20 = vadd.f32 1e-05, %v2523_v46  ;;  %v3087_v46 = vld [vmem:[%s4868_s8 + $0xf8] sm:$0xff] }
 0xf86   :  { %2818 = vmatpush.msra.mxu1 %v3087_v46 }
 0xf87   :  { %3351 = vrsqrt.f32 %v2529_v20  ;;  %vm2541_vm12 = vweird.f32 %v2529_v20 }
 0xf8d   :  { %v3352_v62 = vpop.eup %3351 }
 0xf8e   :  { %v2536_v63 = vmul.f32 %v3352_v62, %v2529_v20  ;;  %vm2542_vm0 = vweird.f32 %v3352_v62 }
 0xf8f   :  { %vm2543_vm13 = vmor %vm2541_vm12, %vm2542_vm0 }
 0xf90   :  { %v2537_v27 = vmul.f32 %v3352_v62, %v2536_v63  ;;  %v3084_v63 = vld [vmem:[%s4868_s8 + $0xe0] sm:$0xff] }
 0xf92   :  { %v2538_v19 = vmul.f32 0.5, %v2537_v27 }
 0xf94   :  { %v2539_v17 = vsub.f32 1.5, %v2538_v19 }
 0xf96   :  { %v2540_v38 = vmul.f32 %v3352_v62, %v2539_v17  ;;  %v2359_v54 = vpop.f32.mrf.mxu0  ;;  %v3083_v17 = vld [vmem:[%s4868_s8 + $0xd8] sm:$0xff] }
 0xf97   :  { %2379 = vrot.lane.b32.xlu0 %v2359_v54, %s3427_s17  ;;  %v3082_v54 = vld [vmem:[%s4868_s8 + $0xd0] sm:$0xff] }
 0xf98   :  { %v2544_v21 = vsel %vm2543_vm13, %v3352_v62, %v2540_v38  ;;  %v2510_v57 = vpop.xlane.xlu0 %2509  ;;  %v3085_v62 = vld [vmem:[%s4868_s8 + $0xe8] sm:$0xff] }
 0xf99   :  { %v2595_v16 = vmul.f32 %v2544_v21, %v4673_v11  ;;  %v2524_v25 = vmul.f32 %v2510_v57, %v3550_v42  ;;  %v3081_v21 = vld [vmem:[%s4868_s8 + $0xc8] sm:$0xff]  ;;  %v3080_v57 = vld [vmem:[%s4868_s8 + $0xc0] sm:$0xff] }
 0xf9b   :  { %v2602_v35 = vmul.f32 %v4720_v6, %v2595_v16  ;;  %v2530_v59 = vadd.f32 1e-05, %v2524_v25  ;;  %v3079_v16 = vld [vmem:[%s4868_s8 + $0xb8] sm:$0xff]  ;;  %v3078_v25 = vld [vmem:[%s4868_s8 + $0xb0] sm:$0xff] }
 0xf9d   :  { %3353 = vrsqrt.f32 %v2530_v59  ;;  %v2609_v52 = vadd.f32 %v4728_v44, %v2602_v35  ;;  %vm2551_vm15 = vweird.f32 %v2530_v59  ;;  %v3077_v35 = vld [vmem:[%s4868_s8 + $0xa8] sm:$0xff] }
 0xf9e   :  { %v2362_v4 = vpop.f32.mrf.mxu0 }
 0xf9f   :  { %2381 = vrot.lane.b32.xlu1 %v2362_v4, %s3427_s17  ;;  %3060 = vmatmul.msk.f32.vlgmr.msrb.gmra.mxu2 %vm110_vm1, %v2609_v52  ;;  %v3076_v52 = vld [vmem:[%s4868_s8 + $0xa0] sm:$0xff]  ;;  %v3075_v4 = vld [vmem:[%s4868_s8 + $0x98] sm:$0xff] }
 0xfa3   :  { %v3354_v49 = vpop.eup %3353 }
 0xfa4   :  { %v2546_v11 = vmul.f32 %v3354_v49, %v2530_v59  ;;  %vm2552_vm14 = vweird.f32 %v3354_v49  ;;  %v4788_v59 = vld [vmem:[%s4863_s3 + $0x12] ss:$0 sm:$0xff] }
 0xfa5   :  { %vm2553_vm2 = vmor %vm2551_vm15, %vm2552_vm14 }
 0xfa6   :  { %v2547_v7 = vmul.f32 %v3354_v49, %v2546_v11 }
 0xfa8   :  { %v2548_v61 = vmul.f32 0.5, %v2547_v7  ;;  %v3074_v7 = vld [vmem:[%s4868_s8 + $0x90] sm:$0xff] }
 0xfaa   :  { %v2549_v50 = vsub.f32 1.5, %v2548_v61 }
 0xfac   :  { %v2550_v29 = vmul.f32 %v3354_v49, %v2549_v50  ;;  %v2064_v27 = vpop.f32.mrf.mxu2  ;;  %v3073_v50 = vld [vmem:[%s4868_s8 + $0x88] sm:$0xff] }
 0xfae   :  { %v2554_v22 = vsel %vm2553_vm2, %v3354_v49, %v2550_v29 }
 0xfaf   :  { %v2596_v3 = vmul.f32 %v2554_v22, %v4682_v0  ;;  %v3072_v22 = vld [vmem:[%s4868_s8 + $0x80] sm:$0xff] }
 0xfb0   :  { %v2513_v41 = vpop.xlane.xlu1 %2512 }
 0xfb1   :  { %v2603_v53 = vmul.f32 %v4720_v6, %v2596_v3  ;;  %v2525_v55 = vmul.f32 %v2513_v41, %v3550_v42 }
 0xfb3   :  { %v2610_v10 = vadd.f32 %v4728_v44, %v2603_v53  ;;  %v2531_v30 = vadd.f32 1e-05, %v2525_v55 }
 0xfb5   :  { %3061 = vmatmul.msk.f32.gmra.mxu2 %vm110_vm1, %v2610_v10  ;;  %3355 = vrsqrt.f32 %v2531_v30  ;;  %vm2561_vm4 = vweird.f32 %v2531_v30 }
 0xfbb   :  { %v3356_v8 = vpop.eup %3355 }
 0xfbc   :  { %v2556_v34 = vmul.f32 %v3356_v8, %v2531_v30  ;;  %vm2562_vm3 = vweird.f32 %v3356_v8 }
 0xfbd   :  { %vm2563_vm5 = vmor %vm2561_vm4, %vm2562_vm3 }
 0xfbe   :  { %v2557_v43 = vmul.f32 %v3356_v8, %v2556_v34 }
 0xfc0   :  { %v2558_v13 = vmul.f32 0.5, %v2557_v43 }
 0xfc2   :  { %v2559_v1 = vsub.f32 1.5, %v2558_v13 }
 0xfc4   :  { %v2560_v2 = vmul.f32 %v3356_v8, %v2559_v1 }
 0xfc6   :  { %v2564_v0 = vsel %vm2563_vm5, %v3356_v8, %v2560_v2 }
 0xfc7   :  { %v2597_v32 = vmul.f32 %v2564_v0, %v4692_v48 }
 0xfc9   :  { %v2604_v56 = vmul.f32 %v4720_v6, %v2597_v32 }
 0xfcb   :  { %v2611_v5 = vadd.f32 %v4728_v44, %v2604_v56 }
 0xfcd   :  { %3062 = vmatmul.msk.f32.gmra.mxu2 %vm110_vm1, %v2611_v5 }
 0xfd3   :  { %v2516_v39 = vpop.xlane.xlu2 %2515 }
 0xfd4   :  { %v2526_v60 = vmul.f32 %v2516_v39, %v3550_v42 }
 0xfd6   :  { %v2532_v36 = vadd.f32 1e-05, %v2526_v60 }
 0xfd8   :  { %3357 = vrsqrt.f32 %v2532_v36  ;;  %vm2571_vm7 = vweird.f32 %v2532_v36 }
 0xfde   :  { %v3358_v26 = vpop.eup %3357 }
 0xfdf   :  { %v2566_v18 = vmul.f32 %v3358_v26, %v2532_v36  ;;  %vm2572_vm6 = vweird.f32 %v3358_v26 }
 0xfe0   :  { %vm2573_vm8 = vmor %vm2571_vm7, %vm2572_vm6 }
 0xfe1   :  { %v2567_v31 = vmul.f32 %v3358_v26, %v2566_v18 }
 0xfe3   :  { %v2568_v23 = vmul.f32 0.5, %v2567_v31 }
 0xfe5   :  { %v2569_v51 = vsub.f32 1.5, %v2568_v23 }
 0xfe7   :  { %v2570_v12 = vmul.f32 %v3358_v26, %v2569_v51 }
 0xfe9   :  { %v2574_v48 = vsel %vm2573_vm8, %v3358_v26, %v2570_v12 }
 0xfea   :  { %v2598_v45 = vmul.f32 %v2574_v48, %v4699_v9  ;;  %v3086_v9 = vld [vmem:[%s4868_s8 + $0xf0] sm:$0xff] }
 0xfeb   :  { %2819 = vmatpush.msra.mxu1 %v3086_v9 }
 0xfec   :  { %v2605_v24 = vmul.f32 %v4720_v6, %v2598_v45 }
 0xfed   :  { %2820 = vmatpush.msra.mxu1 %v3085_v62 }
 0xfee   :  { %v2612_v58 = vadd.f32 %v4728_v44, %v2605_v24 }
 0xfef   :  { %2821 = vmatpush.msra.mxu1 %v3084_v63 }
 0xff0   :  { %3063 = vmatmul.msk.f32.gmra.mxu2 %vm110_vm1, %v2612_v58 }
 0xff1   :  { %2822 = vmatpush.msra.mxu1 %v3083_v17 }
 0xff3   :  { %2823 = vmatpush.msra.mxu1 %v3082_v54 }
 0xff5   :  { %2824 = vmatpush.msra.mxu1 %v3081_v21 }
 0xff7   :  { %2825 = vmatpush.msra.mxu1 %v3080_v57 }
 0xff9   :  { %2826 = vmatpush.msra.mxu1 %v3079_v16 }
 0xffb   :  { %2827 = vmatpush.msra.mxu1 %v3078_v25 }
 0xffd   :  { %2828 = vmatpush.msra.mxu1 %v3077_v35 }
 0xfff   :  { %2829 = vmatpush.msra.mxu1 %v3076_v52 }
0x1001   :  { %2830 = vmatpush.msra.mxu1 %v3075_v4 }
0x1003   :  { %2831 = vmatpush.msra.mxu1 %v3074_v7 }
0x1005   :  { %2832 = vmatpush.msra.mxu1 %v3073_v50 }
0x1007   :  { %2833 = vmatpush.msra.mxu1 %v3072_v22 }
0x1009   :  { %v2380_v40 = vpop.permute.xlu0 %2379 }
0x100a   :  { %v2393_v20 = vsel %vm495_vm11, %v2061_v28, %v2380_v40 }
0x100b   :  { %3054 = vmatmul.msk.f32.gmra.mxu3 %vm110_vm1, %v2393_v20 }
0x1011   :  { %v2382_v19 = vpop.permute.xlu1 %2381 }
0x1012   :  { %v2394_v38 = vsel %vm495_vm11, %v2064_v27, %v2382_v19 }
0x1013   :  { %3055 = vmatmul.msk.f32.gmra.mxu3 %vm110_vm1, %v2394_v38 }
0x1022   :  { %v2657_v49 = vpop.f32.mrf.mxu2 }
0x1023   :  { %v2658_v11 = vadd.f32 %v4788_v59, %v2657_v49 }
0x1025   :  { %v3066_v61 = vmul.f32 -1.702, %v2658_v11 }
0x1027   :  { %v2687_v29 = vmul.f32 1.442695, %v3066_v61 }
0x1029   :  { %3359 = vpow2.f32 %v2687_v29 }
0x102f   :  { %v3360_v3 = vpop.eup %3359 }
0x1030   :  { %v2699_v41 = vadd.f32 1.0, %v3360_v3 }
0x1032   :  { %3361 = vrcp.f32 %v2699_v41  ;;  %v2716_v43 = vand.u32 2147483648, %v2699_v41  ;;  %v2714_v1 = vand.u32 2147483647, %v2699_v41  ;;  %vm2710_vm9 = vweird.f32 %v2699_v41 }
0x1034   :  { %v2717_v32 = vor.u32 1.1754944e-38, %v2716_v43  ;;  %vm2715_vm0 = vcmp.eq.f32.partialorder %v2714_v1, 8.507059e+37 }
0x1038   :  { %v3362_v53 = vpop.eup %3361  ;;  %v2660_v55 = vpop.f32.mrf.mxu2 }
0x1039   :  { %v2706_v10 = vmul.f32 %v3362_v53, %v2699_v41  ;;  %v2661_v30 = vadd.f32 %v4788_v59, %v2660_v55  ;;  %vm2711_vm11 = vweird.f32 %v3362_v53 }
0x103a   :  { %vm2712_vm10 = vmor %vm2710_vm9, %vm2711_vm11  ;;  %vm2858_vm9 = vcmask 1040384  }
0x103b   :  { %v2707_v8 = vsub.f32 1.0, %v2706_v10  ;;  %v3067_v34 = vmul.f32 -1.702, %v2661_v30 }
0x103d   :  { %v2708_v13 = vmul.f32 %v3362_v53, %v2707_v8  ;;  %v2689_v2 = vmul.f32 1.442695, %v3067_v34 }
0x103f   :  { %v2709_v0 = vadd.f32 %v3362_v53, %v2708_v13  ;;  %3363 = vpow2.f32 %v2689_v2 }
0x1041   :  { %v2713_v56 = vsel %vm2712_vm10, %v3362_v53, %v2709_v0  ;;  %vm2862_vm10 = vcmask 254976  }
0x1042   :  { %v2718_v5 = vsel %vm2715_vm0, %v2717_v32, %v2713_v56 }
0x1043   :  { %v2795_v39 = vmul.f32 %v2718_v5, %v2658_v11 }
0x1045   :  { %v3364_v60 = vpop.eup %3363  ;;  %2834 = vmatmul.f32.vlgmr.msra.gmra.mxu1 %v2795_v39 }
0x1046   :  { %v2700_v36 = vadd.f32 1.0, %v3364_v60 }
0x1048   :  { %3365 = vrcp.f32 %v2700_v36  ;;  %v2731_v12 = vand.u32 2147483648, %v2700_v36  ;;  %v2729_v45 = vand.u32 2147483647, %v2700_v36  ;;  %vm2725_vm13 = vweird.f32 %v2700_v36 }
0x104a   :  { %v2732_v40 = vor.u32 1.1754944e-38, %v2731_v12  ;;  %vm2730_vm15 = vcmp.eq.f32.partialorder %v2729_v45, 8.507059e+37 }
0x104e   :  { %v3366_v26 = vpop.eup %3365 }
0x104f   :  { %v2721_v18 = vmul.f32 %v3366_v26, %v2700_v36  ;;  %vm2726_vm12 = vweird.f32 %v3366_v26 }
0x1050   :  { %v2663_v31 = vpop.f32.mrf.mxu2  ;;  %vm2727_vm14 = vmor %vm2725_vm13, %vm2726_vm12 }
0x1051   :  { %v2722_v23 = vsub.f32 1.0, %v2721_v18  ;;  %v2664_v51 = vadd.f32 %v4788_v59, %v2663_v31 }
0x1053   :  { %v2723_v48 = vmul.f32 %v3366_v26, %v2722_v23  ;;  %v3068_v24 = vmul.f32 -1.702, %v2664_v51 }
0x1055   :  { %v2724_v58 = vadd.f32 %v3366_v26, %v2723_v48  ;;  %v2691_v28 = vmul.f32 1.442695, %v3068_v24  ;;  %v3178_v24 = vld [vmem:[%s4863_s3 + $0x13] ss:$0 sm:$0xff] }
0x1057   :  { %v2728_v46 = vsel %vm2727_vm14, %v3366_v26, %v2724_v58  ;;  %3367 = vpow2.f32 %v2691_v28 }
0x1058   :  { %v2733_v20 = vsel %vm2730_vm15, %v2732_v40, %v2728_v46 }
0x1059   :  { %v2796_v9 = vmul.f32 %v2733_v20, %v2661_v30 }
0x105b   :  { %2837 = vmatmul.f32.gmra.mxu1 %v2796_v9 }
0x105d   :  { %v3368_v62 = vpop.eup %3367 }
0x105e   :  { %v2701_v63 = vadd.f32 1.0, %v3368_v62 }
0x1060   :  { %3369 = vrcp.f32 %v2701_v63  ;;  %v2746_v38 = vand.u32 2147483648, %v2701_v63  ;;  %v2744_v21 = vand.u32 2147483647, %v2701_v63  ;;  %vm2740_vm3 = vweird.f32 %v2701_v63 }
0x1062   :  { %v2747_v16 = vor.u32 1.1754944e-38, %v2746_v38  ;;  %vm2745_vm5 = vcmp.eq.f32.partialorder %v2744_v21, 8.507059e+37 }
0x1066   :  { %v3370_v27 = vpop.eup %3369 }
0x1067   :  { %v2736_v19 = vmul.f32 %v3370_v27, %v2701_v63  ;;  %vm2741_vm2 = vweird.f32 %v3370_v27 }
0x1068   :  { %vm2742_vm4 = vmor %vm2740_vm3, %vm2741_vm2 }
0x1069   :  { %v2737_v17 = vsub.f32 1.0, %v2736_v19 }
0x106b   :  { %v2738_v54 = vmul.f32 %v3370_v27, %v2737_v17 }
0x106d   :  { %v2739_v57 = vadd.f32 %v3370_v27, %v2738_v54 }
0x106f   :  { %v2743_v25 = vsel %vm2742_vm4, %v3370_v27, %v2739_v57 }
0x1070   :  { %v2748_v35 = vsel %vm2745_vm5, %v2747_v16, %v2743_v25 }
0x1071   :  { %v2797_v52 = vmul.f32 %v2748_v35, %v2664_v51 }
0x1073   :  { %v2666_v4 = vpop.f32.mrf.mxu2  ;;  %2839 = vmatmul.f32.gmra.mxu1 %v2797_v52 }
0x1074   :  { %v2667_v49 = vadd.f32 %v4788_v59, %v2666_v4 }
0x1076   :  { %v3069_v11 = vmul.f32 -1.702, %v2667_v49 }
0x1078   :  { %v2693_v7 = vmul.f32 1.442695, %v3069_v11 }
0x107a   :  { %3371 = vpow2.f32 %v2693_v7 }
0x1080   :  { %v3372_v61 = vpop.eup %3371 }
0x1081   :  { %v2702_v50 = vadd.f32 1.0, %v3372_v61 }
0x1083   :  { %3373 = vrcp.f32 %v2702_v50  ;;  %v2761_v41 = vand.u32 2147483648, %v2702_v50  ;;  %v2759_v55 = vand.u32 2147483647, %v2702_v50  ;;  %vm2755_vm7 = vweird.f32 %v2702_v50 }
0x1085   :  { %v2762_v34 = vor.u32 1.1754944e-38, %v2761_v41  ;;  %vm2760_vm11 = vcmp.eq.f32.partialorder %v2759_v55, 8.507059e+37 }
0x1089   :  { %v3374_v29 = vpop.eup %3373 }
0x108a   :  { %v2751_v22 = vmul.f32 %v3374_v29, %v2702_v50  ;;  %vm2756_vm6 = vweird.f32 %v3374_v29 }
0x108b   :  { %vm2757_vm8 = vmor %vm2755_vm7, %vm2756_vm6 }
0x108c   :  { %v2752_v3 = vsub.f32 1.0, %v2751_v22 }
0x108e   :  { %v2753_v53 = vmul.f32 %v3374_v29, %v2752_v3  ;;  %v2447_v10 = vpop.f32.mrf.mxu3 }
0x108f   :  { %v2457_v30 = vadd.f32 %v2447_v10, %v4297_v14 }
0x1090   :  { %v2754_v8 = vadd.f32 %v3374_v29, %v2753_v53 }
0x1091   :  { %v2465_v43 = vadd.f32 %v4634_v33, %v2457_v30 }
0x1092   :  { %v2758_v13 = vsel %vm2757_vm8, %v3374_v29, %v2754_v8 }
0x1093   :  { %v2763_v1 = vsel %vm2760_vm11, %v2762_v34, %v2758_v13  ;;  %v2481_v2 = vsel %vm110_vm1, %v2465_v43, 0.0 }
0x1094   :  { %v2798_v0 = vmul.f32 %v2763_v1, %v2667_v49  ;;  %2482 = vadd.xlane.f32.xlu2 %v2481_v2  ;;  %v2892_v1 = vld [vmem:[%s4869_s9 + $0x18] sm:$0xff]  ;;  %v2891_v2 = vld [vmem:[%s4869_s9 + $0x10] sm:$0xff] }
0x1095   :  { %2908 = vmatpush.msra.mxu0 %v2892_v1 }
0x1096   :  { %v2450_v32 = vpop.f32.mrf.mxu3  ;;  %2841 = vmatmul.f32.gmra.mxu1 %v2798_v0  ;;  %v2890_v0 = vld [vmem:[%s4869_s9 + $0x8] sm:$0xff] }
0x1097   :  { %v2458_v56 = vadd.f32 %v2450_v32, %v4302_v37  ;;  %2909 = vmatpush.msra.mxu0 %v2891_v2 }
0x1099   :  { %v2466_v5 = vadd.f32 %v4634_v33, %v2458_v56  ;;  %2910 = vmatpush.msra.mxu0 %v2890_v0 }
0x109b   :  { %v2484_v14 = vsel %vm110_vm1, %v2466_v5, 0.0 }
0x109c   :  { %2485 = vadd.xlane.f32.xlu2 %v2484_v14 }
0x10c2   :  { %v2835_v39 = vpop.f32.mrf.mxu1 }
0x10c3   :  { %v2849_v33 = vadd.f32 %v2835_v39, %v4641_v47 }
0x10c5   :  { %v2853_v20 = vadd.f32 %v3178_v24, %v2849_v33 }
0x10d8   :  { %v2838_v60 = vpop.f32.mrf.mxu1 }
0x10f0   :  { %v2840_v36 = vpop.f32.mrf.mxu1 }
0x1107   :  { %v2483_v26 = vpop.xlane.xlu2 %2482 }
0x1108   :  { %v2491_v18 = vmul.f32 %v2483_v26, %v3550_v42 }
0x110a   :  { %v2497_v31 = vsub.f32 %v2465_v43, %v2491_v18  ;;  %v3179_v18 = vld [vmem:[%s4863_s3 + $0x2] ss:$0 sm:$0xff] }
0x110c   :  { %v2503_v23 = vmul.f32 %v2497_v31, %v2497_v31 }
0x110e   :  { %v2517_v51 = vsel %vm110_vm1, %v2503_v23, 0.0 }
0x110f   :  { %2518 = vadd.xlane.f32.xlu0 %v2517_v51  ;;  %v2486_v12 = vpop.xlane.xlu2 %2485 }
0x1110   :  { %v2492_v48 = vmul.f32 %v2486_v12, %v3550_v42 }
0x1112   :  { %v2498_v37 = vsub.f32 %v2466_v5, %v2492_v48 }
0x1113   :  { %v2842_v45 = vpop.f32.mrf.mxu1 }
0x1114   :  { %v2850_v58 = vadd.f32 %v2842_v45, %v4667_v15  ;;  %v2504_v28 = vmul.f32 %v2498_v37, %v2498_v37 }
0x1116   :  { %v2854_v40 = vadd.f32 %v3178_v24, %v2850_v58  ;;  %v2520_v46 = vsel %vm110_vm1, %v2504_v28, 0.0 }
0x1117   :  { %2521 = vadd.xlane.f32.xlu2 %v2520_v46 }
0x1118   :  { %v2856_v9 = vrot.slane %v2854_v40, 7 }
0x111a   :  { %v2859_v62 = vsel %vm2858_vm9, %v2853_v20, %v2856_v9 }
0x111b   :  { %v2863_v63 = vsel %vm2862_vm10, %v2859_v62, 0.0 }
0x111c   :  { %2864 = vadd.xlane.f32.xlu1 %v2863_v63 }
0x1182   :  { %v2519_v47 = vpop.xlane.xlu0 %2518 }
0x1183   :  { %v2527_v27 = vmul.f32 %v2519_v47, %v3550_v42 }
0x1185   :  { %v2533_v19 = vadd.f32 1e-05, %v2527_v27 }
0x1187   :  { %3375 = vrsqrt.f32 %v2533_v19  ;;  %vm2581_vm12 = vweird.f32 %v2533_v19 }
0x118a   :  { %v2522_v17 = vpop.xlane.xlu2 %2521 }
0x118b   :  { %v2528_v15 = vmul.f32 %v2522_v17, %v3550_v42 }
0x118d   :  { %v3376_v38 = vpop.eup %3375  ;;  %v2534_v54 = vadd.f32 1e-05, %v2528_v15 }
0x118e   :  { %v2576_v21 = vmul.f32 %v3376_v38, %v2533_v19  ;;  %vm2582_vm0 = vweird.f32 %v3376_v38 }
0x118f   :  { %3377 = vrsqrt.f32 %v2534_v54  ;;  %v2865_v57 = vpop.xlane.xlu1 %2864  ;;  %vm2583_vm13 = vmor %vm2581_vm12, %vm2582_vm0  ;;  %vm2591_vm15 = vweird.f32 %v2534_v54  ;;  %vm2916_vm12 = vcmask 123904  }
0x1190   :  { %v2577_v16 = vmul.f32 %v3376_v38, %v2576_v21  ;;  %v2866_v25 = vmul.f32 %v2865_v57, %v3550_v42 }
0x1192   :  { %v2578_v35 = vmul.f32 0.5, %v2577_v16  ;;  %v2867_v52 = vsub.f32 %v2859_v62, %v2866_v25 }
0x1194   :  { %v2579_v4 = vsub.f32 1.5, %v2578_v35  ;;  %v2868_v49 = vmul.f32 %v2867_v52, %v2867_v52 }
0x1195   :  { %v3378_v11 = vpop.eup %3377 }
0x1196   :  { %v2580_v7 = vmul.f32 %v3376_v38, %v2579_v4  ;;  %v2586_v61 = vmul.f32 %v3378_v11, %v2534_v54  ;;  %v2869_v50 = vsel %vm2862_vm10, %v2868_v49, 0.0  ;;  %vm2592_vm14 = vweird.f32 %v3378_v11 }
0x1197   :  { %2870 = vadd.xlane.f32.xlu2 %v2869_v50  ;;  %vm2593_vm2 = vmor %vm2591_vm15, %vm2592_vm14 }
0x1198   :  { %v2584_v29 = vsel %vm2583_vm13, %v3376_v38, %v2580_v7  ;;  %v2587_v22 = vmul.f32 %v3378_v11, %v2586_v61 }
0x1199   :  { %v2599_v3 = vmul.f32 %v2584_v29, %v2497_v31 }
0x119a   :  { %v2588_v41 = vmul.f32 0.5, %v2587_v22 }
0x119b   :  { %v2606_v53 = vmul.f32 %v4720_v6, %v2599_v3 }
0x119c   :  { %v2589_v55 = vsub.f32 1.5, %v2588_v41 }
0x119d   :  { %v2613_v10 = vadd.f32 %v4728_v44, %v2606_v53 }
0x119e   :  { %v2590_v30 = vmul.f32 %v3378_v11, %v2589_v55 }
0x119f   :  { %3064 = vmatmul.msk.f32.gmra.mxu2 %vm110_vm1, %v2613_v10 }
0x11a0   :  { %v2594_v8 = vsel %vm2593_vm2, %v3378_v11, %v2590_v30 }
0x11a1   :  { %v2600_v34 = vmul.f32 %v2594_v8, %v2498_v37 }
0x11a3   :  { %v2607_v43 = vmul.f32 %v4720_v6, %v2600_v34  ;;  %v2889_v6 = vld [vmem:[%s4869_s9] sm:$0xff] }
0x11a4   :  { %2911 = vmatpush.msra.mxu0 %v2889_v6 }
0x11a5   :  { %v2614_v13 = vadd.f32 %v4728_v44, %v2607_v43 }
0x11a7   :  { %3065 = vmatmul.msk.f32.gmra.mxu2 %vm110_vm1, %v2614_v13 }
0x120a   :  { %v2871_v44 = vpop.xlane.xlu2 %2870 }
0x120b   :  { %v2872_v32 = vmul.f32 %v2871_v44, %v3550_v42  ;;  %v3180_v42 = vld [vmem:[%s4863_s3 + $0x3] ss:$0 sm:$0xff]  ;;  %s3428_s3 = smov [#allocation2]  }
0x120c   :  { %s2923_s23 = sshll.u32 %s3428_s3, 4  ;;  %s2924_s23 = int_to_ptr.vmem [resolvable:$true] %s2923_s23 }
0x120d   :  { %v2873_v56 = vadd.f32 1e-05, %v2872_v32 }
0x120f   :  { %3379 = vrsqrt.f32 %v2873_v56  ;;  %vm2880_vm4 = vweird.f32 %v2873_v56 }
0x1215   :  { %v3380_v5 = vpop.eup %3379 }
0x1216   :  { %v2875_v14 = vmul.f32 %v3380_v5, %v2873_v56  ;;  %vm2881_vm3 = vweird.f32 %v3380_v5 }
0x1217   :  { %vm2882_vm5 = vmor %vm2880_vm4, %vm2881_vm3 }
0x1218   :  { %v2876_v39 = vmul.f32 %v3380_v5, %v2875_v14 }
0x121a   :  { %v2877_v60 = vmul.f32 0.5, %v2876_v39 }
0x121c   :  { %v2878_v36 = vsub.f32 1.5, %v2877_v60 }
0x121e   :  { %v2879_v26 = vmul.f32 %v3380_v5, %v2878_v36 }
0x1220   :  { %v2883_v31 = vsel %vm2882_vm5, %v3380_v5, %v2879_v26 }
0x1221   :  { %v2884_v23 = vmul.f32 %v2883_v31, %v2867_v52 }
0x1222   :  { %v2669_v51 = vpop.f32.mrf.mxu2 }
0x1223   :  { %v2886_v12 = vmul.f32 %v3179_v18, %v2884_v23  ;;  %v2670_v48 = vadd.f32 %v4788_v59, %v2669_v51 }
0x1225   :  { %v2888_v37 = vadd.f32 %v3180_v42, %v2886_v12  ;;  %v3070_v45 = vmul.f32 -1.702, %v2670_v48 }
0x1227   :  { %v2695_v33 = vmul.f32 1.442695, %v3070_v45  ;;  %3088 = vmatmul.msk.f32.vlgmr.msra.gmra.mxu0 %vm110_vm1, %v2888_v37 }
0x1229   :  { %3381 = vpow2.f32 %v2695_v33 }
0x122a   :  { %v2672_v24 = vpop.f32.mrf.mxu2 }
0x122b   :  { %v2673_v58 = vadd.f32 %v4788_v59, %v2672_v24 }
0x122d   :  { %v3071_v28 = vmul.f32 -1.702, %v2673_v58 }
0x122f   :  { %v3382_v40 = vpop.eup %3381  ;;  %v2697_v46 = vmul.f32 1.442695, %v3071_v28 }
0x1230   :  { %v2703_v20 = vadd.f32 1.0, %v3382_v40 }
0x1231   :  { %3383 = vpow2.f32 %v2697_v46 }
0x1232   :  { %3385 = vrcp.f32 %v2703_v20  ;;  %v2776_v19 = vand.u32 2147483648, %v2703_v20  ;;  %v2774_v15 = vand.u32 2147483647, %v2703_v20  ;;  %vm2770_vm1 = vweird.f32 %v2703_v20 }
0x1234   :  { %v2777_v59 = vor.u32 1.1754944e-38, %v2776_v19  ;;  %vm2775_vm8 = vcmp.eq.f32.partialorder %v2774_v15, 8.507059e+37 }
0x1237   :  { %v3384_v9 = vpop.eup %3383 }
0x1238   :  { %v3386_v62 = vpop.eup %3385  ;;  %v2704_v63 = vadd.f32 1.0, %v3384_v9 }
0x1239   :  { %v2766_v47 = vmul.f32 %v3386_v62, %v2703_v20  ;;  %vm2771_vm6 = vweird.f32 %v3386_v62 }
0x123a   :  { %3387 = vrcp.f32 %v2704_v63  ;;  %vm2772_vm7 = vmor %vm2770_vm1, %vm2771_vm6  ;;  %v2791_v52 = vand.u32 2147483648, %v2704_v63  ;;  %v2789_v49 = vand.u32 2147483647, %v2704_v63  ;;  %vm2785_vm9 = vweird.f32 %v2704_v63 }
0x123b   :  { %v2767_v27 = vsub.f32 1.0, %v2766_v47 }
0x123c   :  { %v2792_v7 = vor.u32 1.1754944e-38, %v2791_v52  ;;  %vm2790_vm0 = vcmp.eq.f32.partialorder %v2789_v49, 8.507059e+37 }
0x123d   :  { %v2768_v17 = vmul.f32 %v3386_v62, %v2767_v27 }
0x123f   :  { %v2769_v38 = vadd.f32 %v3386_v62, %v2768_v17 }
0x1240   :  { %v3388_v54 = vpop.eup %3387 }
0x1241   :  { %v2773_v21 = vsel %vm2772_vm7, %v3386_v62, %v2769_v38  ;;  %v2781_v57 = vmul.f32 %v3388_v54, %v2704_v63  ;;  %vm2786_vm11 = vweird.f32 %v3388_v54 }
0x1242   :  { %v2778_v16 = vsel %vm2775_vm8, %v2777_v59, %v2773_v21  ;;  %vm2787_vm10 = vmor %vm2785_vm9, %vm2786_vm11 }
0x1243   :  { %v2799_v25 = vmul.f32 %v2778_v16, %v2670_v48  ;;  %v2782_v35 = vsub.f32 1.0, %v2781_v57 }
0x1245   :  { %v2783_v4 = vmul.f32 %v3388_v54, %v2782_v35  ;;  %2844 = vmatmul.f32.gmra.mxu1 %v2799_v25 }
0x1247   :  { %v2784_v11 = vadd.f32 %v3388_v54, %v2783_v4 }
0x1249   :  { %v2788_v61 = vsel %vm2787_vm10, %v3388_v54, %v2784_v11 }
0x124a   :  { %v2793_v50 = vsel %vm2790_vm0, %v2792_v7, %v2788_v61 }
0x124b   :  { %v2800_v29 = vmul.f32 %v2793_v50, %v2673_v58 }
0x124d   :  { %2846 = vmatmul.f32.gmra.mxu1 %v2800_v29 }
0x12a4   :  { %v2913_v22 = vpop.f32.mrf.mxu0 }
0x12a5   :  { %2917 = vst.msk [vmem:[#allocation2] sm:$0x3] %vm2916_vm12, %v2913_v22 }
0x12a6   :  { %2928 = dma.vmem_to_hbm [thread:$0]  %s2924_s23, 32, %s2926_s26, [#allocation3]  }
0x12c2   :  { %v2845_v3 = vpop.f32.mrf.mxu1 }
0x12ca   :  { %v2847_v41 = vpop.f32.mrf.mxu1 }
0x12cb   :  { %3419 = dma.done.wait [#allocation3], 32  }
0x12cc   :  { %3420 = vsyncadd [#allocation3], 4294967264 }
0x12cd   :  { %2933 = vsyncpa [#allocation3], 1 }

</bundles_post_ra>
